<compile_context>
chip_gen: v5e
topology: v5e:2x2
jax: 0.10.0
libtpu: 0.0.40
codegen_flags: <defaults>
</compile_context>

<pallas_src>
import functools

import jax
import jax.numpy as jnp
import numpy as np
from jax import lax
from jax.experimental import pallas as pl
from jax.experimental.pallas import tpu as pltpu

# ---- synthetic config (small shapes consistent with the module) -------------
SEQ = 50           # h36m_input_length_dct — hard-coded 50 in the module
DIM = 24           # config.motion.dim (H36M uses 66; small synthetic value)
B = 2              # batch
NUM_LAYERS = 4     # config.motion_mlp.num_layers (small synthetic value)
LN_EPS = 1e-5
PAD_N = 128        # lane-dense width for the output-side matmuls / stores

# bf16 operands -> single-pass MXU matmuls on v5e/v6e/v7x; f32 accumulation.
MATMUL_DTYPE = jnp.bfloat16


def _mm(a, b):
    # .astype on an already-bf16 weight is a trace-time no-op.
    return jnp.dot(a.astype(MATMUL_DTYPE), b.astype(MATMUL_DTYPE),
                   preferred_element_type=jnp.float32)


def gcnext_kernel(x_ref, win_ref, bin_ref, inw_ref, fcw_ref, fcb_ref,
                  lng_ref, lnb_ref, wout_ref, bout_ref, outw_ref, o_ref,
                  *, bb, apply_inw, apply_outw, add_fcb, apply_ln_affine):
    # Load / broadcast the shared params ONCE (JAX does not CSE
    # broadcast_in_dim, so hoisting avoids re-materialising them per chain).
    win = win_ref[...]                                           # (DIM, DIM)
    bin_ = bin_ref[...]                                          # (1, DIM)
    inw = inw_ref[...] if apply_inw else None                    # (SEQ, SEQ)
    wout = wout_ref[...]                                         # (DIM, PAD_N)
    bout = bout_ref[...]                                         # (1, PAD_N)
    outw = outw_ref[...] if apply_outw else None                 # (SEQ, SEQ)
    fcw = [fcw_ref[l] for l in range(NUM_LAYERS)]                # (SEQ, SEQ)
    fcb = [fcb_ref[l] for l in range(NUM_LAYERS)] if add_fcb else None
    lng = [lng_ref[l] for l in range(NUM_LAYERS)] if apply_ln_affine else None
    lnb = [lnb_ref[l] for l in range(NUM_LAYERS)] if apply_ln_affine else None

    # TODO(synk): dynamic UniGC graph-conv branch (gumbel-softmax over mlp,
    # if_make_dynamic, tau) not implemented — static base branch only.
    for b in range(bb):
        xb = x_ref[b]                                            # (SEQ, DIM)

        # motion_fc_in (Linear over feature dim); weight pre-transposed on host.
        h = _mm(xb, win) + bin_                                  # (SEQ, DIM)

        # arr0 fused with einsum('bvt,tj->bvj', ., in_weight): in (SEQ, DIM)
        # layout this is in_weight.T @ h.  Skipped when in_weight == eye(50).
        if apply_inw:
            h = _mm(inw, h)                                      # (SEQ, DIM)

        # Static base branch of the dynamic layers: Temporal_FC + spatial LN
        # + residual.
        for l in range(NUM_LAYERS):
            # TODO(synk): for the real 48-layer config convert this static
            # unroll to lax.fori_loop with dynamic fcw_ref[l] indexing.
            y = _mm(fcw[l], h)                                   # (SEQ, DIM)
            if add_fcb:
                y = y + fcb[l]
            # one-pass LayerNorm over the feature (lane) axis
            m1 = jnp.mean(y, axis=1, keepdims=True)
            m2 = jnp.mean(y * y, axis=1, keepdims=True)
            var = jnp.maximum(m2 - m1 * m1, 0.0)
            yn = (y - m1) * lax.rsqrt(var + LN_EPS)
            if apply_ln_affine:
                yn = yn * lng[l] + lnb[l]
            h = h + yn

        # arr1 fused with motion_fc_out; weight/bias zero-padded on the host to
        # PAD_N lanes -> lane-dense (unmasked) stores.
        g = _mm(h, wout) + bout                                  # (SEQ, PAD_N)

        # einsum('btv,tj->bjv', ., out_weight) == out_weight.T @ g.
        if apply_outw:
            g = _mm(outw, g)                                     # (SEQ, PAD_N)

        o_ref[b] = g


def _full_spec(shape):
    """Whole-array block, constant index map (resident across the grid)."""
    nd = len(shape)
    return pl.BlockSpec(shape, lambda i, _nd=nd: (0,) * _nd)


def _default_use_batch_grid():
    # Split the 2 independent batch chains across the 2 TensorCores on v7x;
    # keep the single-shot form on 1-TC chips (v5e/v6e).
    try:
        return "v7" in jax.devices()[0].device_kind.lower()
    except Exception:
        return False


def prepare_params(p, use_batch_grid=None):
    """One-time host-side prep: transpose / pad / cast weights, decide the
    static skip flags (exact equality), and return a jitted forward fn."""
    if use_batch_grid is None:
        use_batch_grid = _default_use_batch_grid()

    # --- static trace-time checks (exact, done once) --------------------------
    eye = np.eye(SEQ, dtype=np.float32)
    apply_inw = not np.array_equal(np.asarray(p['inw']), eye)
    apply_outw = not np.array_equal(np.asarray(p['outw']), eye)
    add_fcb = bool(np.any(np.asarray(p['fcb']) != 0.0))
    apply_ln_affine = (not np.all(np.asarray(p['lng']) == 1.0)) or \
                      bool(np.any(np.asarray(p['lnb']) != 0.0))

    # --- host-side param prep: natural (K,N) orientation, lane pad, bf16 cast -
    wd = MATMUL_DTYPE
    win_t = jnp.asarray(p['win'].T, wd)                          # (DIM, DIM)
    bin_ = jnp.asarray(p['bin'], jnp.float32)                    # (1, DIM)
    inw_t = jnp.asarray(p['inw'].T, wd)                          # (SEQ, SEQ)
    outw_t = jnp.asarray(p['outw'].T, wd)                        # (SEQ, SEQ)
    fcw = jnp.asarray(p['fcw'], wd)                              # (L, SEQ, SEQ)
    fcb = jnp.asarray(jnp.swapaxes(p['fcb'], 1, 2), jnp.float32) # (L, SEQ, 1)
    lng = jnp.asarray(jnp.swapaxes(p['lng'], 1, 2), jnp.float32) # (L, 1, DIM)
    lnb = jnp.asarray(jnp.swapaxes(p['lnb'], 1, 2), jnp.float32) # (L, 1, DIM)
    wout_pad = jnp.zeros((DIM, PAD_N), jnp.float32).at[:, :DIM].set(
        p['wout'].T).astype(wd)                                  # (DIM, PAD_N)
    bout_pad = jnp.zeros((1, PAD_N), jnp.float32).at[:, :DIM].set(
        p['bout'])                                               # (1, PAD_N)

    grid_b = B if use_batch_grid else 1
    bb = B // grid_b

    kernel = functools.partial(
        gcnext_kernel, bb=bb, apply_inw=apply_inw, apply_outw=apply_outw,
        add_fcb=add_fcb, apply_ln_affine=apply_ln_affine)

    weight_specs = [
        _full_spec(win_t.shape), _full_spec(bin_.shape), _full_spec(inw_t.shape),
        _full_spec(fcw.shape), _full_spec(fcb.shape), _full_spec(lng.shape),
        _full_spec(lnb.shape), _full_spec(wout_pad.shape),
        _full_spec(bout_pad.shape), _full_spec(outw_t.shape),
    ]
    call = pl.pallas_call(
        kernel,
        out_shape=jax.ShapeDtypeStruct((B, SEQ, PAD_N), jnp.float32),
        grid=(grid_b,),
        in_specs=[pl.BlockSpec((bb, SEQ, DIM), lambda i: (i, 0, 0))] + weight_specs,
        out_specs=pl.BlockSpec((bb, SEQ, PAD_N), lambda i: (i, 0, 0)),
        compiler_params=pltpu.CompilerParams(
            dimension_semantics=("parallel",) if use_batch_grid else ("arbitrary",)),
    )

    @jax.jit
    def forward(x):
        out_pad = call(x, win_t, bin_, inw_t, fcw, fcb, lng, lnb,
                       wout_pad, bout_pad, outw_t)
        return out_pad[:, :, :DIM]

    return forward


def init_params(key):
    ks = jax.random.split(key, 5)
    # motion_fc_in: default nn.Linear init (uniform +-1/sqrt(fan_in))
    s_in = 1.0 / np.sqrt(DIM)
    win = jax.random.uniform(ks[0], (DIM, DIM), jnp.float32, -s_in, s_in)
    bin_ = jax.random.uniform(ks[1], (1, DIM), jnp.float32, -s_in, s_in)
    inw = jnp.eye(SEQ, dtype=jnp.float32)                        # in_weight = eye(50)
    # dynamic-layer Temporal_FC: xavier_uniform(gain=1e-8), bias 0
    xav_fc = 1e-8 * np.sqrt(6.0 / (SEQ + SEQ))
    fcw = jax.random.uniform(ks[2], (NUM_LAYERS, SEQ, SEQ), jnp.float32, -xav_fc, xav_fc)
    fcb = jnp.zeros((NUM_LAYERS, 1, SEQ), jnp.float32)
    lng = jnp.ones((NUM_LAYERS, DIM, 1), jnp.float32)
    lnb = jnp.zeros((NUM_LAYERS, DIM, 1), jnp.float32)
    # motion_fc_out: xavier_uniform(gain=1e-8), bias 0 (reset_parameters)
    xav_out = 1e-8 * np.sqrt(6.0 / (DIM + DIM))
    wout = jax.random.uniform(ks[3], (DIM, DIM), jnp.float32, -xav_out, xav_out)
    bout = jnp.zeros((1, DIM), jnp.float32)
    outw = jnp.eye(SEQ, dtype=jnp.float32)                       # out_weight = eye(50)
    # self.mlp (50, 4) xavier gain 1e-8 — only used by the dynamic branch (TODO above)
    xav_mlp = 1e-8 * np.sqrt(6.0 / (SEQ + 4))
    mlp = jax.random.uniform(ks[4], (SEQ, 4), jnp.float32, -xav_mlp, xav_mlp)
    return dict(win=win, bin=bin_, inw=inw, fcw=fcw, fcb=fcb,
                lng=lng, lnb=lnb, wout=wout, bout=bout, outw=outw, mlp=mlp)


def gcnext_ref(x, p):
    """Pure-JAX (f32) reference mirroring the PyTorch module's forward pass."""
    h = jnp.einsum('btd,vd->btv', x, p['win']) + p['bin']        # (B, SEQ, DIM)
    h = jnp.swapaxes(h, 1, 2)                                    # (B, DIM, SEQ)
    h = jnp.einsum('bvt,tj->bvj', h, p['inw'])
    for l in range(NUM_LAYERS):
        y = jnp.einsum('bvs,ts->bvt', h, p['fcw'][l]) + p['fcb'][l]
        mu = y.mean(axis=1, keepdims=True)
        var = ((y - mu) ** 2).mean(axis=1, keepdims=True)
        yn = (y - mu) / jnp.sqrt(var + LN_EPS)
        yn = yn * p['lng'][l] + p['lnb'][l]
        h = h + yn
    h = jnp.swapaxes(h, 1, 2)                                    # (B, SEQ, DIM)
    h = jnp.einsum('btv,uv->btu', h, p['wout']) + p['bout']
    return jnp.einsum('btv,tj->bjv', h, p['outw'])


if __name__ == "__main__":
    key = jax.random.PRNGKey(0)
    kx, kp, kn = jax.random.split(key, 3)
    x = jax.random.normal(kx, (B, SEQ, DIM), dtype=jnp.float32)
    params = init_params(kp)

    # Case 1: module defaults — identity in/out graph weights, zero biases,
    # unit gammas: kernel statically skips all of them.
    fwd = prepare_params(params)
    out = jax.block_until_ready(fwd(x))
    ref = gcnext_ref(x, params)
    assert out.shape == (B, SEQ, DIM)
    np.testing.assert_allclose(np.asarray(out), np.asarray(ref), rtol=2e-2, atol=1e-9)

    # Case 2: trained-like params — non-identity graph weights and non-trivial
    # affines: exercises every kernel branch.
    ks = jax.random.split(kn, 5)
    params2 = dict(params)
    params2['inw'] = params['inw'] + 0.02 * jax.random.normal(ks[0], (SEQ, SEQ), jnp.float32)
    params2['outw'] = params['outw'] + 0.02 * jax.random.normal(ks[1], (SEQ, SEQ), jnp.float32)
    params2['fcb'] = 0.02 * jax.random.normal(ks[2], (NUM_LAYERS, 1, SEQ), jnp.float32)
    params2['lng'] = 1.0 + 0.02 * jax.random.normal(ks[3], (NUM_LAYERS, DIM, 1), jnp.float32)
    params2['lnb'] = 0.02 * jax.random.normal(ks[4], (NUM_LAYERS, DIM, 1), jnp.float32)
    fwd2 = prepare_params(params2)
    out2 = jax.block_until_ready(fwd2(x))
    ref2 = gcnext_ref(x, params2)
    np.testing.assert_allclose(np.asarray(out2), np.asarray(ref2), rtol=2e-2, atol=1e-9)

    print("KERNEL_OK")
</pallas_src>

<mosaic_0001>
module attributes {stable_mosaic.version = 11 : i64} {
  func.func @gcnext_kernel(%arg0: i32, %arg1: memref<2x50x24xf32, #tpu.memory_space<vmem>>, %arg2: memref<24x24xbf16, #tpu.memory_space<vmem>>, %arg3: memref<1x24xf32, #tpu.memory_space<vmem>>, %arg4: memref<50x50xbf16, #tpu.memory_space<vmem>>, %arg5: memref<4x50x50xbf16, #tpu.memory_space<vmem>>, %arg6: memref<4x50x1xf32, #tpu.memory_space<vmem>>, %arg7: memref<4x1x24xf32, #tpu.memory_space<vmem>>, %arg8: memref<4x1x24xf32, #tpu.memory_space<vmem>>, %arg9: memref<24x128xbf16, #tpu.memory_space<vmem>>, %arg10: memref<1x128xf32, #tpu.memory_space<vmem>>, %arg11: memref<50x50xbf16, #tpu.memory_space<vmem>>, %arg12: memref<2x50x128xf32, #tpu.memory_space<vmem>>) attributes {dimension_semantics = [#tpu.dimension_semantics<arbitrary>], iteration_bounds = array<i64: 1>, scalar_prefetch = 0 : i64, scratch_operands = 0 : i64, tpu.core_type = #tpu.core_type<tc>, window_params = [{transform_indices = @transform_0, window_bounds = array<i64: 2, 50, 24>}, {pipeline_mode = #tpu.pipeline_mode<synchronous>, transform_indices = @transform_1, window_bounds = array<i64: 24, 24>}, {pipeline_mode = #tpu.pipeline_mode<synchronous>, transform_indices = @transform_2, window_bounds = array<i64: 1, 24>}, {pipeline_mode = #tpu.pipeline_mode<synchronous>, transform_indices = @transform_3, window_bounds = array<i64: 50, 50>}, {pipeline_mode = #tpu.pipeline_mode<synchronous>, transform_indices = @transform_4, window_bounds = array<i64: 4, 50, 50>}, {pipeline_mode = #tpu.pipeline_mode<synchronous>, transform_indices = @transform_5, window_bounds = array<i64: 4, 50, 1>}, {pipeline_mode = #tpu.pipeline_mode<synchronous>, transform_indices = @transform_6, window_bounds = array<i64: 4, 1, 24>}, {pipeline_mode = #tpu.pipeline_mode<synchronous>, transform_indices = @transform_7, window_bounds = array<i64: 4, 1, 24>}, {pipeline_mode = #tpu.pipeline_mode<synchronous>, transform_indices = @transform_8, window_bounds = array<i64: 24, 128>}, {pipeline_mode = #tpu.pipeline_mode<synchronous>, transform_indices = @transform_9, window_bounds = array<i64: 1, 128>}, {pipeline_mode = #tpu.pipeline_mode<synchronous>, transform_indices = @transform_10, window_bounds = array<i64: 50, 50>}, {transform_indices = @transform_11, window_bounds = array<i64: 2, 50, 128>}]} {
    %c0 = arith.constant 0 : index
    %c0_0 = arith.constant 0 : index
    %0 = vector.load %arg2[%c0, %c0_0] : memref<24x24xbf16, #tpu.memory_space<vmem>>, vector<24x24xbf16>
    %c0_1 = arith.constant 0 : index
    %c0_2 = arith.constant 0 : index
    %1 = vector.load %arg3[%c0_1, %c0_2] : memref<1x24xf32, #tpu.memory_space<vmem>>, vector<1x24xf32>
    %c0_3 = arith.constant 0 : index
    %c0_4 = arith.constant 0 : index
    %2 = vector.load %arg9[%c0_3, %c0_4] : memref<24x128xbf16, #tpu.memory_space<vmem>>, vector<24x128xbf16>
    %c0_5 = arith.constant 0 : index
    %c0_6 = arith.constant 0 : index
    %3 = vector.load %arg10[%c0_5, %c0_6] : memref<1x128xf32, #tpu.memory_space<vmem>>, vector<1x128xf32>
    %c0_7 = arith.constant 0 : index
    %c0_8 = arith.constant 0 : index
    %c0_9 = arith.constant 0 : index
    %4 = vector.load %arg5[%c0_7, %c0_8, %c0_9] : memref<4x50x50xbf16, #tpu.memory_space<vmem>>, vector<1x50x50xbf16>
    %5 = vector.shape_cast %4 : vector<1x50x50xbf16> to vector<50x50xbf16>
    %c1 = arith.constant 1 : index
    %c0_10 = arith.constant 0 : index
    %c0_11 = arith.constant 0 : index
    %6 = vector.load %arg5[%c1, %c0_10, %c0_11] : memref<4x50x50xbf16, #tpu.memory_space<vmem>>, vector<1x50x50xbf16>
    %7 = vector.shape_cast %6 : vector<1x50x50xbf16> to vector<50x50xbf16>
    %c2 = arith.constant 2 : index
    %c0_12 = arith.constant 0 : index
    %c0_13 = arith.constant 0 : index
    %8 = vector.load %arg5[%c2, %c0_12, %c0_13] : memref<4x50x50xbf16, #tpu.memory_space<vmem>>, vector<1x50x50xbf16>
    %9 = vector.shape_cast %8 : vector<1x50x50xbf16> to vector<50x50xbf16>
    %c3 = arith.constant 3 : index
    %c0_14 = arith.constant 0 : index
    %c0_15 = arith.constant 0 : index
    %10 = vector.load %arg5[%c3, %c0_14, %c0_15] : memref<4x50x50xbf16, #tpu.memory_space<vmem>>, vector<1x50x50xbf16>
    %11 = vector.shape_cast %10 : vector<1x50x50xbf16> to vector<50x50xbf16>
    %c0_16 = arith.constant 0 : index
    %c0_17 = arith.constant 0 : index
    %c0_18 = arith.constant 0 : index
    %12 = vector.load %arg1[%c0_16, %c0_17, %c0_18] : memref<2x50x24xf32, #tpu.memory_space<vmem>>, vector<1x50x24xf32>
    %13 = vector.shape_cast %12 : vector<1x50x24xf32> to vector<50x24xf32>
    %14 = arith.truncf %13 : vector<50x24xf32> to vector<50x24xbf16>
    %cst = arith.constant dense<0.000000e+00> : vector<50x24xf32>
    %15 = tpu.matmul %14, %0, %cst {dimension_numbers = #tpu.dot_dimension_numbers<[1], [0], [0], [1], [0, 0, 1, 1], [], []>} : vector<50x24xbf16>, vector<24x24xbf16>, vector<50x24xf32> -> vector<50x24xf32>
    %16 = vector.broadcast %1 : vector<1x24xf32> to vector<50x24xf32>
    %17 = arith.addf %15, %16 : vector<50x24xf32>
    %18 = arith.truncf %17 : vector<50x24xf32> to vector<50x24xbf16>
    %cst_19 = arith.constant dense<0.000000e+00> : vector<50x24xf32>
    %19 = tpu.matmul %5, %18, %cst_19 {dimension_numbers = #tpu.dot_dimension_numbers<[1], [0], [0], [1], [0, 0, 1, 1], [], []>} : vector<50x50xbf16>, vector<50x24xbf16>, vector<50x24xf32> -> vector<50x24xf32>
    %cst_20 = arith.constant dense<0.000000e+00> : vector<50xf32>
    %20 = vector.multi_reduction <add>, %19, %cst_20 [1] : vector<50x24xf32> to vector<50xf32>
    %21 = vector.shape_cast %20 : vector<50xf32> to vector<50x1xf32>
    %cst_21 = arith.constant 2.400000e+01 : f32
    %22 = vector.broadcast %cst_21 : f32 to vector<50x1xf32>
    %23 = arith.divf %21, %22 : vector<50x1xf32>
    %24 = arith.mulf %19, %19 : vector<50x24xf32>
    %cst_22 = arith.constant dense<0.000000e+00> : vector<50xf32>
    %25 = vector.multi_reduction <add>, %24, %cst_22 [1] : vector<50x24xf32> to vector<50xf32>
    %26 = vector.shape_cast %25 : vector<50xf32> to vector<50x1xf32>
    %cst_23 = arith.constant 2.400000e+01 : f32
    %27 = vector.broadcast %cst_23 : f32 to vector<50x1xf32>
    %28 = arith.divf %26, %27 : vector<50x1xf32>
    %29 = arith.mulf %23, %23 : vector<50x1xf32>
    %30 = arith.subf %28, %29 : vector<50x1xf32>
    %cst_24 = arith.constant 0.000000e+00 : f32
    %31 = vector.broadcast %cst_24 : f32 to vector<50x1xf32>
    %32 = arith.maximumf %30, %31 : vector<50x1xf32>
    %33 = vector.broadcast %23 : vector<50x1xf32> to vector<50x24xf32>
    %34 = arith.subf %19, %33 : vector<50x24xf32>
    %cst_25 = arith.constant 9.99999974E-6 : f32
    %35 = vector.broadcast %cst_25 : f32 to vector<50x1xf32>
    %36 = arith.addf %32, %35 : vector<50x1xf32>
    %37 = math.rsqrt %36 : vector<50x1xf32>
    %38 = vector.broadcast %37 : vector<50x1xf32> to vector<50x24xf32>
    %39 = arith.mulf %34, %38 : vector<50x24xf32>
    %40 = arith.addf %17, %39 : vector<50x24xf32>
    %41 = arith.truncf %40 : vector<50x24xf32> to vector<50x24xbf16>
    %cst_26 = arith.constant dense<0.000000e+00> : vector<50x24xf32>
    %42 = tpu.matmul %7, %41, %cst_26 {dimension_numbers = #tpu.dot_dimension_numbers<[1], [0], [0], [1], [0, 0, 1, 1], [], []>} : vector<50x50xbf16>, vector<50x24xbf16>, vector<50x24xf32> -> vector<50x24xf32>
    %cst_27 = arith.constant dense<0.000000e+00> : vector<50xf32>
    %43 = vector.multi_reduction <add>, %42, %cst_27 [1] : vector<50x24xf32> to vector<50xf32>
    %44 = vector.shape_cast %43 : vector<50xf32> to vector<50x1xf32>
    %cst_28 = arith.constant 2.400000e+01 : f32
    %45 = vector.broadcast %cst_28 : f32 to vector<50x1xf32>
    %46 = arith.divf %44, %45 : vector<50x1xf32>
    %47 = arith.mulf %42, %42 : vector<50x24xf32>
    %cst_29 = arith.constant dense<0.000000e+00> : vector<50xf32>
    %48 = vector.multi_reduction <add>, %47, %cst_29 [1] : vector<50x24xf32> to vector<50xf32>
    %49 = vector.shape_cast %48 : vector<50xf32> to vector<50x1xf32>
    %cst_30 = arith.constant 2.400000e+01 : f32
    %50 = vector.broadcast %cst_30 : f32 to vector<50x1xf32>
    %51 = arith.divf %49, %50 : vector<50x1xf32>
    %52 = arith.mulf %46, %46 : vector<50x1xf32>
    %53 = arith.subf %51, %52 : vector<50x1xf32>
    %cst_31 = arith.constant 0.000000e+00 : f32
    %54 = vector.broadcast %cst_31 : f32 to vector<50x1xf32>
    %55 = arith.maximumf %53, %54 : vector<50x1xf32>
    %56 = vector.broadcast %46 : vector<50x1xf32> to vector<50x24xf32>
    %57 = arith.subf %42, %56 : vector<50x24xf32>
    %cst_32 = arith.constant 9.99999974E-6 : f32
    %58 = vector.broadcast %cst_32 : f32 to vector<50x1xf32>
    %59 = arith.addf %55, %58 : vector<50x1xf32>
    %60 = math.rsqrt %59 : vector<50x1xf32>
    %61 = vector.broadcast %60 : vector<50x1xf32> to vector<50x24xf32>
    %62 = arith.mulf %57, %61 : vector<50x24xf32>
    %63 = arith.addf %40, %62 : vector<50x24xf32>
    %64 = arith.truncf %63 : vector<50x24xf32> to vector<50x24xbf16>
    %cst_33 = arith.constant dense<0.000000e+00> : vector<50x24xf32>
    %65 = tpu.matmul %9, %64, %cst_33 {dimension_numbers = #tpu.dot_dimension_numbers<[1], [0], [0], [1], [0, 0, 1, 1], [], []>} : vector<50x50xbf16>, vector<50x24xbf16>, vector<50x24xf32> -> vector<50x24xf32>
    %cst_34 = arith.constant dense<0.000000e+00> : vector<50xf32>
    %66 = vector.multi_reduction <add>, %65, %cst_34 [1] : vector<50x24xf32> to vector<50xf32>
    %67 = vector.shape_cast %66 : vector<50xf32> to vector<50x1xf32>
    %cst_35 = arith.constant 2.400000e+01 : f32
    %68 = vector.broadcast %cst_35 : f32 to vector<50x1xf32>
    %69 = arith.divf %67, %68 : vector<50x1xf32>
    %70 = arith.mulf %65, %65 : vector<50x24xf32>
    %cst_36 = arith.constant dense<0.000000e+00> : vector<50xf32>
    %71 = vector.multi_reduction <add>, %70, %cst_36 [1] : vector<50x24xf32> to vector<50xf32>
    %72 = vector.shape_cast %71 : vector<50xf32> to vector<50x1xf32>
    %cst_37 = arith.constant 2.400000e+01 : f32
    %73 = vector.broadcast %cst_37 : f32 to vector<50x1xf32>
    %74 = arith.divf %72, %73 : vector<50x1xf32>
    %75 = arith.mulf %69, %69 : vector<50x1xf32>
    %76 = arith.subf %74, %75 : vector<50x1xf32>
    %cst_38 = arith.constant 0.000000e+00 : f32
    %77 = vector.broadcast %cst_38 : f32 to vector<50x1xf32>
    %78 = arith.maximumf %76, %77 : vector<50x1xf32>
    %79 = vector.broadcast %69 : vector<50x1xf32> to vector<50x24xf32>
    %80 = arith.subf %65, %79 : vector<50x24xf32>
    %cst_39 = arith.constant 9.99999974E-6 : f32
    %81 = vector.broadcast %cst_39 : f32 to vector<50x1xf32>
    %82 = arith.addf %78, %81 : vector<50x1xf32>
    %83 = math.rsqrt %82 : vector<50x1xf32>
    %84 = vector.broadcast %83 : vector<50x1xf32> to vector<50x24xf32>
    %85 = arith.mulf %80, %84 : vector<50x24xf32>
    %86 = arith.addf %63, %85 : vector<50x24xf32>
    %87 = arith.truncf %86 : vector<50x24xf32> to vector<50x24xbf16>
    %cst_40 = arith.constant dense<0.000000e+00> : vector<50x24xf32>
    %88 = tpu.matmul %11, %87, %cst_40 {dimension_numbers = #tpu.dot_dimension_numbers<[1], [0], [0], [1], [0, 0, 1, 1], [], []>} : vector<50x50xbf16>, vector<50x24xbf16>, vector<50x24xf32> -> vector<50x24xf32>
    %cst_41 = arith.constant dense<0.000000e+00> : vector<50xf32>
    %89 = vector.multi_reduction <add>, %88, %cst_41 [1] : vector<50x24xf32> to vector<50xf32>
    %90 = vector.shape_cast %89 : vector<50xf32> to vector<50x1xf32>
    %cst_42 = arith.constant 2.400000e+01 : f32
    %91 = vector.broadcast %cst_42 : f32 to vector<50x1xf32>
    %92 = arith.divf %90, %91 : vector<50x1xf32>
    %93 = arith.mulf %88, %88 : vector<50x24xf32>
    %cst_43 = arith.constant dense<0.000000e+00> : vector<50xf32>
    %94 = vector.multi_reduction <add>, %93, %cst_43 [1] : vector<50x24xf32> to vector<50xf32>
    %95 = vector.shape_cast %94 : vector<50xf32> to vector<50x1xf32>
    %cst_44 = arith.constant 2.400000e+01 : f32
    %96 = vector.broadcast %cst_44 : f32 to vector<50x1xf32>
    %97 = arith.divf %95, %96 : vector<50x1xf32>
    %98 = arith.mulf %92, %92 : vector<50x1xf32>
    %99 = arith.subf %97, %98 : vector<50x1xf32>
    %cst_45 = arith.constant 0.000000e+00 : f32
    %100 = vector.broadcast %cst_45 : f32 to vector<50x1xf32>
    %101 = arith.maximumf %99, %100 : vector<50x1xf32>
    %102 = vector.broadcast %92 : vector<50x1xf32> to vector<50x24xf32>
    %103 = arith.subf %88, %102 : vector<50x24xf32>
    %cst_46 = arith.constant 9.99999974E-6 : f32
    %104 = vector.broadcast %cst_46 : f32 to vector<50x1xf32>
    %105 = arith.addf %101, %104 : vector<50x1xf32>
    %106 = math.rsqrt %105 : vector<50x1xf32>
    %107 = vector.broadcast %106 : vector<50x1xf32> to vector<50x24xf32>
    %108 = arith.mulf %103, %107 : vector<50x24xf32>
    %109 = arith.addf %86, %108 : vector<50x24xf32>
    %110 = arith.truncf %109 : vector<50x24xf32> to vector<50x24xbf16>
    %cst_47 = arith.constant dense<0.000000e+00> : vector<50x128xf32>
    %111 = tpu.matmul %110, %2, %cst_47 {dimension_numbers = #tpu.dot_dimension_numbers<[1], [0], [0], [1], [0, 0, 1, 1], [], []>} : vector<50x24xbf16>, vector<24x128xbf16>, vector<50x128xf32> -> vector<50x128xf32>
    %112 = vector.broadcast %3 : vector<1x128xf32> to vector<50x128xf32>
    %113 = arith.addf %111, %112 : vector<50x128xf32>
    %c0_48 = arith.constant 0 : index
    %c0_49 = arith.constant 0 : index
    %c0_50 = arith.constant 0 : index
    %114 = vector.load %arg12[%c0_48, %c0_49, %c0_50] : memref<2x50x128xf32, #tpu.memory_space<vmem>>, vector<1x50x128xf32>
    %115 = vector.shape_cast %114 : vector<1x50x128xf32> to vector<50x128xf32>
    %116 = vector.shape_cast %113 : vector<50x128xf32> to vector<1x50x128xf32>
    tpu.vector_store %arg12[%c0_48, %c0_49, %c0_50], %116 {strides = array<i32>} : memref<2x50x128xf32, #tpu.memory_space<vmem>>, vector<1x50x128xf32>,
    %c1_51 = arith.constant 1 : index
    %c0_52 = arith.constant 0 : index
    %c0_53 = arith.constant 0 : index
    %117 = vector.load %arg1[%c1_51, %c0_52, %c0_53] : memref<2x50x24xf32, #tpu.memory_space<vmem>>, vector<1x50x24xf32>
    %118 = vector.shape_cast %117 : vector<1x50x24xf32> to vector<50x24xf32>
    %119 = arith.truncf %118 : vector<50x24xf32> to vector<50x24xbf16>
    %cst_54 = arith.constant dense<0.000000e+00> : vector<50x24xf32>
    %120 = tpu.matmul %119, %0, %cst_54 {dimension_numbers = #tpu.dot_dimension_numbers<[1], [0], [0], [1], [0, 0, 1, 1], [], []>} : vector<50x24xbf16>, vector<24x24xbf16>, vector<50x24xf32> -> vector<50x24xf32>
    %121 = vector.broadcast %1 : vector<1x24xf32> to vector<50x24xf32>
    %122 = arith.addf %120, %121 : vector<50x24xf32>
    %123 = arith.truncf %122 : vector<50x24xf32> to vector<50x24xbf16>
    %cst_55 = arith.constant dense<0.000000e+00> : vector<50x24xf32>
    %124 = tpu.matmul %5, %123, %cst_55 {dimension_numbers = #tpu.dot_dimension_numbers<[1], [0], [0], [1], [0, 0, 1, 1], [], []>} : vector<50x50xbf16>, vector<50x24xbf16>, vector<50x24xf32> -> vector<50x24xf32>
    %cst_56 = arith.constant dense<0.000000e+00> : vector<50xf32>
    %125 = vector.multi_reduction <add>, %124, %cst_56 [1] : vector<50x24xf32> to vector<50xf32>
    %126 = vector.shape_cast %125 : vector<50xf32> to vector<50x1xf32>
    %cst_57 = arith.constant 2.400000e+01 : f32
    %127 = vector.broadcast %cst_57 : f32 to vector<50x1xf32>
    %128 = arith.divf %126, %127 : vector<50x1xf32>
    %129 = arith.mulf %124, %124 : vector<50x24xf32>
    %cst_58 = arith.constant dense<0.000000e+00> : vector<50xf32>
    %130 = vector.multi_reduction <add>, %129, %cst_58 [1] : vector<50x24xf32> to vector<50xf32>
    %131 = vector.shape_cast %130 : vector<50xf32> to vector<50x1xf32>
    %cst_59 = arith.constant 2.400000e+01 : f32
    %132 = vector.broadcast %cst_59 : f32 to vector<50x1xf32>
    %133 = arith.divf %131, %132 : vector<50x1xf32>
    %134 = arith.mulf %128, %128 : vector<50x1xf32>
    %135 = arith.subf %133, %134 : vector<50x1xf32>
    %cst_60 = arith.constant 0.000000e+00 : f32
    %136 = vector.broadcast %cst_60 : f32 to vector<50x1xf32>
    %137 = arith.maximumf %135, %136 : vector<50x1xf32>
    %138 = vector.broadcast %128 : vector<50x1xf32> to vector<50x24xf32>
    %139 = arith.subf %124, %138 : vector<50x24xf32>
    %cst_61 = arith.constant 9.99999974E-6 : f32
    %140 = vector.broadcast %cst_61 : f32 to vector<50x1xf32>
    %141 = arith.addf %137, %140 : vector<50x1xf32>
    %142 = math.rsqrt %141 : vector<50x1xf32>
    %143 = vector.broadcast %142 : vector<50x1xf32> to vector<50x24xf32>
    %144 = arith.mulf %139, %143 : vector<50x24xf32>
    %145 = arith.addf %122, %144 : vector<50x24xf32>
    %146 = arith.truncf %145 : vector<50x24xf32> to vector<50x24xbf16>
    %cst_62 = arith.constant dense<0.000000e+00> : vector<50x24xf32>
    %147 = tpu.matmul %7, %146, %cst_62 {dimension_numbers = #tpu.dot_dimension_numbers<[1], [0], [0], [1], [0, 0, 1, 1], [], []>} : vector<50x50xbf16>, vector<50x24xbf16>, vector<50x24xf32> -> vector<50x24xf32>
    %cst_63 = arith.constant dense<0.000000e+00> : vector<50xf32>
    %148 = vector.multi_reduction <add>, %147, %cst_63 [1] : vector<50x24xf32> to vector<50xf32>
    %149 = vector.shape_cast %148 : vector<50xf32> to vector<50x1xf32>
    %cst_64 = arith.constant 2.400000e+01 : f32
    %150 = vector.broadcast %cst_64 : f32 to vector<50x1xf32>
    %151 = arith.divf %149, %150 : vector<50x1xf32>
    %152 = arith.mulf %147, %147 : vector<50x24xf32>
    %cst_65 = arith.constant dense<0.000000e+00> : vector<50xf32>
    %153 = vector.multi_reduction <add>, %152, %cst_65 [1] : vector<50x24xf32> to vector<50xf32>
    %154 = vector.shape_cast %153 : vector<50xf32> to vector<50x1xf32>
    %cst_66 = arith.constant 2.400000e+01 : f32
    %155 = vector.broadcast %cst_66 : f32 to vector<50x1xf32>
    %156 = arith.divf %154, %155 : vector<50x1xf32>
    %157 = arith.mulf %151, %151 : vector<50x1xf32>
    %158 = arith.subf %156, %157 : vector<50x1xf32>
    %cst_67 = arith.constant 0.000000e+00 : f32
    %159 = vector.broadcast %cst_67 : f32 to vector<50x1xf32>
    %160 = arith.maximumf %158, %159 : vector<50x1xf32>
    %161 = vector.broadcast %151 : vector<50x1xf32> to vector<50x24xf32>
    %162 = arith.subf %147, %161 : vector<50x24xf32>
    %cst_68 = arith.constant 9.99999974E-6 : f32
    %163 = vector.broadcast %cst_68 : f32 to vector<50x1xf32>
    %164 = arith.addf %160, %163 : vector<50x1xf32>
    %165 = math.rsqrt %164 : vector<50x1xf32>
    %166 = vector.broadcast %165 : vector<50x1xf32> to vector<50x24xf32>
    %167 = arith.mulf %162, %166 : vector<50x24xf32>
    %168 = arith.addf %145, %167 : vector<50x24xf32>
    %169 = arith.truncf %168 : vector<50x24xf32> to vector<50x24xbf16>
    %cst_69 = arith.constant dense<0.000000e+00> : vector<50x24xf32>
    %170 = tpu.matmul %9, %169, %cst_69 {dimension_numbers = #tpu.dot_dimension_numbers<[1], [0], [0], [1], [0, 0, 1, 1], [], []>} : vector<50x50xbf16>, vector<50x24xbf16>, vector<50x24xf32> -> vector<50x24xf32>
    %cst_70 = arith.constant dense<0.000000e+00> : vector<50xf32>
    %171 = vector.multi_reduction <add>, %170, %cst_70 [1] : vector<50x24xf32> to vector<50xf32>
    %172 = vector.shape_cast %171 : vector<50xf32> to vector<50x1xf32>
    %cst_71 = arith.constant 2.400000e+01 : f32
    %173 = vector.broadcast %cst_71 : f32 to vector<50x1xf32>
    %174 = arith.divf %172, %173 : vector<50x1xf32>
    %175 = arith.mulf %170, %170 : vector<50x24xf32>
    %cst_72 = arith.constant dense<0.000000e+00> : vector<50xf32>
    %176 = vector.multi_reduction <add>, %175, %cst_72 [1] : vector<50x24xf32> to vector<50xf32>
    %177 = vector.shape_cast %176 : vector<50xf32> to vector<50x1xf32>
    %cst_73 = arith.constant 2.400000e+01 : f32
    %178 = vector.broadcast %cst_73 : f32 to vector<50x1xf32>
    %179 = arith.divf %177, %178 : vector<50x1xf32>
    %180 = arith.mulf %174, %174 : vector<50x1xf32>
    %181 = arith.subf %179, %180 : vector<50x1xf32>
    %cst_74 = arith.constant 0.000000e+00 : f32
    %182 = vector.broadcast %cst_74 : f32 to vector<50x1xf32>
    %183 = arith.maximumf %181, %182 : vector<50x1xf32>
    %184 = vector.broadcast %174 : vector<50x1xf32> to vector<50x24xf32>
    %185 = arith.subf %170, %184 : vector<50x24xf32>
    %cst_75 = arith.constant 9.99999974E-6 : f32
    %186 = vector.broadcast %cst_75 : f32 to vector<50x1xf32>
    %187 = arith.addf %183, %186 : vector<50x1xf32>
    %188 = math.rsqrt %187 : vector<50x1xf32>
    %189 = vector.broadcast %188 : vector<50x1xf32> to vector<50x24xf32>
    %190 = arith.mulf %185, %189 : vector<50x24xf32>
    %191 = arith.addf %168, %190 : vector<50x24xf32>
    %192 = arith.truncf %191 : vector<50x24xf32> to vector<50x24xbf16>
    %cst_76 = arith.constant dense<0.000000e+00> : vector<50x24xf32>
    %193 = tpu.matmul %11, %192, %cst_76 {dimension_numbers = #tpu.dot_dimension_numbers<[1], [0], [0], [1], [0, 0, 1, 1], [], []>} : vector<50x50xbf16>, vector<50x24xbf16>, vector<50x24xf32> -> vector<50x24xf32>
    %cst_77 = arith.constant dense<0.000000e+00> : vector<50xf32>
    %194 = vector.multi_reduction <add>, %193, %cst_77 [1] : vector<50x24xf32> to vector<50xf32>
    %195 = vector.shape_cast %194 : vector<50xf32> to vector<50x1xf32>
    %cst_78 = arith.constant 2.400000e+01 : f32
    %196 = vector.broadcast %cst_78 : f32 to vector<50x1xf32>
    %197 = arith.divf %195, %196 : vector<50x1xf32>
    %198 = arith.mulf %193, %193 : vector<50x24xf32>
    %cst_79 = arith.constant dense<0.000000e+00> : vector<50xf32>
    %199 = vector.multi_reduction <add>, %198, %cst_79 [1] : vector<50x24xf32> to vector<50xf32>
    %200 = vector.shape_cast %199 : vector<50xf32> to vector<50x1xf32>
    %cst_80 = arith.constant 2.400000e+01 : f32
    %201 = vector.broadcast %cst_80 : f32 to vector<50x1xf32>
    %202 = arith.divf %200, %201 : vector<50x1xf32>
    %203 = arith.mulf %197, %197 : vector<50x1xf32>
    %204 = arith.subf %202, %203 : vector<50x1xf32>
    %cst_81 = arith.constant 0.000000e+00 : f32
    %205 = vector.broadcast %cst_81 : f32 to vector<50x1xf32>
    %206 = arith.maximumf %204, %205 : vector<50x1xf32>
    %207 = vector.broadcast %197 : vector<50x1xf32> to vector<50x24xf32>
    %208 = arith.subf %193, %207 : vector<50x24xf32>
    %cst_82 = arith.constant 9.99999974E-6 : f32
    %209 = vector.broadcast %cst_82 : f32 to vector<50x1xf32>
    %210 = arith.addf %206, %209 : vector<50x1xf32>
    %211 = math.rsqrt %210 : vector<50x1xf32>
    %212 = vector.broadcast %211 : vector<50x1xf32> to vector<50x24xf32>
    %213 = arith.mulf %208, %212 : vector<50x24xf32>
    %214 = arith.addf %191, %213 : vector<50x24xf32>
    %215 = arith.truncf %214 : vector<50x24xf32> to vector<50x24xbf16>
    %cst_83 = arith.constant dense<0.000000e+00> : vector<50x128xf32>
    %216 = tpu.matmul %215, %2, %cst_83 {dimension_numbers = #tpu.dot_dimension_numbers<[1], [0], [0], [1], [0, 0, 1, 1], [], []>} : vector<50x24xbf16>, vector<24x128xbf16>, vector<50x128xf32> -> vector<50x128xf32>
    %217 = vector.broadcast %3 : vector<1x128xf32> to vector<50x128xf32>
    %218 = arith.addf %216, %217 : vector<50x128xf32>
    %c1_84 = arith.constant 1 : index
    %c0_85 = arith.constant 0 : index
    %c0_86 = arith.constant 0 : index
    %219 = vector.load %arg12[%c1_84, %c0_85, %c0_86] : memref<2x50x128xf32, #tpu.memory_space<vmem>>, vector<1x50x128xf32>
    %220 = vector.shape_cast %219 : vector<1x50x128xf32> to vector<50x128xf32>
    %221 = vector.shape_cast %218 : vector<50x128xf32> to vector<1x50x128xf32>
    tpu.vector_store %arg12[%c1_84, %c0_85, %c0_86], %221 {strides = array<i32>} : memref<2x50x128xf32, #tpu.memory_space<vmem>>, vector<1x50x128xf32>,
    return
  }
  func.func @transform_0(%arg0: i32) -> (i32, i32, i32) {
    %c0_i32 = arith.constant 0 : i32
    %c0_i32_0 = arith.constant 0 : i32
    %c0_i32_1 = arith.constant 0 : i32
    return %arg0, %c0_i32, %c0_i32_0 : i32, i32, i32
  }
  func.func @transform_1(%arg0: i32) -> (i32, i32) {
    %c0_i32 = arith.constant 0 : i32
    %c0_i32_0 = arith.constant 0 : i32
    %c0_i32_1 = arith.constant 0 : i32
    return %c0_i32, %c0_i32_0 : i32, i32
  }
  func.func @transform_2(%arg0: i32) -> (i32, i32) {
    %c0_i32 = arith.constant 0 : i32
    %c0_i32_0 = arith.constant 0 : i32
    %c0_i32_1 = arith.constant 0 : i32
    return %c0_i32, %c0_i32_0 : i32, i32
  }
  func.func @transform_3(%arg0: i32) -> (i32, i32) {
    %c0_i32 = arith.constant 0 : i32
    %c0_i32_0 = arith.constant 0 : i32
    %c0_i32_1 = arith.constant 0 : i32
    return %c0_i32, %c0_i32_0 : i32, i32
  }
  func.func @transform_4(%arg0: i32) -> (i32, i32, i32) {
    %c0_i32 = arith.constant 0 : i32
    %c0_i32_0 = arith.constant 0 : i32
    %c0_i32_1 = arith.constant 0 : i32
    %c0_i32_2 = arith.constant 0 : i32
    return %c0_i32, %c0_i32_0, %c0_i32_1 : i32, i32, i32
  }
  func.func @transform_5(%arg0: i32) -> (i32, i32, i32) {
    %c0_i32 = arith.constant 0 : i32
    %c0_i32_0 = arith.constant 0 : i32
    %c0_i32_1 = arith.constant 0 : i32
    %c0_i32_2 = arith.constant 0 : i32
    return %c0_i32, %c0_i32_0, %c0_i32_1 : i32, i32, i32
  }
  func.func @transform_6(%arg0: i32) -> (i32, i32, i32) {
    %c0_i32 = arith.constant 0 : i32
    %c0_i32_0 = arith.constant 0 : i32
    %c0_i32_1 = arith.constant 0 : i32
    %c0_i32_2 = arith.constant 0 : i32
    return %c0_i32, %c0_i32_0, %c0_i32_1 : i32, i32, i32
  }
  func.func @transform_7(%arg0: i32) -> (i32, i32, i32) {
    %c0_i32 = arith.constant 0 : i32
    %c0_i32_0 = arith.constant 0 : i32
    %c0_i32_1 = arith.constant 0 : i32
    %c0_i32_2 = arith.constant 0 : i32
    return %c0_i32, %c0_i32_0, %c0_i32_1 : i32, i32, i32
  }
  func.func @transform_8(%arg0: i32) -> (i32, i32) {
    %c0_i32 = arith.constant 0 : i32
    %c0_i32_0 = arith.constant 0 : i32
    %c0_i32_1 = arith.constant 0 : i32
    return %c0_i32, %c0_i32_0 : i32, i32
  }
  func.func @transform_9(%arg0: i32) -> (i32, i32) {
    %c0_i32 = arith.constant 0 : i32
    %c0_i32_0 = arith.constant 0 : i32
    %c0_i32_1 = arith.constant 0 : i32
    return %c0_i32, %c0_i32_0 : i32, i32
  }
  func.func @transform_10(%arg0: i32) -> (i32, i32) {
    %c0_i32 = arith.constant 0 : i32
    %c0_i32_0 = arith.constant 0 : i32
    %c0_i32_1 = arith.constant 0 : i32
    return %c0_i32, %c0_i32_0 : i32, i32
  }
  func.func @transform_11(%arg0: i32) -> (i32, i32, i32) {
    %c0_i32 = arith.constant 0 : i32
    %c0_i32_0 = arith.constant 0 : i32
    %c0_i32_1 = arith.constant 0 : i32
    return %arg0, %c0_i32, %c0_i32_0 : i32, i32, i32
  }
}

</mosaic_0001>

<bundles_post_ra>
// kernel: forward.1
= control target key start
LH: loop header
LB: loop body
LE: loop exit
PB: predicated region body
PF: predicated region fallthrough
CT: control target
= control target key end

     0   :  { %vm114_vm0 = vcmask 1043456   ;;  %vm101_vm1 = vcmask 195584   ;;  %vm181_vm2 = vcmask 1040384   ;;  %vm168_vm3 = vcmask 408576   ;;  %s4356_s1 = inlined_call_operand.vmem [shape: bf16[24,24], index: 1, kind: input, shape index: {}]   ;;  %s4357_s3 = inlined_call_operand.vmem [shape: bf16[50,50], index: 3, kind: input, shape index: {}, may-alias: {3,10}]   ;;  %s4358_s5 = inlined_call_operand.vmem [shape: f32[4,50,1], index: 5, kind: input, shape index: {}]   ;;  %s4359_s6 = inlined_call_operand.vmem [shape: f32[4,1,24], index: 6, kind: input, shape index: {}]   ;;  %s4360_s7 = inlined_call_operand.vmem [shape: f32[4,1,24], index: 7, kind: input, shape index: {}]   ;;  %s4361_s10 = inlined_call_operand.vmem [shape: bf16[50,50], index: 10, kind: input, shape index: {}, may-alias: {3,10}]   ;;  %s4362_s2 = inlined_call_operand.vmem [shape: f32[1,24], index: 2, kind: input, shape index: {}]   ;;  %s4363_s0 = inlined_call_operand.vmem [shape: f32[2,50,24], index: 0, kind: input, shape index: {}]   ;;  %s4364_s4 = inlined_call_operand.vmem [shape: bf16[4,50,50], index: 4, kind: input, shape index: {}]   ;;  %s4365_s8 = inlined_call_operand.vmem [shape: bf16[24,128], index: 8, kind: input, shape index: {}]   ;;  %s4366_s9 = inlined_call_operand.vmem [shape: f32[1,128], index: 9, kind: input, shape index: {}]   ;;  %s4367_s11 = inlined_call_operand.vmem [shape: f32[2,50,128], index: 11, kind: output, shape index: {}]  }
   0x1   :  { %v41_v0 = vld [vmem:[%s4356_s1 + $0x8] sm:$0xf]  ;;  %v2536_v4 = vld [vmem:[%s4356_s1] sm:$0xff]  ;;  %v80_v8 = vld [vmem:[%s4363_s0 + $0x10] sm:$0xff]  ;;  %vm231_vm4 = vcmask 189440  }
   0x2   :  { %v97_v1 = vunpack.c.l.b16 %v41_v0  ;;  %v78_v5 = vld [vmem:[%s4363_s0] sm:$0xff]  ;;  %v79_v6 = vld [vmem:[%s4363_s0 + $0x8] sm:$0xff]  ;;  %v81_v9 = vld [vmem:[%s4363_s0 + $0x18] sm:$0xff] }
   0x3   :  { %v85_v7 = vpack.c.bf16 %v79_v6, %v78_v5  ;;  %v86_v10 = vpack.c.bf16 %v81_v9, %v80_v8  ;;  %v82_v11 = vld [vmem:[%s4363_s0 + $0x20] sm:$0xff]  ;;  %v83_v12 = vld [vmem:[%s4363_s0 + $0x28] sm:$0xff]  ;;  %v84_v14 = vld [vmem:[%s4363_s0 + $0x30] sm:$0x3] }
   0x4   :  { %v99_v2 = vpack.c.b16 %v97_v1, %v97_v1  ;;  %v87_v13 = vpack.c.bf16 %v83_v12, %v82_v11  ;;  %v88_v15 = vpack.c.bf16 %v84_v14, %v84_v14  ;;  %v2567_v22 = vld [vmem:[%s4362_s2] ss:$0 sm:$0xff]  ;;  %v2609_v38 = vld [vmem:[%s4364_s4 + $0x8] sm:$0xff]  ;;  %v2616_v39 = vld [vmem:[%s4364_s4 + $0x10] sm:$0xff] }
   0x5   :  { %v2602_v37 = vld [vmem:[%s4364_s4] sm:$0xff]  ;;  %v53_v40 = vld [vmem:[%s4364_s4 + $0x18] sm:$0x1] }
   0x6   :  { %v2530_v3 = vsel %vm114_vm0, %v99_v2, 0  ;;  %v163_v41 = vunpack.c.l.b16 %v53_v40 }
   0x7   :  { %124 = vmatpush.bf16.msra.mxu0 %v2530_v3 }
   0x8   :  { %v2623_v42 = vpack.c.b16 %v163_v41, %v163_v41 }
   0xb   :  { %125 = vmatpush.bf16.msra.mxu0 %v2536_v4 }
   0xe   :  { %2211 = vmatmul.msk.bf16.vlgmr.msra.gmra.mxu0 %vm101_vm1, %v85_v7 }
  0x1e   :  { %2212 = vmatmul.msk.bf16.gmra.mxu0 %vm101_vm1, %v86_v10  ;;  %v2465_v10 = vmov 24.0  }
  0x1f   :  { %2342 = vrcp.f32 %v2465_v10 }
  0x25   :  { %v2343_v11 = vpop.eup %2342 }
  0x26   :  { %v236_v12 = vmul.f32 24.0, %v2343_v11  ;;  %vm240_vm5 = vweird.f32 %v2343_v11 }
  0x2e   :  { %2213 = vmatmul.msk.bf16.gmra.mxu0 %vm101_vm1, %v87_v13  ;;  %v237_v13 = vsub.f32 1.0, %v236_v12 }
  0x30   :  { %v238_v14 = vmul.f32 %v2343_v11, %v237_v13 }
  0x3e   :  { %2214 = vmatmul.msk.bf16.gmra.mxu0 %vm101_vm1, %v88_v15 }
  0x8b   :  { %v127_v16 = vpop.f32.mrf.mxu0 }
  0x8c   :  { %v2595_v35 = vadd.f32 %v2567_v22, %v127_v16 }
  0x93   :  { %v129_v17 = vpop.f32.mrf.mxu0 }
  0x94   :  { %v2590_v33 = vadd.f32 %v2567_v22, %v129_v17  ;;  %v239_v17 = vadd.f32 %v2343_v11, %v238_v14 }
  0x96   :  { %v146_v36 = vpack.c.bf16 %v2590_v33, %v2595_v35 }
  0x9b   :  { %v132_v18 = vpop.f32.mrf.mxu0 }
  0x9c   :  { %v2587_v32 = vadd.f32 %v2567_v22, %v132_v18  ;;  %v2676_v18 = vsel %vm240_vm5, %v2343_v11, %v239_v17 }
  0xa3   :  { %v134_v19 = vpop.f32.mrf.mxu0 }
  0xa4   :  { %v2582_v29 = vadd.f32 %v2567_v22, %v134_v19 }
  0xa6   :  { %v147_v34 = vpack.c.bf16 %v2582_v29, %v2587_v32 }
  0xab   :  { %v137_v20 = vpop.f32.mrf.mxu0 }
  0xac   :  { %v2579_v28 = vadd.f32 %v2567_v22, %v137_v20 }
  0xb3   :  { %v139_v21 = vpop.f32.mrf.mxu0 }
  0xb4   :  { %v2575_v26 = vadd.f32 %v2567_v22, %v139_v21 }
  0xb6   :  { %v148_v31 = vpack.c.bf16 %v2575_v26, %v2579_v28 }
  0xbb   :  { %v142_v23 = vpop.f32.mrf.mxu0 }
  0xbc   :  { %v2570_v24 = vadd.f32 %v2567_v22, %v142_v23 }
  0xbe   :  { %v149_v25 = vpack.c.bf16 %v2570_v24, %v2570_v24 }
  0xc0   :  { %v183_v27 = vsel %vm181_vm2, %v149_v25, 0 }
  0xc1   :  { %189 = vmatpush.bf16.msra.mxu1 %v183_v27 }
  0xc3   :  { %v144_v30 = vpop.f32.mrf.mxu0 }
  0xc5   :  { %190 = vmatpush.bf16.msra.mxu1 %v148_v31 }
  0xc9   :  { %191 = vmatpush.bf16.msra.mxu1 %v147_v34 }
  0xcd   :  { %192 = vmatpush.bf16.msra.mxu1 %v146_v36 }
  0xd0   :  { %2227 = vmatmul.msk.bf16.vlgmr.msra.gmra.mxu1 %vm168_vm3, %v2602_v37 }
  0xe0   :  { %2228 = vmatmul.msk.bf16.gmra.mxu1 %vm168_vm3, %v2609_v38 }
  0xf0   :  { %2229 = vmatmul.msk.bf16.gmra.mxu1 %vm168_vm3, %v2616_v39 }
 0x100   :  { %2230 = vmatmul.msk.bf16.gmra.mxu1 %vm168_vm3, %v2623_v42 }
 0x14d   :  { %v2627_v43 = vpop.f32.mrf.mxu1 }
 0x14e   :  { %v213_v60 = vsel %vm101_vm1, %v2627_v43, 0.0  ;;  %v249_v8 = vmul.f32 %v2627_v43, %v2627_v43 }
 0x150   :  { %v256_v9 = vsel %vm101_vm1, %v249_v8, 0.0 }
 0x155   :  { %v2629_v44 = vpop.f32.mrf.mxu1 }
 0x156   :  { %v216_v62 = vsel %vm101_vm1, %v2629_v44, 0.0  ;;  %v250_v63 = vmul.f32 %v2629_v44, %v2629_v44 }
 0x158   :  { %v259_v2 = vsel %vm101_vm1, %v250_v63, 0.0 }
 0x15d   :  { %v2631_v45 = vpop.f32.mrf.mxu1 }
 0x15e   :  { %v219_v46 = vsel %vm101_vm1, %v2631_v45, 0.0  ;;  %v251_v47 = vmul.f32 %v2631_v45, %v2631_v45 }
 0x15f   :  { %220 = vadd.xlane.f32.xlu0 %v219_v46 }
 0x160   :  { %v262_v48 = vsel %vm101_vm1, %v251_v47, 0.0 }
 0x161   :  { %263 = vadd.xlane.f32.xlu2 %v262_v48 }
 0x165   :  { %v2638_v49 = vpop.f32.mrf.mxu1 }
 0x166   :  { %v222_v50 = vsel %vm101_vm1, %v2638_v49, 0.0  ;;  %v252_v6 = vmul.f32 %v2638_v49, %v2638_v49 }
 0x167   :  { %223 = vadd.xlane.f32.xlu1 %v222_v50 }
 0x168   :  { %v265_v7 = vsel %vm101_vm1, %v252_v6, 0.0 }
 0x16d   :  { %v2642_v51 = vpop.f32.mrf.mxu1 }
 0x16e   :  { %v225_v52 = vsel %vm101_vm1, %v2642_v51, 0.0  ;;  %v253_v53 = vmul.f32 %v2642_v51, %v2642_v51 }
 0x16f   :  { %226 = vadd.xlane.f32.xlu1 %v225_v52 }
 0x170   :  { %v268_v54 = vsel %vm101_vm1, %v253_v53, 0.0 }
 0x171   :  { %269 = vadd.xlane.f32.xlu2 %v268_v54 }
 0x175   :  { %v2649_v55 = vpop.f32.mrf.mxu1 }
 0x176   :  { %v228_v56 = vsel %vm101_vm1, %v2649_v55, 0.0  ;;  %v254_v57 = vmul.f32 %v2649_v55, %v2649_v55 }
 0x177   :  { %229 = vadd.xlane.f32.xlu1 %v228_v56 }
 0x178   :  { %v271_v58 = vsel %vm101_vm1, %v254_v57, 0.0 }
 0x179   :  { %272 = vadd.xlane.f32.xlu2 %v271_v58 }
 0x17d   :  { %v2656_v59 = vpop.f32.mrf.mxu1 }
 0x17e   :  { %v232_v61 = vsel %vm231_vm4, %v2656_v59, 0.0  ;;  %v255_v0 = vmul.f32 %v2656_v59, %v2656_v59 }
 0x17f   :  { %214 = vadd.xlane.f32.xlu1 %v213_v60  ;;  %233 = vadd.xlane.f32.xlu0 %v232_v61 }
 0x180   :  { %v274_v5 = vsel %vm231_vm4, %v255_v0, 0.0 }
 0x181   :  { %217 = vadd.xlane.f32.xlu2 %v216_v62 }
 0x185   :  { %v211_v1 = vpop.f32.mrf.mxu1 }
 0x187   :  { %260 = vadd.xlane.f32.xlu1 %v259_v2  ;;  %275 = vadd.xlane.f32.xlu0 %v274_v5 }
 0x18f   :  { %266 = vadd.xlane.f32.xlu0 %v265_v7 }
 0x197   :  { %257 = vadd.xlane.f32.xlu0 %v256_v9 }
 0x1d2   :  { %v221_v19 = vpop.xlane.xlu0 %220 }
 0x1d3   :  { %v2679_v21 = vmul.f32 %v2676_v18, %v221_v19 }
 0x1d4   :  { %v264_v16 = vpop.xlane.xlu2 %263 }
 0x1d5   :  { %v286_v27 = vmul.f32 %v2679_v21, %v2679_v21  ;;  %v279_v30 = vmul.f32 %v264_v16, %v2676_v18 }
 0x1d7   :  { %v293_v41 = vsub.f32 %v279_v30, %v286_v27 }
 0x1d9   :  { %v300_v52 = vmax.f32 %v293_v41, 0.0 }
 0x1da   :  { %v224_v15 = vpop.xlane.xlu1 %223 }
 0x1db   :  { %v2696_v60 = vadd.f32 1e-05, %v300_v52  ;;  %v2724_v19 = vmul.f32 %v2676_v18, %v224_v15 }
 0x1dd   :  { %vm345_vm5 = vweird.f32 %v2696_v60 }
 0x1e2   :  { %v227_v20 = vpop.xlane.xlu1 %226 }
 0x1e3   :  { %v2682_v25 = vmul.f32 %v2676_v18, %v227_v20 }
 0x1e4   :  { %v270_v23 = vpop.xlane.xlu2 %269 }
 0x1e5   :  { %v288_v31 = vmul.f32 %v2682_v25, %v2682_v25  ;;  %v281_v34 = vmul.f32 %v270_v23, %v2676_v18 }
 0x1e7   :  { %v295_v47 = vsub.f32 %v281_v34, %v288_v31 }
 0x1e9   :  { %v302_v54 = vmax.f32 %v295_v47, 0.0 }
 0x1ea   :  { %v230_v36 = vpop.xlane.xlu1 %229 }
 0x1eb   :  { %v2691_v40 = vmul.f32 %v2676_v18, %v230_v36  ;;  %v2700_v63 = vadd.f32 1e-05, %v302_v54  ;;  %v287_v36 = vmul.f32 %v2724_v19, %v2724_v19 }
 0x1ec   :  { %v273_v46 = vpop.xlane.xlu2 %272 }
 0x1ed   :  { %v289_v48 = vmul.f32 %v2691_v40, %v2691_v40  ;;  %v282_v50 = vmul.f32 %v273_v46, %v2676_v18  ;;  %vm365_vm13 = vweird.f32 %v2700_v63 }
 0x1ef   :  { %v296_v53 = vsub.f32 %v282_v50, %v289_v48 }
 0x1f1   :  { %v303_v56 = vmax.f32 %v296_v53, 0.0 }
 0x1f2   :  { %v215_v57 = vpop.xlane.xlu1 %214  ;;  %v234_v58 = vpop.xlane.xlu0 %233 }
 0x1f3   :  { %v2698_v61 = vadd.f32 1e-05, %v303_v56  ;;  %v2704_v0 = vmul.f32 %v2676_v18, %v234_v58  ;;  %v2742_v50 = vmul.f32 %v2676_v18, %v215_v57 }
 0x1f4   :  { %v218_v62 = vpop.xlane.xlu2 %217 }
 0x1f5   :  { %2344 = vrsqrt.f32 %v2698_v61  ;;  %v2707_v1 = vmul.f32 %v2676_v18, %v218_v62  ;;  %v290_v6 = vmul.f32 %v2704_v0, %v2704_v0  ;;  %vm375_vm9 = vweird.f32 %v2698_v61 }
 0x1f6   :  { %2346 = vrsqrt.f32 %v2696_v60 }
 0x1f7   :  { %2348 = vrsqrt.f32 %v2700_v63  ;;  %v285_v7 = vmul.f32 %v2707_v1, %v2707_v1 }
 0x1fa   :  { %v261_v2 = vpop.xlane.xlu1 %260  ;;  %v276_v5 = vpop.xlane.xlu0 %275 }
 0x1fb   :  { %v278_v8 = vmul.f32 %v261_v2, %v2676_v18  ;;  %v283_v9 = vmul.f32 %v276_v5, %v2676_v18  ;;  %v2717_v10 = vpop.eup %2344 }
 0x1fc   :  { %v2719_v13 = vpop.eup %2346  ;;  %v370_v20 = vmul.f32 %v2717_v10, %v2698_v61  ;;  %vm376_vm6 = vweird.f32 %v2717_v10 }
 0x1fd   :  { %v292_v11 = vsub.f32 %v278_v8, %v285_v7  ;;  %v297_v12 = vsub.f32 %v283_v9, %v290_v6  ;;  %v2721_v14 = vpop.eup %2348  ;;  %v340_v30 = vmul.f32 %v2719_v13, %v2696_v60  ;;  %v284_v6 = vmul.f32 %v2742_v50, %v2742_v50  ;;  %vm377_vm12 = vmor %vm375_vm9, %vm376_vm6 }
 0x1fe   :  { %v360_v31 = vmul.f32 %v2721_v14, %v2700_v63  ;;  %v371_v15 = vmul.f32 %v2717_v10, %v370_v20  ;;  %vm346_vm8 = vweird.f32 %v2719_v13  ;;  %vm366_vm10 = vweird.f32 %v2721_v14 }
 0x1ff   :  { %v299_v16 = vmax.f32 %v292_v11, 0.0  ;;  %v304_v17 = vmax.f32 %v297_v12, 0.0  ;;  %v341_v46 = vmul.f32 %v2719_v13, %v340_v30  ;;  %vm367_vm15 = vmor %vm365_vm13, %vm366_vm10  ;;  %v307_v60 = vsub.f32 %v2631_v45, %v2679_v21 }
 0x200   :  { %v361_v47 = vmul.f32 %v2721_v14, %v360_v31  ;;  %v372_v52 = vmul.f32 0.5, %v371_v15  ;;  %vm347_vm6 = vmor %vm345_vm5, %vm346_vm8 }
 0x201   :  { %v2728_v23 = vadd.f32 1e-05, %v299_v16  ;;  %v318_v27 = vadd.f32 1e-05, %v304_v17  ;;  %v342_v58 = vmul.f32 0.5, %v341_v46 }
 0x202   :  { %v267_v34 = vpop.xlane.xlu0 %266  ;;  %v362_v62 = vmul.f32 0.5, %v361_v47  ;;  %v373_v9 = vsub.f32 1.5, %v372_v52 }
 0x203   :  { %2350 = vrsqrt.f32 %v2728_v23  ;;  %v280_v41 = vmul.f32 %v267_v34, %v2676_v18  ;;  %v343_v16 = vsub.f32 1.5, %v342_v58  ;;  %vm385_vm11 = vweird.f32 %v318_v27 }
 0x204   :  { %2352 = vrsqrt.f32 %v318_v27  ;;  %v363_v17 = vsub.f32 1.5, %v362_v62  ;;  %v374_v34 = vmul.f32 %v2717_v10, %v373_v9  ;;  %v310_v62 = vsub.f32 %v2649_v55, %v2691_v40 }
 0x205   :  { %v294_v48 = vsub.f32 %v280_v41, %v287_v36  ;;  %v344_v47 = vmul.f32 %v2719_v13, %v343_v16 }
 0x206   :  { %v364_v46 = vmul.f32 %v2721_v14, %v363_v17  ;;  %v378_v61 = vsel %vm377_vm12, %v2717_v10, %v374_v34 }
 0x207   :  { %v301_v53 = vmax.f32 %v294_v48, 0.0  ;;  %v348_v40 = vsel %vm347_vm6, %v2719_v13, %v344_v47 }
 0x208   :  { %v368_v63 = vsel %vm367_vm15, %v2721_v14, %v364_v46 }
 0x209   :  { %v2744_v54 = vpop.eup %2350  ;;  %v2746_v2 = vadd.f32 1e-05, %v301_v53  ;;  %v311_v53 = vsub.f32 %v2656_v59, %v2704_v0  ;;  %v309_v59 = vsub.f32 %v2642_v51, %v2682_v25  ;;  %v308_v51 = vsub.f32 %v2638_v49, %v2724_v19 }
 0x20a   :  { %v2353_v56 = vpop.eup %2352  ;;  %v258_v5 = vpop.xlane.xlu0 %257  ;;  %v330_v57 = vmul.f32 %v2744_v54, %v2728_v23  ;;  %vm336_vm10 = vweird.f32 %v2744_v54 }
 0x20b   :  { %v380_v7 = vmul.f32 %v2353_v56, %v318_v27  ;;  %v277_v8 = vmul.f32 %v258_v5, %v2676_v18  ;;  %2354 = vrsqrt.f32 %v2746_v2  ;;  %vm386_vm7 = vweird.f32 %v2353_v56 }
 0x20c   :  { %v331_v31 = vmul.f32 %v2744_v54, %v330_v57  ;;  %vm387_vm14 = vmor %vm385_vm11, %vm386_vm7  ;;  %v393_v14 = vmul.f32 %v368_v63, %v309_v59  ;;  %vm355_vm8 = vweird.f32 %v2746_v2  ;;  %v391_v57 = vmul.f32 %v348_v40, %v307_v60  ;;  %v2291_v59 = vld [vmem:[%s4363_s0 + $0x58] sm:$0xff] }
 0x20d   :  { %v381_v11 = vmul.f32 %v2353_v56, %v380_v7  ;;  %v291_v12 = vsub.f32 %v277_v8, %v284_v6  ;;  %v394_v7 = vmul.f32 %v378_v61, %v310_v62  ;;  %vm335_vm11 = vweird.f32 %v2728_v23 }
 0x20e   :  { %v332_v58 = vmul.f32 0.5, %v331_v31  ;;  %v2800_v49 = vadd.f32 %v393_v14, %v2579_v28  ;;  %v2806_v16 = vadd.f32 %v391_v57, %v2587_v32  ;;  %vm337_vm12 = vmor %vm335_vm11, %vm336_vm10  ;;  %v305_v32 = vsub.f32 %v2627_v43, %v2742_v50 }
 0x20f   :  { %v382_v20 = vmul.f32 0.5, %v381_v11  ;;  %v298_v30 = vmax.f32 %v291_v12, 0.0 }
 0x210   :  { %v333_v10 = vsub.f32 1.5, %v332_v58 }
 0x211   :  { %v383_v36 = vsub.f32 1.5, %v382_v20  ;;  %v2757_v15 = vadd.f32 1e-05, %v298_v30  ;;  %v2355_v41 = vpop.eup %2354  ;;  %v306_v30 = vsub.f32 %v2629_v44, %v2707_v1 }
 0x212   :  { %v350_v48 = vmul.f32 %v2355_v41, %v2746_v2  ;;  %vm356_vm7 = vweird.f32 %v2355_v41  ;;  %v334_v21 = vmul.f32 %v2744_v54, %v333_v10 }
 0x213   :  { %2356 = vrsqrt.f32 %v2757_v15  ;;  %v384_v52 = vmul.f32 %v2353_v56, %v383_v36  ;;  %vm357_vm9 = vmor %vm355_vm8, %vm356_vm7 }
 0x214   :  { %v351_v27 = vmul.f32 %v2355_v41, %v350_v48  ;;  %v338_v28 = vsel %vm337_vm12, %v2744_v54, %v334_v21 }
 0x215   :  { %v388_v5 = vsel %vm387_vm14, %v2353_v56, %v384_v52  ;;  %vm325_vm14 = vweird.f32 %v2757_v15  ;;  %v390_v34 = vmul.f32 %v338_v28, %v306_v30  ;;  %v2289_v52 = vld [vmem:[%s4363_s0 + $0x48] sm:$0xff] }
 0x216   :  { %v395_v6 = vmul.f32 %v388_v5, %v311_v53  ;;  %v352_v0 = vmul.f32 0.5, %v351_v27  ;;  %v2290_v53 = vld [vmem:[%s4363_s0 + $0x50] sm:$0xff] }
 0x217   :  { %v2823_v44 = vadd.f32 %v390_v34, %v2590_v33  ;;  %v2332_v33 = vld [vmem:[%s4364_s4 + $0x2c] sm:$0xff]  ;;  %v1219_v61 = vpack.c.bf16 %v2290_v53, %v2289_v52 }
 0x218   :  { %v2782_v55 = vadd.f32 %v395_v6, %v2570_v24  ;;  %v353_v8 = vsub.f32 1.5, %v352_v0  ;;  %v2794_v24 = vadd.f32 %v394_v7, %v2575_v26  ;;  %v2292_v0 = vld [vmem:[%s4363_s0 + $0x60] sm:$0xff] }
 0x219   :  { %v2357_v56 = vpop.eup %2356  ;;  %v1220_v7 = vpack.c.bf16 %v2292_v0, %v2291_v59 }
 0x21a   :  { %v320_v25 = vmul.f32 %v2357_v56, %v2757_v15  ;;  %v406_v9 = vpack.c.bf16 %v2782_v55, %v2782_v55  ;;  %v354_v13 = vmul.f32 %v2355_v41, %v353_v8  ;;  %v405_v12 = vpack.c.bf16 %v2794_v24, %v2800_v49  ;;  %v2330_v15 = vld [vmem:[%s4364_s4 + $0x1c] sm:$0xff] }
 0x21b   :  { %vm326_vm13 = vweird.f32 %v2357_v56 }
 0x21c   :  { %v321_v11 = vmul.f32 %v2357_v56, %v320_v25  ;;  %v438_v45 = vsel %vm181_vm2, %v406_v9, 0  ;;  %v358_v19 = vsel %vm357_vm9, %v2355_v41, %v354_v13  ;;  %vm327_vm15 = vmor %vm325_vm14, %vm326_vm13  ;;  %v2288_v41 = vld [vmem:[%s4363_s0 + $0x40] sm:$0xff]  ;;  %v2293_v9 = vld [vmem:[%s4363_s0 + $0x68] sm:$0x3] }
 0x21d   :  { %444 = vmatpush.bf16.msra.mxu2 %v438_v45  ;;  %v392_v26 = vmul.f32 %v358_v19, %v308_v51  ;;  %v1221_v13 = vpack.c.bf16 %v2293_v9, %v2293_v9 }
 0x21e   :  { %v322_v2 = vmul.f32 0.5, %v321_v11 }
 0x21f   :  { %v2809_v20 = vadd.f32 %v392_v26, %v2582_v29 }
 0x220   :  { %v323_v17 = vsub.f32 1.5, %v322_v2 }
 0x221   :  { %445 = vmatpush.bf16.msra.mxu2 %v405_v12  ;;  %v404_v23 = vpack.c.bf16 %v2809_v20, %v2806_v16 }
 0x222   :  { %v324_v31 = vmul.f32 %v2357_v56, %v323_v17 }
 0x224   :  { %v328_v29 = vsel %vm327_vm15, %v2357_v56, %v324_v31 }
 0x225   :  { %446 = vmatpush.bf16.msra.mxu2 %v404_v23  ;;  %v389_v36 = vmul.f32 %v328_v29, %v305_v32 }
 0x227   :  { %v2820_v54 = vadd.f32 %v389_v36, %v2595_v35  ;;  %v2331_v35 = vld [vmem:[%s4364_s4 + $0x24] sm:$0xff] }
 0x229   :  { %v403_v1 = vpack.c.bf16 %v2823_v44, %v2820_v54 }
 0x22b   :  { %447 = vmatpush.bf16.msra.mxu2 %v403_v1 }
 0x22e   :  { %2243 = vmatmul.msk.bf16.vlgmr.msra.gmra.mxu2 %vm168_vm3, %v2330_v15 }
 0x22f   :  { %1240 = vmatpush.bf16.msrb.mxu2 %v2530_v3  ;;  %v2192_v3 = vld [vmem:[%s4364_s4 + $0x34] sm:$0x1] }
 0x230   :  { %v420_v43 = vunpack.c.l.b16 %v2192_v3 }
 0x232   :  { %v2844_v50 = vpack.c.b16 %v420_v43, %v420_v43 }
 0x233   :  { %1241 = vmatpush.bf16.msrb.mxu2 %v2536_v4  ;;  %v2287_v4 = vld [vmem:[%s4363_s0 + $0x38] sm:$0xff] }
 0x234   :  { %4371 = vst [vmem:[#allocation2_spill] sm:$0xff] %v2844_v50  ;;  %v1218_v47 = vpack.c.bf16 %v2288_v41, %v2287_v4 }
 0x23e   :  { %2244 = vmatmul.msk.bf16.gmra.mxu2 %vm168_vm3, %v2331_v35 }
 0x24e   :  { %2245 = vmatmul.msk.bf16.gmra.mxu2 %vm168_vm3, %v2332_v33 }
 0x25e   :  { %2246 = vmatmul.msk.bf16.gmra.mxu2 %vm168_vm3, %v2844_v50 }
 0x26e   :  { %2294 = vmatmul.msk.bf16.vlgmr.msrb.gmra.mxu2 %vm101_vm1, %v1218_v47 }
 0x27e   :  { %2295 = vmatmul.msk.bf16.gmra.mxu2 %vm101_vm1, %v1219_v61 }
 0x28e   :  { %2296 = vmatmul.msk.bf16.gmra.mxu2 %vm101_vm1, %v1220_v7 }
 0x29e   :  { %2297 = vmatmul.msk.bf16.gmra.mxu2 %vm101_vm1, %v1221_v13 }
 0x2b1   :  { %v2854_v46 = vpop.f32.mrf.mxu2 }
 0x2b2   :  { %v468_v17 = vsel %vm101_vm1, %v2854_v46, 0.0  ;;  %v496_v28 = vmul.f32 %v2854_v46, %v2854_v46 }
 0x2b4   :  { %v503_v23 = vsel %vm101_vm1, %v496_v28, 0.0 }
 0x2b9   :  { %v2857_v48 = vpop.f32.mrf.mxu2 }
 0x2ba   :  { %v471_v21 = vsel %vm101_vm1, %v2857_v48, 0.0  ;;  %v497_v30 = vmul.f32 %v2857_v48, %v2857_v48 }
 0x2bc   :  { %v506_v31 = vsel %vm101_vm1, %v497_v30, 0.0 }
 0x2c1   :  { %v2865_v58 = vpop.f32.mrf.mxu2 }
 0x2c2   :  { %v474_v62 = vsel %vm101_vm1, %v2865_v58, 0.0  ;;  %v498_v27 = vmul.f32 %v2865_v58, %v2865_v58 }
 0x2c3   :  { %475 = vadd.xlane.f32.xlu2 %v474_v62 }
 0x2c4   :  { %v509_v5 = vsel %vm101_vm1, %v498_v27, 0.0 }
 0x2c5   :  { %510 = vadd.xlane.f32.xlu1 %v509_v5 }
 0x2c9   :  { %v2873_v6 = vpop.f32.mrf.mxu2 }
 0x2ca   :  { %v477_v63 = vsel %vm101_vm1, %v2873_v6, 0.0  ;;  %v499_v2 = vmul.f32 %v2873_v6, %v2873_v6 }
 0x2cb   :  { %478 = vadd.xlane.f32.xlu0 %v477_v63 }
 0x2cc   :  { %v512_v12 = vsel %vm101_vm1, %v499_v2, 0.0 }
 0x2d1   :  { %v2883_v10 = vpop.f32.mrf.mxu2 }
 0x2d2   :  { %v480_v40 = vsel %vm101_vm1, %v2883_v10, 0.0  ;;  %v500_v56 = vmul.f32 %v2883_v10, %v2883_v10 }
 0x2d3   :  { %481 = vadd.xlane.f32.xlu1 %v480_v40 }
 0x2d4   :  { %v515_v60 = vsel %vm101_vm1, %v500_v56, 0.0 }
 0x2d5   :  { %516 = vadd.xlane.f32.xlu0 %v515_v60 }
 0x2d9   :  { %v2891_v8 = vpop.f32.mrf.mxu2 }
 0x2da   :  { %v483_v14 = vsel %vm101_vm1, %v2891_v8, 0.0  ;;  %v501_v51 = vmul.f32 %v2891_v8, %v2891_v8 }
 0x2db   :  { %484 = vadd.xlane.f32.xlu2 %v483_v14 }
 0x2dc   :  { %v518_v25 = vsel %vm101_vm1, %v501_v51, 0.0 }
 0x2dd   :  { %519 = vadd.xlane.f32.xlu1 %v518_v25 }
 0x2e1   :  { %v2901_v57 = vpop.f32.mrf.mxu2 }
 0x2e2   :  { %v486_v11 = vsel %vm231_vm4, %v2901_v57, 0.0  ;;  %v502_v45 = vmul.f32 %v2901_v57, %v2901_v57 }
 0x2e3   :  { %487 = vadd.xlane.f32.xlu2 %v486_v11 }
 0x2e4   :  { %v521_v19 = vsel %vm231_vm4, %v502_v45, 0.0 }
 0x2e5   :  { %472 = vadd.xlane.f32.xlu1 %v471_v21  ;;  %522 = vadd.xlane.f32.xlu0 %v521_v19 }
 0x2e9   :  { %v466_v26 = vpop.f32.mrf.mxu2 }
 0x2eb   :  { %513 = vadd.xlane.f32.xlu2 %v512_v12 }
 0x2ed   :  { %469 = vadd.xlane.f32.xlu0 %v468_v17 }
 0x2f1   :  { %v2922_v32 = vpop.f32.mrf.mxu2 }
 0x2f3   :  { %504 = vadd.xlane.f32.xlu2 %v503_v23 }
 0x2f5   :  { %507 = vadd.xlane.f32.xlu0 %v506_v31 }
 0x2f9   :  { %v2924_v29 = vpop.f32.mrf.mxu2 }
 0x301   :  { %v2929_v33 = vpop.f32.mrf.mxu2 }
 0x309   :  { %v2940_v5 = vpop.f32.mrf.mxu2 }
 0x311   :  { %v2953_v9 = vpop.f32.mrf.mxu2 }
 0x319   :  { %v2974_v31 = vpop.f32.mrf.mxu2 }
 0x336   :  { %v476_v36 = vpop.xlane.xlu2 %475 }
 0x337   :  { %v2927_v15 = vmul.f32 %v476_v36, %v2676_v18 }
 0x338   :  { %v511_v34 = vpop.xlane.xlu1 %510 }
 0x339   :  { %v533_v3 = vmul.f32 %v2927_v15, %v2927_v15  ;;  %v526_v43 = vmul.f32 %v511_v34, %v2676_v18 }
 0x33b   :  { %v540_v53 = vsub.f32 %v526_v43, %v533_v3 }
 0x33d   :  { %v547_v63 = vmax.f32 %v540_v53, 0.0 }
 0x33e   :  { %v479_v1 = vpop.xlane.xlu0 %478 }
 0x33f   :  { %v2950_v60 = vadd.f32 1e-05, %v547_v63  ;;  %v2968_v26 = vmul.f32 %v479_v1, %v2676_v18 }
 0x341   :  { %v534_v34 = vmul.f32 %v2968_v26, %v2968_v26  ;;  %vm592_vm15 = vweird.f32 %v2950_v60 }
 0x346   :  { %v482_v35 = vpop.xlane.xlu1 %481 }
 0x347   :  { %v2935_v4 = vmul.f32 %v482_v35, %v2676_v18 }
 0x348   :  { %v517_v41 = vpop.xlane.xlu0 %516 }
 0x349   :  { %v535_v47 = vmul.f32 %v2935_v4, %v2935_v4  ;;  %v528_v52 = vmul.f32 %v517_v41, %v2676_v18 }
 0x34b   :  { %v542_v61 = vsub.f32 %v528_v52, %v535_v47 }
 0x34d   :  { %v549_v62 = vmax.f32 %v542_v61, 0.0 }
 0x34e   :  { %v485_v27 = vpop.xlane.xlu2 %484 }
 0x34f   :  { %v2943_v59 = vmul.f32 %v485_v27, %v2676_v18  ;;  %v2945_v7 = vadd.f32 1e-05, %v549_v62 }
 0x350   :  { %v520_v0 = vpop.xlane.xlu1 %519 }
 0x351   :  { %v536_v40 = vmul.f32 %v2943_v59, %v2943_v59  ;;  %v529_v56 = vmul.f32 %v520_v0, %v2676_v18  ;;  %2358 = vrsqrt.f32 %v2945_v7  ;;  %vm612_vm9 = vweird.f32 %v2945_v7 }
 0x352   :  { %2360 = vrsqrt.f32 %v2950_v60 }
 0x353   :  { %v543_v14 = vsub.f32 %v529_v56, %v536_v40 }
 0x355   :  { %v550_v51 = vmax.f32 %v543_v14, 0.0 }
 0x356   :  { %v488_v25 = vpop.xlane.xlu2 %487 }
 0x357   :  { %v2957_v13 = vmul.f32 %v488_v25, %v2676_v18  ;;  %v2959_v11 = vadd.f32 1e-05, %v550_v51  ;;  %v2965_v2 = vpop.eup %2358  ;;  %v2996_v25 = vpop.f32.mrf.mxu2 }
 0x358   :  { %v523_v45 = vpop.xlane.xlu0 %522  ;;  %v2970_v17 = vpop.eup %2360  ;;  %v607_v30 = vmul.f32 %v2965_v2, %v2945_v7  ;;  %vm613_vm7 = vweird.f32 %v2965_v2  ;;  %v557_v7 = vsub.f32 %v2891_v8, %v2943_v59  ;;  %v556_v8 = vsub.f32 %v2883_v10, %v2935_v4 }
 0x359   :  { %v537_v21 = vmul.f32 %v2957_v13, %v2957_v13  ;;  %v530_v19 = vmul.f32 %v523_v45, %v2676_v18  ;;  %2362 = vrsqrt.f32 %v2959_v11  ;;  %v587_v1 = vmul.f32 %v2970_v17, %v2950_v60  ;;  %v473_v53 = vpop.xlane.xlu1 %472  ;;  %vm3021_vm12 = vmor %vm612_vm9, %vm613_vm7 }
 0x35a   :  { %v608_v52 = vmul.f32 %v2965_v2, %v607_v30  ;;  %v2992_v40 = vmul.f32 %v473_v53, %v2676_v18  ;;  %vm622_vm6 = vweird.f32 %v2959_v11  ;;  %vm593_vm14 = vweird.f32 %v2970_v17 }
 0x35b   :  { %v544_v12 = vsub.f32 %v530_v19, %v537_v21  ;;  %v588_v63 = vmul.f32 %v2970_v17, %v587_v1 }
 0x35c   :  { %v609_v14 = vmul.f32 0.5, %v608_v52 }
 0x35d   :  { %v551_v28 = vmax.f32 %v544_v12, 0.0  ;;  %v589_v12 = vmul.f32 0.5, %v588_v63 }
 0x35e   :  { %v514_v23 = vpop.xlane.xlu2 %513 }
 0x35f   :  { %v565_v36 = vadd.f32 1e-05, %v551_v28  ;;  %v527_v35 = vmul.f32 %v514_v23, %v2676_v18  ;;  %v2979_v3 = vpop.eup %2362  ;;  %v590_v53 = vsub.f32 1.5, %v589_v12  ;;  %v1260_v12 = vpop.f32.mrf.mxu2 }
 0x360   :  { %v470_v43 = vpop.xlane.xlu0 %469  ;;  %v617_v41 = vmul.f32 %v2979_v3, %v2959_v11  ;;  %vm623_vm5 = vweird.f32 %v2979_v3 }
 0x361   :  { %2364 = vrsqrt.f32 %v565_v36  ;;  %v541_v47 = vsub.f32 %v527_v35, %v534_v34  ;;  %v2988_v27 = vmul.f32 %v470_v43, %v2676_v18  ;;  %v532_v34 = vmul.f32 %v2992_v40, %v2992_v40  ;;  %vm3017_vm10 = vmor %vm622_vm6, %vm623_vm5 }
 0x362   :  { %v618_v61 = vmul.f32 %v2979_v3, %v617_v41  ;;  %v610_v43 = vsub.f32 1.5, %v609_v14  ;;  %vm632_vm11 = vweird.f32 %v565_v36  ;;  %vm3045_vm6 = vmor %vm592_vm15, %vm593_vm14 }
 0x363   :  { %v548_v62 = vmax.f32 %v541_v47, 0.0  ;;  %v531_v21 = vmul.f32 %v2988_v27, %v2988_v27 }
 0x364   :  { %v619_v0 = vmul.f32 0.5, %v618_v61 }
 0x365   :  { %v2994_v56 = vadd.f32 1e-05, %v548_v62 }
 0x366   :  { %v505_v51 = vpop.xlane.xlu2 %504  ;;  %v620_v28 = vsub.f32 1.5, %v619_v0 }
 0x367   :  { %v2365_v45 = vpop.eup %2364  ;;  %2366 = vrsqrt.f32 %v2994_v56  ;;  %v524_v19 = vmul.f32 %v505_v51, %v2676_v18  ;;  %vm602_vm7 = vweird.f32 %v2994_v56 }
 0x368   :  { %v627_v30 = vmul.f32 %v2365_v45, %v565_v36  ;;  %v508_v23 = vpop.xlane.xlu0 %507  ;;  %v621_v62 = vmul.f32 %v2979_v3, %v620_v28  ;;  %vm633_vm8 = vweird.f32 %v2365_v45 }
 0x369   :  { %v538_v35 = vsub.f32 %v524_v19, %v531_v21  ;;  %v525_v1 = vmul.f32 %v508_v23, %v2676_v18  ;;  %v611_v19 = vmul.f32 %v2965_v2, %v610_v43  ;;  %vm634_vm13 = vmor %vm632_vm11, %vm633_vm8 }
 0x36a   :  { %v628_v41 = vmul.f32 %v2365_v45, %v627_v30 }
 0x36b   :  { %v545_v47 = vmax.f32 %v538_v35, 0.0  ;;  %v539_v52 = vsub.f32 %v525_v1, %v532_v34  ;;  %v625_v35 = vsel %vm3017_vm10, %v2979_v3, %v621_v62  ;;  %v558_v1 = vsub.f32 %v2901_v57, %v2957_v13 }
 0x36c   :  { %v629_v61 = vmul.f32 0.5, %v628_v41  ;;  %v615_v41 = vsel %vm3021_vm12, %v2965_v2, %v611_v19  ;;  %v591_v3 = vmul.f32 %v2970_v17, %v590_v53  ;;  %v554_v53 = vsub.f32 %v2865_v58, %v2927_v15 }
 0x36d   :  { %v2367_v63 = vpop.eup %2366  ;;  %v3008_v0 = vadd.f32 1e-05, %v545_v47  ;;  %v546_v51 = vmax.f32 %v539_v52, 0.0  ;;  %v641_v47 = vmul.f32 %v625_v35, %v557_v7  ;;  %v552_v34 = vsub.f32 %v2854_v46, %v2988_v27 }
 0x36e   :  { %v630_v21 = vsub.f32 1.5, %v629_v61  ;;  %v597_v14 = vmul.f32 %v2367_v63, %v2994_v56  ;;  %vm603_vm5 = vweird.f32 %v2367_v63  ;;  %v595_v10 = vsel %vm3045_vm6, %v2970_v17, %v591_v3 }
 0x36f   :  { %2368 = vrsqrt.f32 %v3008_v0  ;;  %v3015_v28 = vadd.f32 1e-05, %v546_v51  ;;  %v3061_v51 = vadd.f32 %v641_v47, %v2794_v24  ;;  %vm604_vm8 = vmor %vm602_vm7, %vm603_vm5  ;;  %v638_v58 = vmul.f32 %v595_v10, %v554_v53 }
 0x370   :  { %v598_v30 = vmul.f32 %v2367_v63, %v597_v14  ;;  %v631_v23 = vmul.f32 %v2365_v45, %v630_v21  ;;  %vm572_vm10 = vweird.f32 %v3008_v0  ;;  %v3081_v35 = vadd.f32 %v2567_v22, %v2996_v25 }
 0x371   :  { %2370 = vrsqrt.f32 %v3015_v28 }
 0x372   :  { %v599_v36 = vmul.f32 0.5, %v598_v30  ;;  %v635_v43 = vsel %vm634_vm13, %v2365_v45, %v631_v23  ;;  %v640_v45 = vmul.f32 %v615_v41, %v556_v8  ;;  %vm582_vm13 = vweird.f32 %v3015_v28 }
 0x373   :  { %v642_v59 = vmul.f32 %v635_v43, %v558_v1  ;;  %v1265_v27 = vpack.c.bf16 %v3081_v35, %v3081_v35  ;;  %v3098_v43 = vadd.f32 %v2567_v22, %v2953_v9  ;;  %v3116_v9 = vadd.f32 %v2567_v22, %v2940_v5 }
 0x374   :  { %v600_v57 = vsub.f32 1.5, %v599_v36  ;;  %v3066_v19 = vadd.f32 %v640_v45, %v2800_v49  ;;  %v3125_v8 = vadd.f32 %v2567_v22, %v2922_v32  ;;  %v2335_v32 = vld [vmem:[%s4364_s4 + $0x48] sm:$0xff] }
 0x375   :  { %v2369_v13 = vpop.eup %2368  ;;  %v3043_v52 = vadd.f32 %v642_v59, %v2782_v55  ;;  %v555_v55 = vsub.f32 %v2873_v6, %v2968_v26  ;;  %v1267_v41 = vsel %vm181_vm2, %v1265_v27, 0  ;;  %v2334_v59 = vld [vmem:[%s4364_s4 + $0x40] sm:$0xff] }
 0x376   :  { %v567_v2 = vmul.f32 %v2369_v13, %v3008_v0  ;;  %v601_v4 = vmul.f32 %v2367_v63, %v600_v57  ;;  %v652_v26 = vpack.c.bf16 %v3061_v51, %v3066_v19  ;;  %vm573_vm9 = vweird.f32 %v2369_v13 }
 0x377   :  { %v2371_v60 = vpop.eup %2370  ;;  %v653_v62 = vpack.c.bf16 %v3043_v52, %v3043_v52  ;;  %vm574_vm12 = vmor %vm572_vm10, %vm573_vm9  ;;  %v553_v0 = vsub.f32 %v2857_v48, %v2992_v40  ;;  %v3102_v48 = vadd.f32 %v2567_v22, %v2974_v31 }
 0x378   :  { %v568_v56 = vmul.f32 %v2369_v13, %v567_v2  ;;  %v577_v21 = vmul.f32 %v2371_v60, %v3015_v28  ;;  %v605_v14 = vsel %vm604_vm8, %v2367_v63, %v601_v4  ;;  %v3074_v63 = vadd.f32 %v638_v58, %v2806_v16 }
 0x379   :  { %v685_v17 = vsel %vm181_vm2, %v653_v62, 0  ;;  %v639_v15 = vmul.f32 %v605_v14, %v555_v55  ;;  %vm583_vm11 = vweird.f32 %v2371_v60  ;;  %v1264_v31 = vpack.c.bf16 %v3102_v48, %v3098_v43 }
 0x37a   :  { %v569_v12 = vmul.f32 0.5, %v568_v56  ;;  %v578_v6 = vmul.f32 %v2371_v60, %v577_v21  ;;  %691 = vmatpush.bf16.msra.mxu3 %v685_v17  ;;  %vm584_vm14 = vmor %vm582_vm13, %vm583_vm11 }
 0x37b   :  { %v3071_v30 = vadd.f32 %v639_v15, %v2809_v20 }
 0x37c   :  { %v570_v24 = vsub.f32 1.5, %v569_v12  ;;  %v579_v11 = vmul.f32 0.5, %v578_v6 }
 0x37d   :  { %v651_v16 = vpack.c.bf16 %v3071_v30, %v3074_v63 }
 0x37e   :  { %v580_v49 = vsub.f32 1.5, %v579_v11  ;;  %692 = vmatpush.bf16.msra.mxu3 %v652_v26  ;;  %v571_v23 = vmul.f32 %v2369_v13, %v570_v24 }
 0x380   :  { %v575_v20 = vsel %vm574_vm12, %v2369_v13, %v571_v23  ;;  %v581_v7 = vmul.f32 %v2371_v60, %v580_v49 }
 0x381   :  { %v636_v1 = vmul.f32 %v575_v20, %v552_v34 }
 0x382   :  { %693 = vmatpush.bf16.msra.mxu3 %v651_v16  ;;  %v585_v36 = vsel %vm584_vm14, %v2371_v60, %v581_v7 }
 0x383   :  { %v637_v46 = vmul.f32 %v585_v36, %v553_v0  ;;  %v3091_v25 = vadd.f32 %v636_v1, %v2820_v54  ;;  %v2333_v54 = vld [vmem:[%s4364_s4 + $0x38] sm:$0xff] }
 0x385   :  { %v3094_v28 = vadd.f32 %v637_v46, %v2823_v44  ;;  %v3112_v44 = vadd.f32 %v2567_v22, %v2929_v33  ;;  %v3129_v33 = vadd.f32 %v2567_v22, %v2924_v29  ;;  %v2199_v22 = vld [vmem:[%s4364_s4 + $0x50] sm:$0x1] }
 0x386   :  { %v667_v29 = vunpack.c.l.b16 %v2199_v22 }
 0x387   :  { %v650_v40 = vpack.c.bf16 %v3094_v28, %v3091_v25  ;;  %v1263_v3 = vpack.c.bf16 %v3116_v9, %v3112_v44  ;;  %4378 = vst [vmem:[#allocation3_spill] sm:$0xff] %v3129_v33  ;;  %v1262_v5 = vpack.c.bf16 %v3129_v33, %v3125_v8 }
 0x388   :  { %v3144_v47 = vpack.c.b16 %v667_v29, %v667_v29 }
 0x389   :  { %694 = vmatpush.bf16.msra.mxu3 %v650_v40 }
 0x38a   :  { %4379 = vst [vmem:[#allocation4_spill] sm:$0xff] %v3144_v47 }
 0x38c   :  { %2259 = vmatmul.msk.bf16.vlgmr.msra.gmra.mxu3 %vm168_vm3, %v2333_v54 }
 0x38d   :  { %1273 = vmatpush.bf16.msrb.mxu3 %v1267_v41 }
 0x391   :  { %1274 = vmatpush.bf16.msrb.mxu3 %v1264_v31 }
 0x395   :  { %1275 = vmatpush.bf16.msrb.mxu3 %v1263_v3 }
 0x399   :  { %1276 = vmatpush.bf16.msrb.mxu3 %v1262_v5 }
 0x39c   :  { %2260 = vmatmul.msk.bf16.gmra.mxu3 %vm168_vm3, %v2334_v59 }
 0x3ac   :  { %2261 = vmatmul.msk.bf16.gmra.mxu3 %vm168_vm3, %v2335_v32 }
 0x3bc   :  { %2262 = vmatmul.msk.bf16.gmra.mxu3 %vm168_vm3, %v3144_v47 }
 0x3cc   :  { %2298 = vmatmul.msk.bf16.vlgmr.msrb.gmra.mxu3 %vm168_vm3, %v2602_v37 }
 0x3dc   :  { %2299 = vmatmul.msk.bf16.gmra.mxu3 %vm168_vm3, %v2609_v38 }
 0x3ec   :  { %2300 = vmatmul.msk.bf16.gmra.mxu3 %vm168_vm3, %v2616_v39 }
 0x3fc   :  { %2301 = vmatmul.msk.bf16.gmra.mxu3 %vm168_vm3, %v2623_v42 }
 0x40f   :  { %v3156_v57 = vpop.f32.mrf.mxu3 }
 0x410   :  { %v715_v24 = vsel %vm101_vm1, %v3156_v57, 0.0  ;;  %v743_v11 = vmul.f32 %v3156_v57, %v3156_v57 }
 0x412   :  { %v750_v34 = vsel %vm101_vm1, %v743_v11, 0.0 }
 0x417   :  { %v3158_v13 = vpop.f32.mrf.mxu3 }
 0x418   :  { %v718_v58 = vsel %vm101_vm1, %v3158_v13, 0.0  ;;  %v744_v49 = vmul.f32 %v3158_v13, %v3158_v13 }
 0x41a   :  { %v753_v16 = vsel %vm101_vm1, %v744_v49, 0.0 }
 0x41f   :  { %v3160_v45 = vpop.f32.mrf.mxu3 }
 0x420   :  { %v721_v61 = vsel %vm101_vm1, %v3160_v45, 0.0  ;;  %v745_v37 = vmul.f32 %v3160_v45, %v3160_v45 }
 0x421   :  { %722 = vadd.xlane.f32.xlu1 %v721_v61 }
 0x422   :  { %v756_v38 = vsel %vm101_vm1, %v745_v37, 0.0 }
 0x423   :  { %757 = vadd.xlane.f32.xlu0 %v756_v38 }
 0x427   :  { %v3167_v39 = vpop.f32.mrf.mxu3 }
 0x428   :  { %v724_v42 = vsel %vm101_vm1, %v3167_v39, 0.0  ;;  %v746_v12 = vmul.f32 %v3167_v39, %v3167_v39 }
 0x429   :  { %725 = vadd.xlane.f32.xlu2 %v724_v42 }
 0x42a   :  { %v759_v26 = vsel %vm101_vm1, %v746_v12, 0.0 }
 0x42f   :  { %v3171_v2 = vpop.f32.mrf.mxu3 }
 0x430   :  { %v727_v10 = vsel %vm101_vm1, %v3171_v2, 0.0  ;;  %v747_v4 = vmul.f32 %v3171_v2, %v3171_v2 }
 0x431   :  { %728 = vadd.xlane.f32.xlu0 %v727_v10 }
 0x432   :  { %v762_v60 = vsel %vm101_vm1, %v747_v4, 0.0 }
 0x433   :  { %763 = vadd.xlane.f32.xlu2 %v762_v60 }
 0x437   :  { %v3178_v53 = vpop.f32.mrf.mxu3 }
 0x438   :  { %v730_v55 = vsel %vm101_vm1, %v3178_v53, 0.0  ;;  %v748_v62 = vmul.f32 %v3178_v53, %v3178_v53 }
 0x439   :  { %731 = vadd.xlane.f32.xlu1 %v730_v55 }
 0x43a   :  { %v765_v56 = vsel %vm101_vm1, %v748_v62, 0.0 }
 0x43b   :  { %766 = vadd.xlane.f32.xlu0 %v765_v56 }
 0x43f   :  { %v3185_v21 = vpop.f32.mrf.mxu3 }
 0x440   :  { %v733_v14 = vsel %vm231_vm4, %v3185_v21, 0.0  ;;  %v749_v17 = vmul.f32 %v3185_v21, %v3185_v21 }
 0x441   :  { %734 = vadd.xlane.f32.xlu1 %v733_v14 }
 0x442   :  { %v768_v15 = vsel %vm231_vm4, %v749_v17, 0.0 }
 0x443   :  { %719 = vadd.xlane.f32.xlu0 %v718_v58  ;;  %769 = vadd.xlane.f32.xlu2 %v768_v15 }
 0x447   :  { %v713_v6 = vpop.f32.mrf.mxu3 }
 0x449   :  { %760 = vadd.xlane.f32.xlu1 %v759_v26 }
 0x44b   :  { %716 = vadd.xlane.f32.xlu2 %v715_v24 }
 0x44f   :  { %v3203_v23 = vpop.f32.mrf.mxu3 }
 0x450   :  { %v1297_v60 = vsel %vm101_vm1, %v3203_v23, 0.0  ;;  %v1325_v55 = vmul.f32 %v3203_v23, %v3203_v23 }
 0x451   :  { %751 = vadd.xlane.f32.xlu1 %v750_v34 }
 0x452   :  { %v1332_v56 = vsel %vm101_vm1, %v1325_v55, 0.0 }
 0x453   :  { %754 = vadd.xlane.f32.xlu2 %v753_v16 }
 0x457   :  { %v3207_v20 = vpop.f32.mrf.mxu3 }
 0x458   :  { %v1300_v37 = vsel %vm101_vm1, %v3207_v20, 0.0  ;;  %v1326_v62 = vmul.f32 %v3207_v20, %v3207_v20 }
 0x45a   :  { %v1335_v14 = vsel %vm101_vm1, %v1326_v62, 0.0 }
 0x45f   :  { %v3209_v7 = vpop.f32.mrf.mxu3 }
 0x460   :  { %v1303_v0 = vsel %vm101_vm1, %v3209_v7, 0.0  ;;  %v1327_v1 = vmul.f32 %v3209_v7, %v3209_v7 }
 0x461   :  { %1304 = vadd.xlane.f32.xlu0 %v1303_v0 }
 0x462   :  { %v1338_v36 = vsel %vm101_vm1, %v1327_v1, 0.0 }
 0x463   :  { %1339 = vadd.xlane.f32.xlu2 %v1338_v36 }
 0x467   :  { %v3216_v46 = vpop.f32.mrf.mxu3 }
 0x468   :  { %v1306_v27 = vsel %vm101_vm1, %v3216_v46, 0.0  ;;  %v1328_v42 = vmul.f32 %v3216_v46, %v3216_v46 }
 0x469   :  { %1307 = vadd.xlane.f32.xlu1 %v1306_v27 }
 0x46a   :  { %v1341_v4 = vsel %vm101_vm1, %v1328_v42, 0.0 }
 0x46f   :  { %v3220_v40 = vpop.f32.mrf.mxu3 }
 0x470   :  { %v1309_v41 = vsel %vm101_vm1, %v3220_v40, 0.0  ;;  %v1329_v54 = vmul.f32 %v3220_v40, %v3220_v40 }
 0x471   :  { %1310 = vadd.xlane.f32.xlu2 %v1309_v41 }
 0x472   :  { %v1344_v31 = vsel %vm101_vm1, %v1329_v54, 0.0 }
 0x473   :  { %1345 = vadd.xlane.f32.xlu1 %v1344_v31 }
 0x477   :  { %v3227_v3 = vpop.f32.mrf.mxu3 }
 0x478   :  { %v1312_v5 = vsel %vm101_vm1, %v3227_v3, 0.0  ;;  %v1330_v59 = vmul.f32 %v3227_v3, %v3227_v3 }
 0x479   :  { %1313 = vadd.xlane.f32.xlu0 %v1312_v5 }
 0x47a   :  { %v1347_v32 = vsel %vm101_vm1, %v1330_v59, 0.0 }
 0x47b   :  { %1348 = vadd.xlane.f32.xlu2 %v1347_v32 }
 0x47f   :  { %v3234_v22 = vpop.f32.mrf.mxu3 }
 0x480   :  { %v1315_v29 = vsel %vm231_vm4, %v3234_v22, 0.0  ;;  %v1331_v61 = vmul.f32 %v3234_v22, %v3234_v22 }
 0x481   :  { %1316 = vadd.xlane.f32.xlu0 %v1315_v29 }
 0x482   :  { %v1350_v38 = vsel %vm231_vm4, %v1331_v61, 0.0 }
 0x483   :  { %1301 = vadd.xlane.f32.xlu2 %v1300_v37  ;;  %1351 = vadd.xlane.f32.xlu1 %v1350_v38 }
 0x487   :  { %v1295_v10 = vpop.f32.mrf.mxu3 }
 0x489   :  { %1342 = vadd.xlane.f32.xlu0 %v1341_v4 }
 0x48b   :  { %1298 = vadd.xlane.f32.xlu1 %v1297_v60 }
 0x491   :  { %1333 = vadd.xlane.f32.xlu0 %v1332_v56 }
 0x493   :  { %1336 = vadd.xlane.f32.xlu1 %v1335_v14 }
 0x494   :  { %v723_v58 = vpop.xlane.xlu1 %722 }
 0x495   :  { %v3255_v12 = vmul.f32 %v723_v58, %v2676_v18 }
 0x496   :  { %v758_v17 = vpop.xlane.xlu0 %757 }
 0x497   :  { %v780_v26 = vmul.f32 %v3255_v12, %v3255_v12  ;;  %v773_v24 = vmul.f32 %v758_v17, %v2676_v18 }
 0x499   :  { %v787_v0 = vsub.f32 %v773_v24, %v780_v26 }
 0x49b   :  { %v794_v41 = vmax.f32 %v787_v0, 0.0 }
 0x49c   :  { %v726_v15 = vpop.xlane.xlu2 %725 }
 0x49d   :  { %v3274_v29 = vadd.f32 1e-05, %v794_v41  ;;  %v3290_v56 = vmul.f32 %v726_v15, %v2676_v18 }
 0x49f   :  { %v781_v24 = vmul.f32 %v3290_v56, %v3290_v56  ;;  %vm839_vm14 = vweird.f32 %v3274_v29 }
 0x4a4   :  { %v729_v6 = vpop.xlane.xlu0 %728 }
 0x4a5   :  { %v3261_v11 = vmul.f32 %v729_v6, %v2676_v18 }
 0x4a6   :  { %v764_v49 = vpop.xlane.xlu2 %763 }
 0x4a7   :  { %v782_v34 = vmul.f32 %v3261_v11, %v3261_v11  ;;  %v775_v16 = vmul.f32 %v764_v49, %v2676_v18 }
 0x4a9   :  { %v789_v1 = vsub.f32 %v775_v16, %v782_v34 }
 0x4ab   :  { %v796_v36 = vmax.f32 %v789_v1, 0.0 }
 0x4ac   :  { %v732_v27 = vpop.xlane.xlu1 %731 }
 0x4ad   :  { %v3267_v54 = vmul.f32 %v732_v27, %v2676_v18  ;;  %v3269_v5 = vadd.f32 1e-05, %v796_v36 }
 0x4ae   :  { %v767_v31 = vpop.xlane.xlu0 %766 }
 0x4af   :  { %v783_v59 = vmul.f32 %v3267_v54, %v3267_v54  ;;  %v776_v32 = vmul.f32 %v767_v31, %v2676_v18  ;;  %2372 = vrsqrt.f32 %v3269_v5  ;;  %vm859_vm8 = vweird.f32 %v3269_v5 }
 0x4b0   :  { %2374 = vrsqrt.f32 %v3274_v29 }
 0x4b1   :  { %v790_v61 = vsub.f32 %v776_v32, %v783_v59 }
 0x4b3   :  { %v797_v37 = vmax.f32 %v790_v61, 0.0 }
 0x4b4   :  { %v735_v38 = vpop.xlane.xlu1 %734 }
 0x4b5   :  { %v3279_v42 = vmul.f32 %v735_v38, %v2676_v18  ;;  %v3281_v10 = vadd.f32 1e-05, %v797_v37  ;;  %v3287_v62 = vpop.eup %2372 }
 0x4b6   :  { %v770_v4 = vpop.xlane.xlu2 %769  ;;  %v3292_v17 = vpop.eup %2374  ;;  %v854_v6 = vmul.f32 %v3287_v62, %v3269_v5  ;;  %vm860_vm6 = vweird.f32 %v3287_v62  ;;  %v804_v5 = vsub.f32 %v3178_v53, %v3267_v54 }
 0x4b7   :  { %v784_v60 = vmul.f32 %v3279_v42, %v3279_v42  ;;  %v777_v55 = vmul.f32 %v770_v4, %v2676_v18  ;;  %2376 = vrsqrt.f32 %v3281_v10  ;;  %v834_v15 = vmul.f32 %v3292_v17, %v3274_v29  ;;  %v720_v41 = vpop.xlane.xlu0 %719  ;;  %vm3339_vm11 = vmor %vm859_vm8, %vm860_vm6 }
 0x4b8   :  { %v855_v27 = vmul.f32 %v3287_v62, %v854_v6  ;;  %v3312_v38 = vmul.f32 %v720_v41, %v2676_v18  ;;  %vm869_vm5 = vweird.f32 %v3281_v10  ;;  %vm840_vm13 = vweird.f32 %v3292_v17 }
 0x4b9   :  { %v791_v14 = vsub.f32 %v777_v55, %v784_v60  ;;  %v835_v61 = vmul.f32 %v3292_v17, %v834_v15 }
 0x4ba   :  { %v856_v60 = vmul.f32 0.5, %v855_v27 }
 0x4bb   :  { %v798_v58 = vmax.f32 %v791_v14, 0.0 }
 0x4bc   :  { %v761_v26 = vpop.xlane.xlu1 %760  ;;  %v857_v27 = vsub.f32 1.5, %v856_v60 }
 0x4bd   :  { %v812_v49 = vadd.f32 1e-05, %v798_v58  ;;  %v774_v34 = vmul.f32 %v761_v26, %v2676_v18  ;;  %v3299_v16 = vpop.eup %2376  ;;  %v836_v26 = vmul.f32 0.5, %v835_v61 }
 0x4be   :  { %v717_v0 = vpop.xlane.xlu2 %716  ;;  %v864_v1 = vmul.f32 %v3299_v16, %v3281_v10  ;;  %vm870_vm15 = vweird.f32 %v3299_v16 }
 0x4bf   :  { %2378 = vrsqrt.f32 %v812_v49  ;;  %v788_v36 = vsub.f32 %v774_v34, %v781_v24  ;;  %v3308_v32 = vmul.f32 %v717_v0, %v2676_v18  ;;  %v779_v0 = vmul.f32 %v3312_v38, %v3312_v38  ;;  %vm3335_vm9 = vmor %vm869_vm5, %vm870_vm15 }
 0x4c0   :  { %v865_v31 = vmul.f32 %v3299_v16, %v864_v1  ;;  %v837_v47 = vsub.f32 1.5, %v836_v26  ;;  %vm879_vm10 = vweird.f32 %v812_v49  ;;  %vm3362_vm5 = vmor %vm839_vm14, %vm840_vm13 }
 0x4c1   :  { %v795_v59 = vmax.f32 %v788_v36, 0.0  ;;  %v778_v58 = vmul.f32 %v3308_v32, %v3308_v32 }
 0x4c2   :  { %v866_v37 = vmul.f32 0.5, %v865_v31 }
 0x4c3   :  { %v3314_v4 = vadd.f32 1e-05, %v795_v59 }
 0x4c4   :  { %v752_v55 = vpop.xlane.xlu1 %751  ;;  %v867_v24 = vsub.f32 1.5, %v866_v37 }
 0x4c5   :  { %v2379_v14 = vpop.eup %2378  ;;  %2380 = vrsqrt.f32 %v3314_v4  ;;  %v771_v6 = vmul.f32 %v752_v55, %v2676_v18  ;;  %vm849_vm6 = vweird.f32 %v3314_v4 }
 0x4c6   :  { %v874_v34 = vmul.f32 %v2379_v14, %v812_v49  ;;  %v755_v15 = vpop.xlane.xlu2 %754  ;;  %v868_v33 = vmul.f32 %v3299_v16, %v867_v24  ;;  %vm880_vm7 = vweird.f32 %v2379_v14 }
 0x4c7   :  { %v785_v1 = vsub.f32 %v771_v6, %v778_v58  ;;  %v772_v36 = vmul.f32 %v755_v15, %v2676_v18  ;;  %v858_v6 = vmul.f32 %v3287_v62, %v857_v27  ;;  %vm881_vm12 = vmor %vm879_vm10, %vm880_vm7  ;;  %v838_v27 = vmul.f32 %v3292_v17, %v837_v47 }
 0x4c8   :  { %v875_v41 = vmul.f32 %v2379_v14, %v874_v34  ;;  %v872_v15 = vsel %vm3335_vm9, %v3299_v16, %v868_v33  ;;  %v803_v33 = vsub.f32 %v3171_v2, %v3261_v11 }
 0x4c9   :  { %v792_v31 = vmax.f32 %v785_v1, 0.0  ;;  %v786_v59 = vsub.f32 %v772_v36, %v779_v0  ;;  %v805_v0 = vsub.f32 %v3185_v21, %v3279_v42  ;;  %v862_v36 = vsel %vm3339_vm11, %v3287_v62, %v858_v6 }
 0x4ca   :  { %v876_v50 = vmul.f32 0.5, %v875_v41  ;;  %v888_v54 = vmul.f32 %v872_v15, %v804_v5  ;;  %v842_v2 = vsel %vm3362_vm5, %v3292_v17, %v838_v27  ;;  %v801_v62 = vsub.f32 %v3160_v45, %v3255_v12 }
 0x4cb   :  { %v2381_v61 = vpop.eup %2380  ;;  %v3326_v37 = vadd.f32 1e-05, %v792_v31  ;;  %v793_v55 = vmax.f32 %v786_v59, 0.0  ;;  %v799_v15 = vsub.f32 %v3156_v57, %v3308_v32 }
 0x4cc   :  { %v877_v58 = vsub.f32 1.5, %v876_v50  ;;  %v844_v60 = vmul.f32 %v2381_v61, %v3314_v4  ;;  %vm850_vm15 = vweird.f32 %v2381_v61  ;;  %v3376_v31 = vadd.f32 %v888_v54, %v3061_v51  ;;  %v2336_v54 = vld [vmem:[%s4364_s4 + $0x54] sm:$0xff] }
 0x4cd   :  { %2382 = vrsqrt.f32 %v3326_v37  ;;  %v3333_v26 = vadd.f32 1e-05, %v793_v55  ;;  %vm851_vm7 = vmor %vm849_vm6, %vm850_vm15  ;;  %v802_v4 = vsub.f32 %v3167_v39, %v3290_v56  ;;  %v885_v45 = vmul.f32 %v842_v2, %v801_v62 }
 0x4ce   :  { %v845_v10 = vmul.f32 %v2381_v61, %v844_v60  ;;  %v878_v34 = vmul.f32 %v2379_v14, %v877_v58  ;;  %vm819_vm9 = vweird.f32 %v3326_v37 }
 0x4cf   :  { %2384 = vrsqrt.f32 %v3333_v26  ;;  %v3391_v56 = vadd.f32 %v885_v45, %v3074_v63 }
 0x4d0   :  { %v846_v49 = vmul.f32 0.5, %v845_v10  ;;  %v882_v1 = vsel %vm881_vm12, %v2379_v14, %v878_v34  ;;  %v887_v14 = vmul.f32 %v862_v36, %v803_v33  ;;  %vm829_vm12 = vweird.f32 %v3333_v26 }
 0x4d1   :  { %v889_v53 = vmul.f32 %v882_v1, %v805_v0 }
 0x4d2   :  { %v847_v21 = vsub.f32 1.5, %v846_v49  ;;  %v3383_v60 = vadd.f32 %v887_v14, %v3066_v19 }
 0x4d3   :  { %v2383_v42 = vpop.eup %2382  ;;  %v3360_v16 = vadd.f32 %v889_v53, %v3043_v52 }
 0x4d4   :  { %v814_v47 = vmul.f32 %v2383_v42, %v3326_v37  ;;  %v848_v11 = vmul.f32 %v2381_v61, %v847_v21  ;;  %v899_v51 = vpack.c.bf16 %v3376_v31, %v3383_v60  ;;  %vm820_vm8 = vweird.f32 %v2383_v42  ;;  %v1305_v49 = vpop.xlane.xlu0 %1304 }
 0x4d5   :  { %v2385_v29 = vpop.eup %2384  ;;  %v900_v52 = vpack.c.bf16 %v3360_v16, %v3360_v16  ;;  %vm821_vm11 = vmor %vm819_vm9, %vm820_vm8  ;;  %v800_v37 = vsub.f32 %v3158_v13, %v3312_v38  ;;  %v3402_v57 = vmul.f32 %v1305_v49, %v2676_v18 }
 0x4d6   :  { %v815_v59 = vmul.f32 %v2383_v42, %v814_v47  ;;  %v824_v55 = vmul.f32 %v2385_v29, %v3333_v26  ;;  %v852_v58 = vsel %vm851_vm7, %v2381_v61, %v848_v11  ;;  %v1340_v61 = vpop.xlane.xlu2 %1339  ;;  %vm830_vm10 = vweird.f32 %v2385_v29 }
 0x4d7   :  { %v932_v17 = vsel %vm181_vm2, %v900_v52, 0  ;;  %v886_v24 = vmul.f32 %v852_v58, %v802_v4  ;;  %vm831_vm13 = vmor %vm829_vm12, %vm830_vm10  ;;  %v1362_v21 = vmul.f32 %v3402_v57, %v3402_v57 }
 0x4d8   :  { %v816_v12 = vmul.f32 0.5, %v815_v59  ;;  %v825_v6 = vmul.f32 %v2385_v29, %v824_v55  ;;  %938 = vmatpush.bf16.msrb.mxu0 %v932_v17 }
 0x4d9   :  { %v3388_v39 = vadd.f32 %v886_v24, %v3071_v30 }
 0x4da   :  { %v817_v10 = vsub.f32 1.5, %v816_v12  ;;  %v826_v34 = vmul.f32 0.5, %v825_v6 }
 0x4db   :  { %v898_v30 = vpack.c.bf16 %v3388_v39, %v3391_v56 }
 0x4dc   :  { %v827_v19 = vsub.f32 1.5, %v826_v34  ;;  %939 = vmatpush.bf16.msrb.mxu0 %v899_v51  ;;  %v818_v50 = vmul.f32 %v2383_v42, %v817_v10  ;;  %v1308_v5 = vpop.xlane.xlu1 %1307  ;;  %v2337_v51 = vld [vmem:[%s4364_s4 + $0x5c] sm:$0xff] }
 0x4de   :  { %v822_v0 = vsel %vm821_vm11, %v2383_v42, %v818_v50  ;;  %v828_v63 = vmul.f32 %v2385_v29, %v827_v19  ;;  %v3452_v50 = vmul.f32 %v1308_v5, %v2676_v18 }
 0x4df   :  { %v883_v36 = vmul.f32 %v822_v0, %v799_v15 }
 0x4e0   :  { %940 = vmatpush.bf16.msrb.mxu0 %v898_v30  ;;  %v832_v1 = vsel %vm831_vm13, %v2385_v29, %v828_v63 }
 0x4e1   :  { %v884_v27 = vmul.f32 %v832_v1, %v800_v37  ;;  %v3405_v32 = vadd.f32 %v883_v36, %v3091_v25  ;;  %v1355_v25 = vmul.f32 %v1340_v61, %v2676_v18  ;;  %v1363_v36 = vmul.f32 %v3452_v50, %v3452_v50 }
 0x4e3   :  { %v3408_v26 = vadd.f32 %v884_v27, %v3094_v28  ;;  %v1369_v41 = vsub.f32 %v1355_v25, %v1362_v21 }
 0x4e4   :  { %v1311_v33 = vpop.xlane.xlu2 %1310 }
 0x4e5   :  { %v3411_v53 = vmul.f32 %v1311_v33, %v2676_v18  ;;  %v897_v13 = vpack.c.bf16 %v3408_v26, %v3405_v32  ;;  %v1376_v62 = vmax.f32 %v1369_v41, 0.0 }
 0x4e6   :  { %v1346_v38 = vpop.xlane.xlu1 %1345 }
 0x4e7   :  { %v1364_v28 = vmul.f32 %v3411_v53, %v3411_v53  ;;  %v1357_v42 = vmul.f32 %v1346_v38, %v2676_v18  ;;  %941 = vmatpush.bf16.msrb.mxu0 %v897_v13  ;;  %v3433_v58 = vadd.f32 1e-05, %v1376_v62 }
 0x4e9   :  { %v1371_v14 = vsub.f32 %v1357_v42, %v1364_v28  ;;  %vm1421_vm13 = vweird.f32 %v3433_v58 }
 0x4ea   :  { %2275 = vmatmul.msk.bf16.vlgmr.msrb.gmra.mxu0 %vm168_vm3, %v2336_v54 }
 0x4eb   :  { %v1378_v47 = vmax.f32 %v1371_v14, 0.0 }
 0x4ec   :  { %v1314_v2 = vpop.xlane.xlu0 %1313 }
 0x4ed   :  { %v3426_v11 = vmul.f32 %v1314_v2, %v2676_v18  ;;  %v3430_v4 = vadd.f32 1e-05, %v1378_v47 }
 0x4ee   :  { %v1349_v29 = vpop.xlane.xlu2 %1348 }
 0x4ef   :  { %v1365_v52 = vmul.f32 %v3426_v11, %v3426_v11  ;;  %v1358_v59 = vmul.f32 %v1349_v29, %v2676_v18  ;;  %2386 = vrsqrt.f32 %v3430_v4  ;;  %vm1441_vm9 = vweird.f32 %v3430_v4 }
 0x4f0   :  { %2388 = vrsqrt.f32 %v3433_v58 }
 0x4f1   :  { %v1372_v55 = vsub.f32 %v1358_v59, %v1365_v52 }
 0x4f3   :  { %v1379_v17 = vmax.f32 %v1372_v55, 0.0 }
 0x4f4   :  { %v1317_v45 = vpop.xlane.xlu0 %1316 }
 0x4f5   :  { %v3437_v12 = vmul.f32 %v1317_v45, %v2676_v18  ;;  %v3439_v6 = vadd.f32 1e-05, %v1379_v17  ;;  %v3449_v61 = vpop.eup %2386  ;;  %v2338_v45 = vld [vmem:[%s4364_s4 + $0x64] sm:$0xff] }
 0x4f6   :  { %v1352_v24 = vpop.xlane.xlu1 %1351  ;;  %v3455_v0 = vpop.eup %2388  ;;  %v1436_v63 = vmul.f32 %v3449_v61, %v3430_v4  ;;  %vm1442_vm15 = vweird.f32 %v3449_v61 }
 0x4f7   :  { %v1366_v10 = vmul.f32 %v3437_v12, %v3437_v12  ;;  %v1359_v34 = vmul.f32 %v1352_v24, %v2676_v18  ;;  %2390 = vrsqrt.f32 %v3439_v6  ;;  %v1416_v33 = vmul.f32 %v3455_v0, %v3433_v58  ;;  %v1302_v13 = vpop.xlane.xlu2 %1301  ;;  %vm3517_vm12 = vmor %vm1441_vm9, %vm1442_vm15 }
 0x4f8   :  { %v1437_v54 = vmul.f32 %v3449_v61, %v1436_v63  ;;  %v3474_v14 = vmul.f32 %v1302_v13, %v2676_v18  ;;  %vm1451_vm6 = vweird.f32 %v3439_v6  ;;  %vm1422_vm11 = vweird.f32 %v3455_v0 }
 0x4f9   :  { %v1373_v19 = vsub.f32 %v1359_v34, %v1366_v10  ;;  %v1417_v41 = vmul.f32 %v3455_v0, %v1416_v33  ;;  %vm3538_vm15 = vmor %vm1421_vm13, %vm1422_vm11 }
 0x4fa   :  { %2276 = vmatmul.msk.bf16.gmra.mxu0 %vm168_vm3, %v2337_v51  ;;  %v1438_v62 = vmul.f32 0.5, %v1437_v54  ;;  %v1361_v51 = vmul.f32 %v3474_v14, %v3474_v14 }
 0x4fb   :  { %v1380_v15 = vmax.f32 %v1373_v19, 0.0  ;;  %v1418_v19 = vmul.f32 0.5, %v1417_v41 }
 0x4fc   :  { %v1343_v30 = vpop.xlane.xlu0 %1342 }
 0x4fd   :  { %v1394_v37 = vadd.f32 1e-05, %v1380_v15  ;;  %v1356_v49 = vmul.f32 %v1343_v30, %v2676_v18  ;;  %v3460_v1 = vpop.eup %2390  ;;  %v1439_v30 = vsub.f32 1.5, %v1438_v62  ;;  %v1387_v62 = vsub.f32 %v3234_v22, %v3437_v12 }
 0x4fe   :  { %v1299_v27 = vpop.xlane.xlu1 %1298  ;;  %v1446_v5 = vmul.f32 %v3460_v1, %v3439_v6  ;;  %vm1452_vm14 = vweird.f32 %v3460_v1  ;;  %v2206_v6 = vld [vmem:[%s4364_s4 + $0x6c] sm:$0x1]  ;;  %v1386_v22 = vsub.f32 %v3227_v3, %v3426_v11 }
 0x4ff   :  { %2392 = vrsqrt.f32 %v1394_v37  ;;  %v1370_v38 = vsub.f32 %v1356_v49, %v1363_v36  ;;  %v3471_v25 = vmul.f32 %v1299_v27, %v2676_v18  ;;  %vm3499_vm7 = vmor %vm1451_vm6, %vm1452_vm14  ;;  %vm1461_vm8 = vweird.f32 %v1394_v37 }
 0x500   :  { %v1447_v21 = vmul.f32 %v3460_v1, %v1446_v5 }
 0x501   :  { %v1377_v28 = vmax.f32 %v1370_v38, 0.0  ;;  %v1360_v52 = vmul.f32 %v3471_v25, %v3471_v25  ;;  %v1419_v38 = vsub.f32 1.5, %v1418_v19 }
 0x502   :  { %v1448_v42 = vmul.f32 0.5, %v1447_v21  ;;  %v1440_v21 = vmul.f32 %v3449_v61, %v1439_v30 }
 0x503   :  { %v3477_v47 = vadd.f32 1e-05, %v1377_v28  ;;  %v1420_v12 = vmul.f32 %v3455_v0, %v1419_v38 }
 0x504   :  { %v1334_v2 = vpop.xlane.xlu0 %1333  ;;  %v1449_v24 = vsub.f32 1.5, %v1448_v42 }
 0x505   :  { %v2393_v29 = vpop.eup %2392  ;;  %v1353_v59 = vmul.f32 %v1334_v2, %v2676_v18  ;;  %2394 = vrsqrt.f32 %v3477_v47 }
 0x506   :  { %v1456_v55 = vmul.f32 %v2393_v29, %v1394_v37  ;;  %v1337_v17 = vpop.xlane.xlu1 %1336  ;;  %v1450_v27 = vmul.f32 %v3460_v1, %v1449_v24  ;;  %vm1462_vm5 = vweird.f32 %v2393_v29  ;;  %v914_v24 = vunpack.c.l.b16 %v2206_v6 }
 0x507   :  { %v1367_v10 = vsub.f32 %v1353_v59, %v1360_v52  ;;  %v1354_v34 = vmul.f32 %v1337_v17, %v2676_v18  ;;  %vm1463_vm10 = vmor %vm1461_vm8, %vm1462_vm5  ;;  %vm1431_vm5 = vweird.f32 %v3477_v47 }
 0x508   :  { %v1457_v15 = vmul.f32 %v2393_v29, %v1456_v55  ;;  %v1454_v59 = vsel %vm3499_vm7, %v3460_v1, %v1450_v27  ;;  %v1444_v1 = vsel %vm3517_vm12, %v3449_v61, %v1440_v21 }
 0x509   :  { %v1374_v63 = vmax.f32 %v1367_v10, 0.0  ;;  %v1368_v49 = vsub.f32 %v1354_v34, %v1361_v51  ;;  %v1470_v51 = vmul.f32 %v1454_v59, %v1386_v22  ;;  %v4392_v59 = vld [vmem:[#allocation3_spill] sm:$0xff] }
 0x50a   :  { %v1458_v36 = vmul.f32 0.5, %v1457_v15  ;;  %2277 = vmatmul.msk.bf16.gmra.mxu0 %vm168_vm3, %v2338_v45  ;;  %v1385_v45 = vsub.f32 %v3220_v40, %v3411_v53  ;;  %v3551_v15 = vpack.c.b16 %v914_v24, %v914_v24 }
 0x50b   :  { %v3492_v5 = vadd.f32 1e-05, %v1374_v63  ;;  %v1375_v33 = vmax.f32 %v1368_v49, 0.0  ;;  %v2395_v13 = vpop.eup %2394  ;;  %v3554_v30 = vadd.f32 %v1470_v51, %v3102_v48 }
 0x50c   :  { %v1459_v54 = vsub.f32 1.5, %v1458_v36  ;;  %v1426_v28 = vmul.f32 %v2395_v13, %v3477_v47  ;;  %vm1432_vm14 = vweird.f32 %v2395_v13  ;;  %v1469_v53 = vmul.f32 %v1444_v1, %v1385_v45 }
 0x50d   :  { %2396 = vrsqrt.f32 %v3492_v5  ;;  %v3503_v2 = vadd.f32 1e-05, %v1375_v33  ;;  %vm1433_vm6 = vmor %vm1431_vm5, %vm1432_vm14  ;;  %vm1401_vm8 = vweird.f32 %v3492_v5 }
 0x50e   :  { %v1460_v41 = vmul.f32 %v2393_v29, %v1459_v54  ;;  %v1427_v52 = vmul.f32 %v2395_v13, %v1426_v28  ;;  %v1381_v28 = vsub.f32 %v3203_v23, %v3471_v25 }
 0x50f   :  { %2398 = vrsqrt.f32 %v3503_v2  ;;  %vm1411_vm11 = vweird.f32 %v3503_v2 }
 0x510   :  { %v1464_v4 = vsel %vm1463_vm10, %v2393_v29, %v1460_v41  ;;  %v1428_v55 = vmul.f32 0.5, %v1427_v52  ;;  %v1383_v29 = vsub.f32 %v3209_v7, %v3402_v57  ;;  %v1384_v57 = vsub.f32 %v3216_v46, %v3452_v50 }
 0x511   :  { %v1471_v17 = vmul.f32 %v1464_v4, %v1387_v62 }
 0x512   :  { %v1429_v3 = vsub.f32 1.5, %v1428_v55 }
 0x513   :  { %v2397_v10 = vpop.eup %2396  ;;  %v3532_v11 = vadd.f32 %v1471_v17, %v3081_v35  ;;  %v1424_v35 = vsel %vm3538_vm15, %v3455_v0, %v1420_v12  ;;  %v3559_v0 = vadd.f32 %v1469_v53, %v3098_v43 }
 0x514   :  { %v1396_v40 = vmul.f32 %v2397_v10, %v3492_v5  ;;  %v1430_v34 = vmul.f32 %v2395_v13, %v1429_v3  ;;  %v1467_v27 = vmul.f32 %v1424_v35, %v1383_v29  ;;  %vm1402_vm7 = vweird.f32 %v2397_v10 }
 0x515   :  { %v1482_v58 = vpack.c.bf16 %v3532_v11, %v3532_v11  ;;  %v2399_v7 = vpop.eup %2398  ;;  %v1481_v48 = vpack.c.bf16 %v3554_v30, %v3559_v0  ;;  %vm1403_vm9 = vmor %vm1401_vm8, %vm1402_vm7  ;;  %v1382_v5 = vsub.f32 %v3207_v20, %v3474_v14  ;;  %v2457_v20 = vld [vmem:[%s4364_s4 + $0x24] sm:$0xff] }
 0x516   :  { %v1397_v19 = vmul.f32 %v2397_v10, %v1396_v40  ;;  %v1406_v47 = vmul.f32 %v2399_v7, %v3503_v2  ;;  %v1434_v49 = vsel %vm1433_vm6, %v2395_v13, %v1430_v34  ;;  %v3570_v43 = vadd.f32 %v1467_v27, %v3112_v44  ;;  %v2456_v2 = vld [vmem:[%s4364_s4 + $0x1c] sm:$0xff] }
 0x517   :  { %v1484_v63 = vsel %vm181_vm2, %v1482_v58, 0  ;;  %v1468_v33 = vmul.f32 %v1434_v49, %v1384_v57  ;;  %vm1412_vm10 = vweird.f32 %v2399_v7  ;;  %v4393_v14 = vld [vmem:[#allocation2_spill] sm:$0xff] }
 0x518   :  { %v1398_v36 = vmul.f32 0.5, %v1397_v19  ;;  %1490 = vmatpush.bf16.msra.mxu0 %v1484_v63  ;;  %v1407_v46 = vmul.f32 %v2399_v7, %v1406_v47  ;;  %vm1413_vm12 = vmor %vm1411_vm11, %vm1412_vm10 }
 0x519   :  { %v3566_v38 = vadd.f32 %v1468_v33, %v3116_v9 }
 0x51a   :  { %v1399_v50 = vsub.f32 1.5, %v1398_v36  ;;  %2278 = vmatmul.msk.bf16.gmra.mxu0 %vm168_vm3, %v3551_v15  ;;  %v1408_v13 = vmul.f32 0.5, %v1407_v46 }
 0x51b   :  { %v1480_v42 = vpack.c.bf16 %v3566_v38, %v3570_v43 }
 0x51c   :  { %v1400_v54 = vmul.f32 %v2397_v10, %v1399_v50  ;;  %1491 = vmatpush.bf16.msra.mxu0 %v1481_v48  ;;  %v1409_v21 = vsub.f32 1.5, %v1408_v13 }
 0x51e   :  { %v1404_v41 = vsel %vm1403_vm9, %v2397_v10, %v1400_v54  ;;  %v1410_v9 = vmul.f32 %v2399_v7, %v1409_v21 }
 0x51f   :  { %v1465_v44 = vmul.f32 %v1404_v41, %v1381_v28 }
 0x520   :  { %1492 = vmatpush.bf16.msra.mxu0 %v1480_v42  ;;  %v1414_v62 = vsel %vm1413_vm12, %v2399_v7, %v1410_v9 }
 0x521   :  { %v1466_v52 = vmul.f32 %v1414_v62, %v1382_v5  ;;  %v3580_v6 = vadd.f32 %v1465_v44, %v3125_v8  ;;  %v2458_v8 = vld [vmem:[%s4364_s4 + $0x2c] sm:$0xff] }
 0x523   :  { %v3583_v23 = vadd.f32 %v1466_v52, %v4392_v59 }
 0x525   :  { %v1479_v25 = vpack.c.bf16 %v3583_v23, %v3580_v6 }
 0x527   :  { %1493 = vmatpush.bf16.msra.mxu0 %v1479_v25 }
 0x52a   :  { %2302 = vmatmul.msk.bf16.vlgmr.msra.gmra.mxu0 %vm168_vm3, %v2456_v2 }
 0x53a   :  { %2303 = vmatmul.msk.bf16.gmra.mxu0 %vm168_vm3, %v2457_v20 }
 0x54a   :  { %2304 = vmatmul.msk.bf16.gmra.mxu0 %vm168_vm3, %v2458_v8 }
 0x55a   :  { %2305 = vmatmul.msk.bf16.gmra.mxu0 %vm168_vm3, %v4393_v14 }
 0x567   :  { %v3601_v37 = vpop.f32.mrf.mxu0 }
 0x568   :  { %v962_v22 = vsel %vm101_vm1, %v3601_v37, 0.0  ;;  %v990_v4 = vmul.f32 %v3601_v37, %v3601_v37 }
 0x569   :  { %963 = vadd.xlane.f32.xlu2 %v962_v22 }
 0x56a   :  { %v997_v12 = vsel %vm101_vm1, %v990_v4, 0.0 }
 0x56b   :  { %998 = vadd.xlane.f32.xlu1 %v997_v12  ;;  %v45_v12 = vld [vmem:[%s4365_s8 + $0x8] sm:$0xf] }
 0x56f   :  { %v3608_v55 = vpop.f32.mrf.mxu0 }
 0x570   :  { %v965_v17 = vsel %vm101_vm1, %v3608_v55, 0.0  ;;  %v991_v1 = vmul.f32 %v3608_v55, %v3608_v55 }
 0x571   :  { %966 = vadd.xlane.f32.xlu0 %v965_v17 }
 0x572   :  { %v1000_v45 = vsel %vm101_vm1, %v991_v1, 0.0 }
 0x573   :  { %1001 = vadd.xlane.f32.xlu2 %v1000_v45  ;;  %v1156_v45 = vunpack.c.l.b16 %v45_v12 }
 0x577   :  { %v3615_v24 = vpop.f32.mrf.mxu0 }
 0x578   :  { %v968_v51 = vsel %vm101_vm1, %v3615_v24, 0.0  ;;  %v992_v10 = vmul.f32 %v3615_v24, %v3615_v24 }
 0x579   :  { %969 = vadd.xlane.f32.xlu0 %v968_v51 }
 0x57a   :  { %v1003_v3 = vsel %vm101_vm1, %v992_v10, 0.0 }
 0x57b   :  { %1004 = vadd.xlane.f32.xlu2 %v1003_v3 }
 0x57f   :  { %v3622_v29 = vpop.f32.mrf.mxu0 }
 0x580   :  { %v971_v61 = vsel %vm101_vm1, %v3622_v29, 0.0  ;;  %v993_v40 = vmul.f32 %v3622_v29, %v3622_v29 }
 0x581   :  { %972 = vadd.xlane.f32.xlu1 %v971_v61 }
 0x582   :  { %v1006_v53 = vsel %vm101_vm1, %v993_v40, 0.0  ;;  %v1158_v40 = vpack.c.b16 %v1156_v45, %v1156_v45 }
 0x583   :  { %1007 = vadd.xlane.f32.xlu0 %v1006_v53 }
 0x587   :  { %v3629_v34 = vpop.f32.mrf.mxu0 }
 0x588   :  { %v974_v58 = vsel %vm101_vm1, %v3629_v34, 0.0  ;;  %v994_v35 = vmul.f32 %v3629_v34, %v3629_v34 }
 0x589   :  { %975 = vadd.xlane.f32.xlu1 %v974_v58 }
 0x58a   :  { %v1009_v7 = vsel %vm101_vm1, %v994_v35, 0.0 }
 0x58b   :  { %1010 = vadd.xlane.f32.xlu0 %v1009_v7  ;;  %v1173_v7 = vsel %vm114_vm0, %v1158_v40, 0 }
 0x58c   :  { %1181 = vmatpush.bf16.msrb.mxu1 %v1173_v7  ;;  %2152 = vmatpush.bf16.msra.mxu3 %v1173_v7 }
 0x58f   :  { %v3636_v57 = vpop.f32.mrf.mxu0 }
 0x590   :  { %v977_v19 = vsel %vm101_vm1, %v3636_v57, 0.0  ;;  %v995_v47 = vmul.f32 %v3636_v57, %v3636_v57 }
 0x591   :  { %978 = vadd.xlane.f32.xlu2 %v977_v19 }
 0x592   :  { %v1012_v63 = vsel %vm101_vm1, %v995_v47, 0.0 }
 0x593   :  { %1013 = vadd.xlane.f32.xlu1 %v1012_v63 }
 0x597   :  { %v3643_v49 = vpop.f32.mrf.mxu0 }
 0x598   :  { %v980_v36 = vsel %vm231_vm4, %v3643_v49, 0.0  ;;  %v996_v27 = vmul.f32 %v3643_v49, %v3643_v49 }
 0x599   :  { %981 = vadd.xlane.f32.xlu2 %v980_v36 }
 0x59a   :  { %v1015_v33 = vsel %vm231_vm4, %v996_v27, 0.0  ;;  %v2326_v27 = vld [vmem:[%s4365_s8] sm:$0xff] }
 0x59b   :  { %1016 = vadd.xlane.f32.xlu1 %v1015_v33  ;;  %1182 = vmatpush.bf16.msrb.mxu1 %v2326_v27 }
 0x59c   :  { %2153 = vmatpush.bf16.msra.mxu3 %v2326_v27 }
 0x59f   :  { %v960_v46 = vpop.f32.mrf.mxu0 }
 0x5a7   :  { %v3650_v50 = vpop.f32.mrf.mxu0 }
 0x5a8   :  { %v1542_v1 = vmul.f32 %v3650_v50, %v3650_v50  ;;  %v1514_v47 = vsel %vm101_vm1, %v3650_v50, 0.0 }
 0x5aa   :  { %v1549_v35 = vsel %vm101_vm1, %v1542_v1, 0.0 }
 0x5af   :  { %v3652_v48 = vpop.f32.mrf.mxu0 }
 0x5b7   :  { %v3654_v13 = vpop.f32.mrf.mxu0 }
 0x5b8   :  { %v1520_v54 = vsel %vm101_vm1, %v3654_v13, 0.0  ;;  %v1544_v61 = vmul.f32 %v3654_v13, %v3654_v13 }
 0x5b9   :  { %1521 = vadd.xlane.f32.xlu1 %v1520_v54 }
 0x5ba   :  { %v1555_v63 = vsel %vm101_vm1, %v1544_v61, 0.0 }
 0x5bf   :  { %v3658_v21 = vpop.f32.mrf.mxu0 }
 0x5c0   :  { %v1523_v28 = vsel %vm101_vm1, %v3658_v21, 0.0  ;;  %v1545_v25 = vmul.f32 %v3658_v21, %v3658_v21 }
 0x5c1   :  { %1524 = vadd.xlane.f32.xlu2 %v1523_v28 }
 0x5c2   :  { %v1558_v20 = vsel %vm101_vm1, %v1545_v25, 0.0 }
 0x5c7   :  { %v3662_v42 = vpop.f32.mrf.mxu0 }
 0x5c8   :  { %v1526_v41 = vsel %vm101_vm1, %v3662_v42, 0.0  ;;  %v1546_v9 = vmul.f32 %v3662_v42, %v3662_v42 }
 0x5c9   :  { %1527 = vadd.xlane.f32.xlu0 %v1526_v41  ;;  %v1543_v41 = vmul.f32 %v3652_v48, %v3652_v48 }
 0x5ca   :  { %v1561_v5 = vsel %vm101_vm1, %v1546_v9, 0.0 }
 0x5cb   :  { %1562 = vadd.xlane.f32.xlu2 %v1561_v5 }
 0x5cf   :  { %v3669_v44 = vpop.f32.mrf.mxu0 }
 0x5d0   :  { %v1529_v62 = vsel %vm101_vm1, %v3669_v44, 0.0  ;;  %v1547_v52 = vmul.f32 %v3669_v44, %v3669_v44 }
 0x5d1   :  { %1530 = vadd.xlane.f32.xlu1 %v1529_v62  ;;  %v1552_v62 = vsel %vm101_vm1, %v1543_v41, 0.0 }
 0x5d2   :  { %v1564_v59 = vsel %vm101_vm1, %v1547_v52, 0.0  ;;  %v1517_v52 = vsel %vm101_vm1, %v3652_v48, 0.0 }
 0x5d3   :  { %1565 = vadd.xlane.f32.xlu0 %v1564_v59 }
 0x5d7   :  { %v3678_v2 = vpop.f32.mrf.mxu0 }
 0x5d8   :  { %v1548_v8 = vmul.f32 %v3678_v2, %v3678_v2  ;;  %v1532_v14 = vsel %vm231_vm4, %v3678_v2, 0.0 }
 0x5d9   :  { %1559 = vadd.xlane.f32.xlu1 %v1558_v20 }
 0x5da   :  { %v1567_v22 = vsel %vm231_vm4, %v1548_v8, 0.0 }
 0x5db   :  { %1568 = vadd.xlane.f32.xlu2 %v1567_v22  ;;  %1533 = vadd.xlane.f32.xlu0 %v1532_v14 }
 0x5dc   :  { %v964_v4 = vpop.xlane.xlu2 %963 }
 0x5dd   :  { %v3690_v17 = vmul.f32 %v964_v4, %v2676_v18 }
 0x5de   :  { %v999_v51 = vpop.xlane.xlu1 %998 }
 0x5df   :  { %v1025_v10 = vmul.f32 %v3690_v17, %v3690_v17  ;;  %v1018_v3 = vmul.f32 %v999_v51, %v2676_v18  ;;  %v1512_v53 = vpop.f32.mrf.mxu0 }
 0x5e1   :  { %v1032_v58 = vsub.f32 %v1018_v3, %v1025_v10  ;;  %1550 = vadd.xlane.f32.xlu1 %v1549_v35 }
 0x5e3   :  { %v1039_v19 = vmax.f32 %v1032_v58, 0.0  ;;  %1515 = vadd.xlane.f32.xlu2 %v1514_v47  ;;  %1556 = vadd.xlane.f32.xlu0 %v1555_v63 }
 0x5e4   :  { %v967_v36 = vpop.xlane.xlu0 %966 }
 0x5e5   :  { %v1053_v33 = vadd.f32 1e-05, %v1039_v19  ;;  %v3708_v46 = vmul.f32 %v967_v36, %v2676_v18 }
 0x5e6   :  { %v1002_v54 = vpop.xlane.xlu2 %1001 }
 0x5e7   :  { %2400 = vrsqrt.f32 %v1053_v33  ;;  %v1026_v28 = vmul.f32 %v3708_v46, %v3708_v46  ;;  %v1019_v9 = vmul.f32 %v1002_v54, %v2676_v18  ;;  %vm1066_vm13 = vweird.f32 %v1053_v33 }
 0x5e9   :  { %v1033_v5 = vsub.f32 %v1019_v9, %v1026_v28 }
 0x5eb   :  { %v1040_v59 = vmax.f32 %v1033_v5, 0.0  ;;  %1553 = vadd.xlane.f32.xlu2 %v1552_v62  ;;  %1518 = vadd.xlane.f32.xlu0 %v1517_v52 }
 0x5ec   :  { %v970_v25 = vpop.xlane.xlu0 %969 }
 0x5ed   :  { %v2401_v20 = vpop.eup %2400  ;;  %v3719_v8 = vmul.f32 %v970_v25, %v2676_v18  ;;  %v1054_v22 = vadd.f32 1e-05, %v1040_v59 }
 0x5ee   :  { %v1061_v14 = vmul.f32 %v2401_v20, %v1053_v33  ;;  %v1005_v4 = vpop.xlane.xlu2 %1004  ;;  %vm1067_vm0 = vweird.f32 %v2401_v20  ;;  %v1046_v33 = vsub.f32 %v3601_v37, %v3690_v17 }
 0x5ef   :  { %v1027_v12 = vmul.f32 %v3719_v8, %v3719_v8  ;;  %v1020_v1 = vmul.f32 %v1005_v4, %v2676_v18  ;;  %2402 = vrsqrt.f32 %v1054_v22  ;;  %vm3730_vm14 = vmor %vm1066_vm13, %vm1067_vm0  ;;  %vm1076_vm5 = vweird.f32 %v1054_v22 }
 0x5f0   :  { %v1062_v45 = vmul.f32 %v2401_v20, %v1061_v14 }
 0x5f1   :  { %v1034_v51 = vsub.f32 %v1020_v1, %v1027_v12 }
 0x5f2   :  { %v1063_v10 = vmul.f32 0.5, %v1062_v45 }
 0x5f3   :  { %v1041_v3 = vmax.f32 %v1034_v51, 0.0 }
 0x5f4   :  { %v973_v61 = vpop.xlane.xlu1 %972  ;;  %v1064_v40 = vsub.f32 1.5, %v1063_v10 }
 0x5f5   :  { %v1055_v53 = vadd.f32 1e-05, %v1041_v3  ;;  %v3725_v58 = vmul.f32 %v973_v61, %v2676_v18  ;;  %v2403_v35 = vpop.eup %2402 }
 0x5f6   :  { %v1008_v7 = vpop.xlane.xlu0 %1007  ;;  %v1071_v19 = vmul.f32 %v2403_v35, %v1054_v22  ;;  %v1065_v36 = vmul.f32 %v2401_v20, %v1064_v40  ;;  %vm1077_vm15 = vweird.f32 %v2403_v35 }
 0x5f7   :  { %2404 = vrsqrt.f32 %v1055_v53  ;;  %v1028_v47 = vmul.f32 %v3725_v58, %v3725_v58  ;;  %v1021_v63 = vmul.f32 %v1008_v7, %v2676_v18  ;;  %vm1078_vm6 = vmor %vm1076_vm5, %vm1077_vm15  ;;  %vm1086_vm8 = vweird.f32 %v1055_v53 }
 0x5f8   :  { %v1072_v27 = vmul.f32 %v2403_v35, %v1071_v19  ;;  %v1069_v52 = vsel %vm3730_vm14, %v2401_v20, %v1065_v36  ;;  %v1047_v20 = vsub.f32 %v3608_v55, %v3708_v46 }
 0x5f9   :  { %v1035_v54 = vsub.f32 %v1021_v63, %v1028_v47  ;;  %v1130_v3 = vmul.f32 %v1069_v52, %v1046_v33 }
 0x5fa   :  { %v1073_v28 = vmul.f32 0.5, %v1072_v27 }
 0x5fb   :  { %v1042_v9 = vmax.f32 %v1035_v54, 0.0  ;;  %v1137_v22 = vadd.f32 %v1130_v3, %v3405_v32 }
 0x5fc   :  { %v976_v5 = vpop.xlane.xlu1 %975  ;;  %v1074_v59 = vsub.f32 1.5, %v1073_v28 }
 0x5fd   :  { %v3734_v62 = vpop.eup %2404  ;;  %v3739_v25 = vmul.f32 %v976_v5, %v2676_v18  ;;  %v1056_v4 = vadd.f32 1e-05, %v1042_v9 }
 0x5fe   :  { %v1081_v14 = vmul.f32 %v3734_v62, %v1055_v53  ;;  %v1011_v12 = vpop.xlane.xlu0 %1010  ;;  %v1075_v1 = vmul.f32 %v2403_v35, %v1074_v59  ;;  %vm1087_vm7 = vweird.f32 %v3734_v62 }
 0x5ff   :  { %v1029_v45 = vmul.f32 %v3739_v25, %v3739_v25  ;;  %v1022_v51 = vmul.f32 %v1011_v12, %v2676_v18  ;;  %2406 = vrsqrt.f32 %v1056_v4  ;;  %vm3761_vm9 = vmor %vm1086_vm8, %vm1087_vm7  ;;  %vm1096_vm11 = vweird.f32 %v1056_v4 }
 0x600   :  { %v1082_v10 = vmul.f32 %v3734_v62, %v1081_v14  ;;  %v1079_v37 = vsel %vm1078_vm6, %v2403_v35, %v1075_v1 }
 0x601   :  { %v1036_v17 = vsub.f32 %v1022_v51, %v1029_v45  ;;  %v1131_v40 = vmul.f32 %v1079_v37, %v1047_v20  ;;  %v1048_v51 = vsub.f32 %v3615_v24, %v3719_v8 }
 0x602   :  { %v1083_v61 = vmul.f32 0.5, %v1082_v10 }
 0x603   :  { %v1043_v7 = vmax.f32 %v1036_v17, 0.0  ;;  %v1138_v47 = vadd.f32 %v1131_v40, %v3408_v26 }
 0x604   :  { %v979_v19 = vpop.xlane.xlu2 %978  ;;  %v1084_v63 = vsub.f32 1.5, %v1083_v61  ;;  %v1049_v61 = vsub.f32 %v3622_v29, %v3725_v58 }
 0x605   :  { %v1057_v36 = vadd.f32 1e-05, %v1043_v7  ;;  %v3753_v27 = vmul.f32 %v979_v19, %v2676_v18  ;;  %v2407_v55 = vpop.eup %2406  ;;  %v1144_v54 = vpack.c.bf16 %v1138_v47, %v1137_v22 }
 0x606   :  { %v1014_v46 = vpop.xlane.xlu1 %1013  ;;  %v1091_v28 = vmul.f32 %v2407_v55, %v1056_v4  ;;  %v1085_v32 = vmul.f32 %v3734_v62, %v1084_v63  ;;  %vm1097_vm10 = vweird.f32 %v2407_v55 }
 0x607   :  { %2408 = vrsqrt.f32 %v1057_v36  ;;  %v1030_v35 = vmul.f32 %v3753_v27, %v3753_v27  ;;  %v1023_v41 = vmul.f32 %v1014_v46, %v2676_v18  ;;  %2283 = vmatmul.msk.bf16.vlgmr.msrb.gmra.mxu1 %vm101_vm1, %v1144_v54  ;;  %vm1098_vm12 = vmor %vm1096_vm11, %vm1097_vm10  ;;  %vm1106_vm13 = vweird.f32 %v1057_v36 }
 0x608   :  { %v1092_v26 = vmul.f32 %v2407_v55, %v1091_v28  ;;  %v1089_v45 = vsel %vm3761_vm9, %v3734_v62, %v1085_v32 }
 0x609   :  { %v1037_v9 = vsub.f32 %v1023_v41, %v1030_v35  ;;  %v1132_v7 = vmul.f32 %v1089_v45, %v1048_v51 }
 0x60a   :  { %v1093_v5 = vmul.f32 0.5, %v1092_v26 }
 0x60b   :  { %v1044_v59 = vmax.f32 %v1037_v9, 0.0  ;;  %v1139_v8 = vadd.f32 %v1132_v7, %v3391_v56 }
 0x60c   :  { %v982_v33 = vpop.xlane.xlu2 %981  ;;  %v1094_v12 = vsub.f32 1.5, %v1093_v5  ;;  %v1051_v5 = vsub.f32 %v3636_v57, %v3753_v27 }
 0x60d   :  { %v2409_v14 = vpop.eup %2408  ;;  %v989_v1 = vmul.f32 %v982_v33, %v2676_v18  ;;  %v1058_v20 = vadd.f32 1e-05, %v1044_v59 }
 0x60e   :  { %v1101_v53 = vmul.f32 %v2409_v14, %v1057_v36  ;;  %v1017_v10 = vpop.xlane.xlu1 %1016  ;;  %v1095_v3 = vmul.f32 %v2407_v55, %v1094_v12  ;;  %vm1107_vm0 = vweird.f32 %v2409_v14 }
 0x60f   :  { %v1031_v37 = vmul.f32 %v989_v1, %v989_v1  ;;  %v1024_v17 = vmul.f32 %v1017_v10, %v2676_v18  ;;  %2410 = vrsqrt.f32 %v1058_v20  ;;  %vm1108_vm14 = vmor %vm1106_vm13, %vm1107_vm0  ;;  %vm1116_vm5 = vweird.f32 %v1058_v20 }
 0x610   :  { %v1102_v40 = vmul.f32 %v2409_v14, %v1101_v53  ;;  %v1099_v62 = vsel %vm1098_vm12, %v2407_v55, %v1095_v3  ;;  %v1052_v57 = vsub.f32 %v3643_v49, %v989_v1 }
 0x611   :  { %v1038_v19 = vsub.f32 %v1024_v17, %v1031_v37  ;;  %v1133_v47 = vmul.f32 %v1099_v62, %v1049_v61 }
 0x612   :  { %v1103_v22 = vmul.f32 0.5, %v1102_v40 }
 0x613   :  { %v1045_v24 = vmax.f32 %v1038_v19, 0.0  ;;  %v1140_v63 = vadd.f32 %v1133_v47, %v3388_v39  ;;  %v1050_v39 = vsub.f32 %v3629_v34, %v3739_v25 }
 0x614   :  { %v1104_v4 = vsub.f32 1.5, %v1103_v22 }
 0x615   :  { %v1059_v46 = vadd.f32 1e-05, %v1045_v24  ;;  %v2411_v54 = vpop.eup %2410  ;;  %v1145_v28 = vpack.c.bf16 %v1140_v63, %v1139_v8 }
 0x616   :  { %v1111_v35 = vmul.f32 %v2411_v54, %v1058_v20  ;;  %v1105_v29 = vmul.f32 %v2409_v14, %v1104_v4  ;;  %vm1117_vm15 = vweird.f32 %v2411_v54 }
 0x617   :  { %2412 = vrsqrt.f32 %v1059_v46  ;;  %2284 = vmatmul.msk.bf16.gmra.mxu1 %vm101_vm1, %v1145_v28  ;;  %vm1118_vm6 = vmor %vm1116_vm5, %vm1117_vm15  ;;  %vm1126_vm8 = vweird.f32 %v1059_v46 }
 0x618   :  { %v1112_v58 = vmul.f32 %v2411_v54, %v1111_v35  ;;  %v1109_v56 = vsel %vm1108_vm14, %v2409_v14, %v1105_v29 }
 0x619   :  { %v1134_v59 = vmul.f32 %v1109_v56, %v1050_v39 }
 0x61a   :  { %v1113_v55 = vmul.f32 0.5, %v1112_v58 }
 0x61b   :  { %v1141_v51 = vadd.f32 %v1134_v59, %v3383_v60 }
 0x61c   :  { %v1114_v32 = vsub.f32 1.5, %v1113_v55 }
 0x61d   :  { %v2413_v41 = vpop.eup %2412 }
 0x61e   :  { %v1121_v26 = vmul.f32 %v2413_v41, %v1059_v46  ;;  %v1115_v9 = vmul.f32 %v2411_v54, %v1114_v32  ;;  %vm1127_vm7 = vweird.f32 %v2413_v41 }
 0x61f   :  { %vm1128_vm9 = vmor %vm1126_vm8, %vm1127_vm7 }
 0x620   :  { %v1122_v52 = vmul.f32 %v2413_v41, %v1121_v26  ;;  %v1119_v33 = vsel %vm1118_vm6, %v2411_v54, %v1115_v9 }
 0x621   :  { %v1135_v12 = vmul.f32 %v1119_v33, %v1051_v5 }
 0x622   :  { %v1123_v36 = vmul.f32 0.5, %v1122_v52 }
 0x623   :  { %v1142_v14 = vadd.f32 %v1135_v12, %v3376_v31 }
 0x624   :  { %v1124_v45 = vsub.f32 1.5, %v1123_v36 }
 0x625   :  { %v1146_v53 = vpack.c.bf16 %v1142_v14, %v1141_v51 }
 0x626   :  { %v1125_v34 = vmul.f32 %v2413_v41, %v1124_v45 }
 0x627   :  { %2285 = vmatmul.msk.bf16.gmra.mxu1 %vm101_vm1, %v1146_v53 }
 0x628   :  { %v1129_v25 = vsel %vm1128_vm9, %v2413_v41, %v1125_v34 }
 0x629   :  { %v1136_v27 = vmul.f32 %v1129_v25, %v1052_v57 }
 0x62b   :  { %v1143_v20 = vadd.f32 %v1136_v27, %v3360_v16 }
 0x62c   :  { %v1522_v60 = vpop.xlane.xlu1 %1521 }
 0x62d   :  { %v1147_v10 = vpack.c.bf16 %v1143_v20, %v1143_v20  ;;  %v3822_v5 = vmul.f32 %v1522_v60, %v2676_v18 }
 0x62f   :  { %v1579_v34 = vmul.f32 %v3822_v5, %v3822_v5 }
 0x634   :  { %v1525_v3 = vpop.xlane.xlu2 %1524 }
 0x635   :  { %v3800_v47 = vmul.f32 %v1525_v3, %v2676_v18 }
 0x637   :  { %2286 = vmatmul.msk.bf16.gmra.mxu1 %vm101_vm1, %v1147_v10  ;;  %v1580_v46 = vmul.f32 %v3800_v47, %v3800_v47 }
 0x63c   :  { %v1528_v37 = vpop.xlane.xlu0 %1527 }
 0x63d   :  { %v3788_v31 = vmul.f32 %v1528_v37, %v2676_v18 }
 0x63e   :  { %v1563_v17 = vpop.xlane.xlu2 %1562 }
 0x63f   :  { %v1581_v61 = vmul.f32 %v3788_v31, %v3788_v31  ;;  %v1574_v40 = vmul.f32 %v1563_v17, %v2676_v18 }
 0x641   :  { %v1588_v7 = vsub.f32 %v1574_v40, %v1581_v61 }
 0x643   :  { %v1595_v1 = vmax.f32 %v1588_v7, 0.0 }
 0x644   :  { %v1531_v49 = vpop.xlane.xlu1 %1530 }
 0x645   :  { %v3794_v16 = vmul.f32 %v1531_v49, %v2676_v18  ;;  %v3802_v24 = vadd.f32 1e-05, %v1595_v1 }
 0x646   :  { %v1566_v19 = vpop.xlane.xlu0 %1565 }
 0x647   :  { %v1582_v62 = vmul.f32 %v3794_v16, %v3794_v16  ;;  %v1575_v22 = vmul.f32 %v1566_v19, %v2676_v18  ;;  %2414 = vrsqrt.f32 %v3802_v24  ;;  %vm1658_vm12 = vweird.f32 %v3802_v24 }
 0x649   :  { %v1589_v8 = vsub.f32 %v1575_v22, %v1582_v62 }
 0x64b   :  { %v1596_v63 = vmax.f32 %v1589_v8, 0.0 }
 0x64c   :  { %v1560_v4 = vpop.xlane.xlu1 %1559 }
 0x64d   :  { %v1573_v54 = vmul.f32 %v1560_v4, %v2676_v18  ;;  %v3808_v28 = vadd.f32 1e-05, %v1596_v63  ;;  %v3817_v39 = vpop.eup %2414 }
 0x64e   :  { %v1569_v35 = vpop.xlane.xlu2 %1568  ;;  %v1534_v29 = vpop.xlane.xlu0 %1533  ;;  %v1653_v36 = vmul.f32 %v3817_v39, %v3802_v24  ;;  %vm1659_vm10 = vweird.f32 %v3817_v39 }
 0x64f   :  { %v1587_v58 = vsub.f32 %v1573_v54, %v1580_v46  ;;  %v1576_v55 = vmul.f32 %v1569_v35, %v2676_v18  ;;  %v3812_v41 = vmul.f32 %v1534_v29, %v2676_v18  ;;  %2416 = vrsqrt.f32 %v3808_v28  ;;  %vm3866_vm13 = vmor %vm1658_vm12, %vm1659_vm10 }
 0x650   :  { %v1654_v10 = vmul.f32 %v3817_v39, %v1653_v36  ;;  %vm1668_vm14 = vweird.f32 %v3808_v28 }
 0x651   :  { %v1594_v32 = vmax.f32 %v1587_v58, 0.0  ;;  %v1583_v56 = vmul.f32 %v3812_v41, %v3812_v41 }
 0x652   :  { %v1655_v49 = vmul.f32 0.5, %v1654_v10 }
 0x653   :  { %v3819_v26 = vadd.f32 1e-05, %v1594_v32  ;;  %v1590_v9 = vsub.f32 %v1576_v55, %v1583_v56 }
 0x654   :  { %v1551_v59 = vpop.xlane.xlu1 %1550  ;;  %v1656_v58 = vsub.f32 1.5, %v1655_v49 }
 0x655   :  { %2418 = vrsqrt.f32 %v3819_v26  ;;  %v1597_v52 = vmax.f32 %v1590_v9, 0.0  ;;  %v3825_v33 = vpop.eup %2416  ;;  %v1570_v27 = vmul.f32 %v1551_v59, %v2676_v18  ;;  %vm1648_vm8 = vweird.f32 %v3819_v26 }
 0x656   :  { %v1516_v12 = vpop.xlane.xlu2 %1515  ;;  %v1557_v45 = vpop.xlane.xlu0 %1556  ;;  %v1663_v51 = vmul.f32 %v3825_v33, %v3808_v28  ;;  %vm1669_vm11 = vweird.f32 %v3825_v33  ;;  %v1604_v28 = vsub.f32 %v3678_v2, %v3812_v41 }
 0x657   :  { %v1611_v14 = vadd.f32 1e-05, %v1597_v52  ;;  %v3832_v53 = vmul.f32 %v1516_v12, %v2676_v18  ;;  %v1572_v25 = vmul.f32 %v1557_v45, %v2676_v18  ;;  %v1657_v12 = vmul.f32 %v3817_v39, %v1656_v58  ;;  %vm3876_vm15 = vmor %vm1668_vm14, %vm1669_vm11 }
 0x658   :  { %v1664_v57 = vmul.f32 %v3825_v33, %v1663_v51 }
 0x659   :  { %2420 = vrsqrt.f32 %v1611_v14  ;;  %v1577_v20 = vmul.f32 %v3832_v53, %v3832_v53  ;;  %v1586_v3 = vsub.f32 %v1572_v25, %v1579_v34  ;;  %vm1678_vm5 = vweird.f32 %v1611_v14 }
 0x65a   :  { %v1665_v40 = vmul.f32 0.5, %v1664_v57 }
 0x65b   :  { %v3842_v60 = vpop.eup %2418  ;;  %v1584_v37 = vsub.f32 %v1570_v27, %v1577_v20  ;;  %v1593_v61 = vmax.f32 %v1586_v3, 0.0  ;;  %v1602_v20 = vsub.f32 %v3662_v42, %v3788_v31  ;;  %v1603_v31 = vsub.f32 %v3669_v44, %v3794_v16 }
 0x65c   :  { %v1643_v17 = vmul.f32 %v3842_v60, %v3819_v26  ;;  %v1666_v54 = vsub.f32 1.5, %v1665_v40  ;;  %vm1649_vm7 = vweird.f32 %v3842_v60 }
 0x65d   :  { %v1591_v7 = vmax.f32 %v1584_v37, 0.0  ;;  %v3846_v1 = vadd.f32 1e-05, %v1593_v61  ;;  %v1661_v61 = vsel %vm3866_vm13, %v3817_v39, %v1657_v12  ;;  %vm3900_vm10 = vmor %vm1648_vm8, %vm1649_vm7 }
 0x65e   :  { %v1554_v19 = vpop.xlane.xlu2 %1553  ;;  %v1519_v62 = vpop.xlane.xlu0 %1518  ;;  %v1644_v8 = vmul.f32 %v3842_v60, %v1643_v17  ;;  %v1667_v52 = vmul.f32 %v3825_v33, %v1666_v54  ;;  %v1686_v16 = vmul.f32 %v1661_v61, %v1602_v20 }
 0x65f   :  { %v2421_v22 = vpop.eup %2420  ;;  %v3849_v63 = vadd.f32 1e-05, %v1591_v7  ;;  %v3852_v4 = vmul.f32 %v1519_v62, %v2676_v18  ;;  %2422 = vrsqrt.f32 %v3846_v1  ;;  %v1571_v35 = vmul.f32 %v1554_v19, %v2676_v18 }
 0x660   :  { %v1673_v46 = vmul.f32 %v2421_v22, %v1611_v14  ;;  %v1645_v32 = vmul.f32 0.5, %v1644_v8  ;;  %vm1679_vm0 = vweird.f32 %v2421_v22  ;;  %v1671_v42 = vsel %vm3876_vm15, %v3825_v33, %v1667_v52 }
 0x661   :  { %2424 = vrsqrt.f32 %v3849_v63  ;;  %v1578_v29 = vmul.f32 %v3852_v4, %v3852_v4  ;;  %vm1680_vm6 = vmor %vm1678_vm5, %vm1679_vm0  ;;  %v1687_v33 = vmul.f32 %v1671_v42, %v1603_v31  ;;  %vm1638_vm11 = vweird.f32 %v3846_v1  ;;  %v4404_v31 = vld [vmem:[#allocation4_spill] sm:$0xff] }
 0x662   :  { %v1674_v55 = vmul.f32 %v2421_v22, %v1673_v46  ;;  %v1646_v25 = vsub.f32 1.5, %v1645_v32  ;;  %v1600_v8 = vsub.f32 %v3654_v13, %v3822_v5  ;;  %v1601_v46 = vsub.f32 %v3658_v21, %v3800_v47 }
 0x663   :  { %v1585_v56 = vsub.f32 %v1571_v35, %v1578_v29  ;;  %v3916_v35 = vadd.f32 %v1687_v33, %v3554_v30  ;;  %v3921_v29 = vadd.f32 %v1686_v16, %v3559_v0  ;;  %vm1618_vm13 = vweird.f32 %v3849_v63 }
 0x664   :  { %v1675_v9 = vmul.f32 0.5, %v1674_v55  ;;  %v1647_v2 = vmul.f32 %v3842_v60, %v1646_v25  ;;  %v2460_v25 = vld [vmem:[%s4364_s4 + $0x40] sm:$0xff] }
 0x665   :  { %v1592_v59 = vmax.f32 %v1585_v56, 0.0  ;;  %v2423_v36 = vpop.eup %2422  ;;  %v1698_v30 = vpack.c.bf16 %v3916_v35, %v3921_v29 }
 0x666   :  { %v1676_v45 = vsub.f32 1.5, %v1675_v9  ;;  %v1633_v57 = vmul.f32 %v2423_v36, %v3846_v1  ;;  %vm1639_vm9 = vweird.f32 %v2423_v36  ;;  %v1598_v9 = vsub.f32 %v3650_v50, %v3832_v53  ;;  %v3952_v53 = vld [vmem:[%s4366_s9] ss:$0 sm:$0xff] }
 0x667   :  { %v3864_v51 = vpop.eup %2424  ;;  %v3872_v27 = vadd.f32 1e-05, %v1592_v59  ;;  %vm1640_vm12 = vmor %vm1638_vm11, %vm1639_vm9  ;;  %v1599_v59 = vsub.f32 %v3652_v48, %v3852_v4  ;;  %v2459_v4 = vld [vmem:[%s4364_s4 + $0x38] sm:$0xff] }
 0x668   :  { %v1677_v10 = vmul.f32 %v2421_v22, %v1676_v45  ;;  %v1613_v3 = vmul.f32 %v3864_v51, %v3849_v63  ;;  %v1634_v37 = vmul.f32 %v2423_v36, %v1633_v57  ;;  %vm1619_vm0 = vweird.f32 %v3864_v51 }
 0x669   :  { %2426 = vrsqrt.f32 %v3872_v27  ;;  %vm1620_vm14 = vmor %vm1618_vm13, %vm1619_vm0  ;;  %vm1628_vm5 = vweird.f32 %v3872_v27 }
 0x66a   :  { %v1681_v17 = vsel %vm1680_vm6, %v2421_v22, %v1677_v10  ;;  %v1614_v14 = vmul.f32 %v3864_v51, %v1613_v3  ;;  %v1635_v40 = vmul.f32 0.5, %v1634_v37  ;;  %v2461_v10 = vld [vmem:[%s4364_s4 + $0x48] sm:$0xff] }
 0x66b   :  { %v1688_v41 = vmul.f32 %v1681_v17, %v1604_v28 }
 0x66c   :  { %v1615_v7 = vmul.f32 0.5, %v1614_v14  ;;  %v1636_v44 = vsub.f32 1.5, %v1635_v40 }
 0x66d   :  { %v3898_v49 = vadd.f32 %v1688_v41, %v3532_v11  ;;  %v1651_v11 = vsel %vm3900_vm10, %v3842_v60, %v1647_v2 }
 0x66e   :  { %v1616_v39 = vsub.f32 1.5, %v1615_v7  ;;  %v1637_v22 = vmul.f32 %v2423_v36, %v1636_v44  ;;  %v1685_v21 = vmul.f32 %v1651_v11, %v1601_v46 }
 0x66f   :  { %v2427_v62 = vpop.eup %2426  ;;  %v1699_v26 = vpack.c.bf16 %v3898_v49, %v3898_v49 }
 0x670   :  { %v1623_v54 = vmul.f32 %v2427_v62, %v3872_v27  ;;  %v1641_v60 = vsel %vm1640_vm12, %v2423_v36, %v1637_v22  ;;  %v1617_v58 = vmul.f32 %v3864_v51, %v1616_v39  ;;  %vm1629_vm15 = vweird.f32 %v2427_v62 }
 0x671   :  { %v1701_v1 = vsel %vm181_vm2, %v1699_v26, 0  ;;  %v1684_v5 = vmul.f32 %v1641_v60, %v1600_v8  ;;  %v3932_v56 = vadd.f32 %v1685_v21, %v3566_v38  ;;  %vm1630_vm6 = vmor %vm1628_vm5, %vm1629_vm15 }
 0x672   :  { %v1624_v13 = vmul.f32 %v2427_v62, %v1623_v54  ;;  %1707 = vmatpush.bf16.msra.mxu1 %v1701_v1  ;;  %v1621_v0 = vsel %vm1620_vm14, %v3864_v51, %v1617_v58 }
 0x673   :  { %v3928_v55 = vadd.f32 %v1684_v5, %v3570_v43  ;;  %v1682_v43 = vmul.f32 %v1621_v0, %v1598_v9 }
 0x674   :  { %v1625_v47 = vmul.f32 0.5, %v1624_v13 }
 0x675   :  { %v1697_v52 = vpack.c.bf16 %v3932_v56, %v3928_v55  ;;  %v3942_v38 = vadd.f32 %v1682_v43, %v3580_v6 }
 0x676   :  { %v1626_v32 = vsub.f32 1.5, %v1625_v47  ;;  %1708 = vmatpush.bf16.msra.mxu1 %v1698_v30 }
 0x678   :  { %v1627_v63 = vmul.f32 %v2427_v62, %v1626_v32 }
 0x67a   :  { %v1631_v36 = vsel %vm1630_vm6, %v2427_v62, %v1627_v63  ;;  %1709 = vmatpush.bf16.msra.mxu1 %v1697_v52 }
 0x67b   :  { %v1683_v12 = vmul.f32 %v1631_v36, %v1599_v59 }
 0x67d   :  { %v3945_v45 = vadd.f32 %v1683_v12, %v3583_v23 }
 0x67f   :  { %v1696_v50 = vpack.c.bf16 %v3945_v45, %v3942_v38 }
 0x681   :  { %1710 = vmatpush.bf16.msra.mxu1 %v1696_v50 }
 0x684   :  { %v1184_v48 = vpop.f32.mrf.mxu1  ;;  %2306 = vmatmul.msk.bf16.vlgmr.msra.gmra.mxu1 %vm168_vm3, %v2459_v4 }
 0x685   :  { %v1185_v6 = vadd.f32 %v3952_v53, %v1184_v48 }
 0x687   :  { %1203 = vst [vmem:[%s4367_s11] sm:$0xff] %v1185_v6 }
 0x68c   :  { %v1186_v23 = vpop.f32.mrf.mxu1 }
 0x68d   :  { %v1187_v51 = vadd.f32 %v3952_v53, %v1186_v23 }
 0x68f   :  { %1204 = vst [vmem:[%s4367_s11 + $0x8] sm:$0xff] %v1187_v51 }
 0x694   :  { %v1189_v34 = vpop.f32.mrf.mxu1  ;;  %2307 = vmatmul.msk.bf16.gmra.mxu1 %vm168_vm3, %v2460_v25 }
 0x695   :  { %v1190_v57 = vadd.f32 %v3952_v53, %v1189_v34 }
 0x697   :  { %1205 = vst [vmem:[%s4367_s11 + $0x10] sm:$0xff] %v1190_v57 }
 0x69c   :  { %v1191_v27 = vpop.f32.mrf.mxu1 }
 0x69d   :  { %v1192_v20 = vadd.f32 %v3952_v53, %v1191_v27 }
 0x69f   :  { %1206 = vst [vmem:[%s4367_s11 + $0x18] sm:$0xff] %v1192_v20 }
 0x6a4   :  { %v1194_v24 = vpop.f32.mrf.mxu1  ;;  %2308 = vmatmul.msk.bf16.gmra.mxu1 %vm168_vm3, %v2461_v10 }
 0x6a5   :  { %v1195_v3 = vadd.f32 %v3952_v53, %v1194_v24 }
 0x6a7   :  { %1207 = vst [vmem:[%s4367_s11 + $0x20] sm:$0xff] %v1195_v3 }
 0x6ac   :  { %v1196_v28 = vpop.f32.mrf.mxu1 }
 0x6ad   :  { %v1197_v37 = vadd.f32 %v3952_v53, %v1196_v28 }
 0x6af   :  { %1208 = vst [vmem:[%s4367_s11 + $0x28] sm:$0xff] %v1197_v37 }
 0x6b4   :  { %v1199_v42 = vpop.f32.mrf.mxu1  ;;  %2309 = vmatmul.msk.bf16.gmra.mxu1 %vm168_vm3, %v4404_v31 }
 0x6b5   :  { %v1200_v17 = vadd.f32 %v3952_v53, %v1199_v42 }
 0x6b7   :  { %1209 = vst [vmem:[%s4367_s11 + $0x30] sm:$0x3] %v1200_v17 }
 0x6bc   :  { %v1201_v14 = vpop.f32.mrf.mxu1 }
 0x701   :  { %v3996_v61 = vpop.f32.mrf.mxu1 }
 0x702   :  { %v1731_v30 = vsel %vm101_vm1, %v3996_v61, 0.0  ;;  %v1759_v0 = vmul.f32 %v3996_v61, %v3996_v61 }
 0x704   :  { %v1766_v9 = vsel %vm101_vm1, %v1759_v0, 0.0 }
 0x709   :  { %v3998_v2 = vpop.f32.mrf.mxu1 }
 0x70a   :  { %v1734_v58 = vsel %vm101_vm1, %v3998_v2, 0.0  ;;  %v1760_v32 = vmul.f32 %v3998_v2, %v3998_v2 }
 0x70c   :  { %v1769_v63 = vsel %vm101_vm1, %v1760_v32, 0.0 }
 0x711   :  { %v4000_v41 = vpop.f32.mrf.mxu1 }
 0x712   :  { %v1737_v40 = vsel %vm101_vm1, %v4000_v41, 0.0  ;;  %v1761_v7 = vmul.f32 %v4000_v41, %v4000_v41 }
 0x713   :  { %1738 = vadd.xlane.f32.xlu0 %v1737_v40 }
 0x714   :  { %v1772_v33 = vsel %vm101_vm1, %v1761_v7, 0.0 }
 0x715   :  { %1773 = vadd.xlane.f32.xlu2 %v1772_v33 }
 0x719   :  { %v4007_v44 = vpop.f32.mrf.mxu1 }
 0x71a   :  { %v1740_v16 = vsel %vm101_vm1, %v4007_v44, 0.0  ;;  %v1762_v5 = vmul.f32 %v4007_v44, %v4007_v44 }
 0x71b   :  { %1741 = vadd.xlane.f32.xlu1 %v1740_v16 }
 0x71c   :  { %v1775_v47 = vsel %vm101_vm1, %v1762_v5, 0.0 }
 0x721   :  { %v4011_v19 = vpop.f32.mrf.mxu1 }
 0x722   :  { %v1743_v39 = vsel %vm101_vm1, %v4011_v19, 0.0  ;;  %v1763_v62 = vmul.f32 %v4011_v19, %v4011_v19 }
 0x723   :  { %1744 = vadd.xlane.f32.xlu2 %v1743_v39 }
 0x724   :  { %v1778_v22 = vsel %vm101_vm1, %v1763_v62, 0.0 }
 0x725   :  { %1779 = vadd.xlane.f32.xlu1 %v1778_v22 }
 0x729   :  { %v4018_v26 = vpop.f32.mrf.mxu1 }
 0x72a   :  { %v1746_v11 = vsel %vm101_vm1, %v4018_v26, 0.0  ;;  %v1764_v8 = vmul.f32 %v4018_v26, %v4018_v26 }
 0x72b   :  { %1747 = vadd.xlane.f32.xlu0 %v1746_v11 }
 0x72c   :  { %v1781_v46 = vsel %vm101_vm1, %v1764_v8, 0.0 }
 0x72d   :  { %1782 = vadd.xlane.f32.xlu2 %v1781_v46 }
 0x731   :  { %v4025_v54 = vpop.f32.mrf.mxu1 }
 0x732   :  { %v1749_v1 = vsel %vm231_vm4, %v4025_v54, 0.0  ;;  %v1765_v60 = vmul.f32 %v4025_v54, %v4025_v54 }
 0x733   :  { %1750 = vadd.xlane.f32.xlu0 %v1749_v1 }
 0x734   :  { %v1784_v13 = vsel %vm231_vm4, %v1765_v60, 0.0 }
 0x735   :  { %1735 = vadd.xlane.f32.xlu2 %v1734_v58  ;;  %1785 = vadd.xlane.f32.xlu1 %v1784_v13 }
 0x739   :  { %v1729_v21 = vpop.f32.mrf.mxu1 }
 0x73b   :  { %1776 = vadd.xlane.f32.xlu0 %v1775_v47 }
 0x73d   :  { %1732 = vadd.xlane.f32.xlu1 %v1731_v30 }
 0x743   :  { %1767 = vadd.xlane.f32.xlu0 %v1766_v9 }
 0x745   :  { %1770 = vadd.xlane.f32.xlu1 %v1769_v63 }
 0x786   :  { %v1739_v59 = vpop.xlane.xlu0 %1738 }
 0x787   :  { %v4046_v36 = vmul.f32 %v1739_v59, %v2676_v18 }
 0x788   :  { %v1774_v52 = vpop.xlane.xlu2 %1773 }
 0x789   :  { %v1796_v4 = vmul.f32 %v4046_v36, %v4046_v36  ;;  %v1789_v6 = vmul.f32 %v1774_v52, %v2676_v18 }
 0x78b   :  { %v1803_v25 = vsub.f32 %v1789_v6, %v1796_v4 }
 0x78d   :  { %v1810_v10 = vmax.f32 %v1803_v25, 0.0 }
 0x78e   :  { %v1742_v43 = vpop.xlane.xlu1 %1741 }
 0x78f   :  { %v4065_v31 = vadd.f32 1e-05, %v1810_v10  ;;  %v4078_v11 = vmul.f32 %v1742_v43, %v2676_v18 }
 0x791   :  { %v1797_v21 = vmul.f32 %v4078_v11, %v4078_v11  ;;  %vm1855_vm5 = vweird.f32 %v4065_v31 }
 0x796   :  { %v1745_v12 = vpop.xlane.xlu2 %1744 }
 0x797   :  { %v4049_v50 = vmul.f32 %v1745_v12, %v2676_v18 }
 0x798   :  { %v1780_v48 = vpop.xlane.xlu1 %1779 }
 0x799   :  { %v1798_v23 = vmul.f32 %v4049_v50, %v4049_v50  ;;  %v1791_v51 = vmul.f32 %v1780_v48, %v2676_v18 }
 0x79b   :  { %v1805_v34 = vsub.f32 %v1791_v51, %v1798_v23 }
 0x79d   :  { %v1812_v57 = vmax.f32 %v1805_v34, 0.0 }
 0x79e   :  { %v1748_v27 = vpop.xlane.xlu0 %1747 }
 0x79f   :  { %v4058_v20 = vmul.f32 %v1748_v27, %v2676_v18  ;;  %v4062_v28 = vadd.f32 1e-05, %v1812_v57 }
 0x7a0   :  { %v1783_v24 = vpop.xlane.xlu2 %1782 }
 0x7a1   :  { %v1799_v3 = vmul.f32 %v4058_v20, %v4058_v20  ;;  %v1792_v37 = vmul.f32 %v1783_v24, %v2676_v18  ;;  %2428 = vrsqrt.f32 %v4062_v28  ;;  %vm1875_vm0 = vweird.f32 %v4062_v28 }
 0x7a2   :  { %2430 = vrsqrt.f32 %v4065_v31 }
 0x7a3   :  { %v1806_v42 = vsub.f32 %v1792_v37, %v1799_v3 }
 0x7a5   :  { %v1813_v17 = vmax.f32 %v1806_v42, 0.0 }
 0x7a6   :  { %v1751_v14 = vpop.xlane.xlu0 %1750 }
 0x7a7   :  { %v4069_v40 = vmul.f32 %v1751_v14, %v2676_v18  ;;  %v1827_v7 = vadd.f32 1e-05, %v1813_v17  ;;  %v4075_v22 = vpop.eup %2428 }
 0x7a8   :  { %v1786_v33 = vpop.xlane.xlu1 %1785  ;;  %v4080_v1 = vpop.eup %2430  ;;  %v1870_v60 = vmul.f32 %v4075_v22, %v4062_v28  ;;  %vm1876_vm8 = vweird.f32 %v4075_v22  ;;  %v1820_v28 = vsub.f32 %v4018_v26, %v4058_v20 }
 0x7a9   :  { %v1800_v16 = vmul.f32 %v4069_v40, %v4069_v40  ;;  %v1793_v39 = vmul.f32 %v1786_v33, %v2676_v18  ;;  %2432 = vrsqrt.f32 %v1827_v7  ;;  %v1850_v0 = vmul.f32 %v4080_v1, %v4065_v31  ;;  %v1736_v32 = vpop.xlane.xlu2 %1735  ;;  %vm4131_vm15 = vmor %vm1875_vm0, %vm1876_vm8 }
 0x7aa   :  { %v1871_v63 = vmul.f32 %v4075_v22, %v1870_v60  ;;  %v4098_v48 = vmul.f32 %v1736_v32, %v2676_v18  ;;  %vm1885_vm10 = vweird.f32 %v1827_v7  ;;  %vm1856_vm14 = vweird.f32 %v4080_v1 }
 0x7ab   :  { %v1807_v62 = vsub.f32 %v1793_v39, %v1800_v16  ;;  %v1851_v4 = vmul.f32 %v4080_v1, %v1850_v0  ;;  %v1817_v31 = vsub.f32 %v4000_v41, %v4046_v36 }
 0x7ac   :  { %v1872_v34 = vmul.f32 0.5, %v1871_v63  ;;  %v1795_v3 = vmul.f32 %v4098_v48, %v4098_v48 }
 0x7ad   :  { %v1814_v8 = vmax.f32 %v1807_v62, 0.0  ;;  %v1852_v17 = vmul.f32 0.5, %v1851_v4 }
 0x7ae   :  { %v1777_v46 = vpop.xlane.xlu0 %1776  ;;  %v1873_v33 = vsub.f32 1.5, %v1872_v34 }
 0x7af   :  { %v1828_v58 = vadd.f32 1e-05, %v1814_v8  ;;  %v1790_v13 = vmul.f32 %v1777_v46, %v2676_v18  ;;  %v4085_v5 = vpop.eup %2432 }
 0x7b0   :  { %v1733_v47 = vpop.xlane.xlu1 %1732  ;;  %v1880_v30 = vmul.f32 %v4085_v5, %v1827_v7  ;;  %vm1886_vm7 = vweird.f32 %v4085_v5 }
 0x7b1   :  { %2434 = vrsqrt.f32 %v1828_v58  ;;  %v1804_v9 = vsub.f32 %v1790_v13, %v1797_v21  ;;  %v4095_v43 = vmul.f32 %v1733_v47, %v2676_v18  ;;  %v1853_v21 = vsub.f32 1.5, %v1852_v17  ;;  %vm4118_vm11 = vmor %vm1885_vm10, %vm1886_vm7 }
 0x7b2   :  { %v1881_v52 = vmul.f32 %v4085_v5, %v1880_v30  ;;  %v1874_v30 = vmul.f32 %v4075_v22, %v1873_v33  ;;  %vm1895_vm12 = vweird.f32 %v1828_v58  ;;  %vm4149_vm7 = vmor %vm1855_vm5, %vm1856_vm14 }
 0x7b3   :  { %v1811_v59 = vmax.f32 %v1804_v9, 0.0  ;;  %v1794_v25 = vmul.f32 %v4095_v43, %v4095_v43 }
 0x7b4   :  { %v1882_v12 = vmul.f32 0.5, %v1881_v52  ;;  %v1821_v52 = vsub.f32 %v4025_v54, %v4069_v40  ;;  %v1854_v54 = vmul.f32 %v4080_v1, %v1853_v21 }
 0x7b5   :  { %v4101_v6 = vadd.f32 1e-05, %v1811_v59 }
 0x7b6   :  { %v1768_v23 = vpop.xlane.xlu0 %1767  ;;  %v1883_v10 = vsub.f32 1.5, %v1882_v12 }
 0x7b7   :  { %v2435_v51 = vpop.eup %2434  ;;  %v1787_v57 = vmul.f32 %v1768_v23, %v2676_v18  ;;  %2436 = vrsqrt.f32 %v4101_v6  ;;  %v1819_v23 = vsub.f32 %v4011_v19, %v4049_v50  ;;  %vm1865_vm8 = vweird.f32 %v4101_v6 }
 0x7b8   :  { %v1890_v27 = vmul.f32 %v2435_v51, %v1828_v58  ;;  %v1771_v24 = vpop.xlane.xlu1 %1770  ;;  %v1884_v8 = vmul.f32 %v4085_v5, %v1883_v10  ;;  %vm1896_vm9 = vweird.f32 %v2435_v51 }
 0x7b9   :  { %v1801_v37 = vsub.f32 %v1787_v57, %v1794_v25  ;;  %v1788_v42 = vmul.f32 %v1771_v24, %v2676_v18  ;;  %vm1897_vm13 = vmor %vm1895_vm12, %vm1896_vm9  ;;  %v1818_v24 = vsub.f32 %v4007_v44, %v4078_v11 }
 0x7ba   :  { %v1891_v14 = vmul.f32 %v2435_v51, %v1890_v27  ;;  %v1888_v7 = vsel %vm4118_vm11, %v4085_v5, %v1884_v8  ;;  %v1878_v5 = vsel %vm4131_vm15, %v4075_v22, %v1874_v30 }
 0x7bb   :  { %v1808_v16 = vmax.f32 %v1801_v37, 0.0  ;;  %v1802_v39 = vsub.f32 %v1788_v42, %v1795_v3  ;;  %v1904_v34 = vmul.f32 %v1888_v7, %v1820_v28 }
 0x7bc   :  { %v1892_v62 = vmul.f32 0.5, %v1891_v14 }
 0x7bd   :  { %v4112_v46 = vadd.f32 1e-05, %v1808_v16  ;;  %v1809_v60 = vmax.f32 %v1802_v39, 0.0  ;;  %v2437_v13 = vpop.eup %2436  ;;  %v4165_v3 = vadd.f32 %v1904_v34, %v3916_v35 }
 0x7be   :  { %v1893_v47 = vsub.f32 1.5, %v1892_v62  ;;  %v1860_v0 = vmul.f32 %v2437_v13, %v4101_v6  ;;  %vm1866_vm6 = vweird.f32 %v2437_v13  ;;  %v1815_v62 = vsub.f32 %v3996_v61, %v4095_v43  ;;  %v2462_v43 = vld [vmem:[%s4364_s4 + $0x54] sm:$0xff] }
 0x7bf   :  { %2438 = vrsqrt.f32 %v4112_v46  ;;  %v1823_v63 = vadd.f32 1e-05, %v1809_v60  ;;  %vm1867_vm9 = vmor %vm1865_vm8, %vm1866_vm6 }
 0x7c0   :  { %v1894_v9 = vmul.f32 %v2435_v51, %v1893_v47  ;;  %v1861_v59 = vmul.f32 %v2437_v13, %v1860_v0 }
 0x7c1   :  { %2440 = vrsqrt.f32 %v1823_v63  ;;  %vm1845_vm0 = vweird.f32 %v1823_v63 }
 0x7c2   :  { %v1898_v58 = vsel %vm1897_vm13, %v2435_v51, %v1894_v9  ;;  %v1862_v40 = vmul.f32 0.5, %v1861_v59  ;;  %v1903_v51 = vmul.f32 %v1878_v5, %v1819_v23 }
 0x7c3   :  { %v1905_v4 = vmul.f32 %v1898_v58, %v1821_v52 }
 0x7c4   :  { %v1863_v57 = vsub.f32 1.5, %v1862_v40 }
 0x7c5   :  { %v2439_v25 = vpop.eup %2438  ;;  %v4145_v26 = vadd.f32 %v1905_v4, %v3898_v49  ;;  %v1858_v49 = vsel %vm4149_vm7, %v4080_v1, %v1854_v54  ;;  %v4169_v1 = vadd.f32 %v1903_v51, %v3921_v29 }
 0x7c6   :  { %v1830_v22 = vmul.f32 %v2439_v25, %v4112_v46  ;;  %v1864_v27 = vmul.f32 %v2437_v13, %v1863_v57  ;;  %v1901_v14 = vmul.f32 %v1858_v49, %v1817_v31  ;;  %vm1836_vm10 = vweird.f32 %v2439_v25 }
 0x7c7   :  { %v1916_v19 = vpack.c.bf16 %v4145_v26, %v4145_v26  ;;  %v2441_v50 = vpop.eup %2440  ;;  %v1915_v44 = vpack.c.bf16 %v4165_v3, %v4169_v1 }
 0x7c8   :  { %v1831_v10 = vmul.f32 %v2439_v25, %v1830_v22  ;;  %v1840_v6 = vmul.f32 %v2441_v50, %v1823_v63  ;;  %v1868_v42 = vsel %vm1867_vm9, %v2437_v13, %v1864_v27  ;;  %v4178_v39 = vadd.f32 %v1901_v14, %v3928_v55 }
 0x7c9   :  { %v1918_v37 = vsel %vm181_vm2, %v1916_v19, 0  ;;  %v1902_v33 = vmul.f32 %v1868_v42, %v1818_v24  ;;  %vm1835_vm2 = vweird.f32 %v4112_v46  ;;  %vm1846_vm12 = vweird.f32 %v2441_v50 }
 0x7ca   :  { %v1832_v17 = vmul.f32 0.5, %v1831_v10  ;;  %1924 = vmatpush.bf16.msra.mxu2 %v1918_v37  ;;  %v1841_v41 = vmul.f32 %v2441_v50, %v1840_v6  ;;  %vm1837_vm11 = vmor %vm1835_vm2, %vm1836_vm10  ;;  %v1816_v13 = vsub.f32 %v3998_v2, %v4098_v48  ;;  %v2463_v2 = vld [vmem:[%s4364_s4 + $0x5c] sm:$0xff] }
 0x7cb   :  { %v4174_v35 = vadd.f32 %v1902_v33, %v3932_v56  ;;  %vm1847_vm13 = vmor %vm1845_vm0, %vm1846_vm12 }
 0x7cc   :  { %v1833_v36 = vsub.f32 1.5, %v1832_v17  ;;  %v1842_v11 = vmul.f32 0.5, %v1841_v41 }
 0x7cd   :  { %v1914_v8 = vpack.c.bf16 %v4174_v35, %v4178_v39 }
 0x7ce   :  { %v1834_v16 = vmul.f32 %v2439_v25, %v1833_v36  ;;  %1925 = vmatpush.bf16.msra.mxu2 %v1915_v44  ;;  %v1843_v29 = vsub.f32 1.5, %v1842_v11 }
 0x7d0   :  { %v1838_v60 = vsel %vm1837_vm11, %v2439_v25, %v1834_v16  ;;  %v1844_v56 = vmul.f32 %v2441_v50, %v1843_v29 }
 0x7d1   :  { %v1899_v46 = vmul.f32 %v1838_v60, %v1815_v62 }
 0x7d2   :  { %1926 = vmatpush.bf16.msra.mxu2 %v1914_v8  ;;  %v1848_v55 = vsel %vm1847_vm13, %v2441_v50, %v1844_v56 }
 0x7d3   :  { %v1900_v21 = vmul.f32 %v1848_v55, %v1816_v13  ;;  %v4187_v47 = vadd.f32 %v1899_v46, %v3942_v38  ;;  %v2464_v38 = vld [vmem:[%s4364_s4 + $0x64] sm:$0xff] }
 0x7d5   :  { %v4190_v30 = vadd.f32 %v1900_v21, %v3945_v45 }
 0x7d7   :  { %v1913_v61 = vpack.c.bf16 %v4190_v30, %v4187_v47 }
 0x7d9   :  { %1927 = vmatpush.bf16.msra.mxu2 %v1913_v61 }
 0x7dc   :  { %2310 = vmatmul.msk.bf16.vlgmr.msra.gmra.mxu2 %vm168_vm3, %v2462_v43 }
 0x7ec   :  { %2311 = vmatmul.msk.bf16.gmra.mxu2 %vm168_vm3, %v2463_v2 }
 0x7fc   :  { %2312 = vmatmul.msk.bf16.gmra.mxu2 %vm168_vm3, %v2464_v38 }
 0x80c   :  { %2313 = vmatmul.msk.bf16.gmra.mxu2 %vm168_vm3, %v3551_v15 }
 0x85f   :  { %v4208_v45 = vpop.f32.mrf.mxu2 }
 0x860   :  { %v1948_v48 = vsel %vm101_vm1, %v4208_v45, 0.0  ;;  %v1976_v0 = vmul.f32 %v4208_v45, %v4208_v45 }
 0x861   :  { %1949 = vadd.xlane.f32.xlu2 %v1948_v48 }
 0x862   :  { %v1983_v32 = vsel %vm101_vm1, %v1976_v0, 0.0 }
 0x863   :  { %1984 = vadd.xlane.f32.xlu1 %v1983_v32 }
 0x867   :  { %v4215_v9 = vpop.f32.mrf.mxu2 }
 0x868   :  { %v1951_v63 = vsel %vm101_vm1, %v4215_v9, 0.0  ;;  %v1977_v15 = vmul.f32 %v4215_v9, %v4215_v9 }
 0x869   :  { %1952 = vadd.xlane.f32.xlu0 %v1951_v63 }
 0x86a   :  { %v1986_v52 = vsel %vm101_vm1, %v1977_v15, 0.0 }
 0x86b   :  { %1987 = vadd.xlane.f32.xlu2 %v1986_v52 }
 0x86f   :  { %v4222_v59 = vpop.f32.mrf.mxu2 }
 0x870   :  { %v1954_v7 = vsel %vm101_vm1, %v4222_v59, 0.0  ;;  %v1978_v12 = vmul.f32 %v4222_v59, %v4222_v59 }
 0x871   :  { %1955 = vadd.xlane.f32.xlu0 %v1954_v7 }
 0x872   :  { %v1989_v28 = vsel %vm101_vm1, %v1978_v12, 0.0 }
 0x873   :  { %1990 = vadd.xlane.f32.xlu2 %v1989_v28 }
 0x877   :  { %v4229_v58 = vpop.f32.mrf.mxu2 }
 0x878   :  { %v1957_v54 = vsel %vm101_vm1, %v4229_v58, 0.0  ;;  %v1979_v40 = vmul.f32 %v4229_v58, %v4229_v58 }
 0x879   :  { %1958 = vadd.xlane.f32.xlu1 %v1957_v54 }
 0x87a   :  { %v1992_v4 = vsel %vm101_vm1, %v1979_v40, 0.0 }
 0x87b   :  { %1993 = vadd.xlane.f32.xlu0 %v1992_v4 }
 0x87f   :  { %v4236_v5 = vpop.f32.mrf.mxu2 }
 0x880   :  { %v1960_v23 = vsel %vm101_vm1, %v4236_v5, 0.0  ;;  %v1980_v34 = vmul.f32 %v4236_v5, %v4236_v5 }
 0x881   :  { %1961 = vadd.xlane.f32.xlu1 %v1960_v23 }
 0x882   :  { %v1995_v25 = vsel %vm101_vm1, %v1980_v34, 0.0 }
 0x883   :  { %1996 = vadd.xlane.f32.xlu0 %v1995_v25 }
 0x887   :  { %v4243_v57 = vpop.f32.mrf.mxu2 }
 0x888   :  { %v1963_v20 = vsel %vm101_vm1, %v4243_v57, 0.0  ;;  %v1981_v22 = vmul.f32 %v4243_v57, %v4243_v57 }
 0x889   :  { %1964 = vadd.xlane.f32.xlu2 %v1963_v20 }
 0x88a   :  { %v1998_v51 = vsel %vm101_vm1, %v1981_v22, 0.0 }
 0x88b   :  { %1999 = vadd.xlane.f32.xlu1 %v1998_v51 }
 0x88f   :  { %v4250_v27 = vpop.f32.mrf.mxu2 }
 0x890   :  { %v1966_v19 = vsel %vm231_vm4, %v4250_v27, 0.0  ;;  %v1982_v49 = vmul.f32 %v4250_v27, %v4250_v27 }
 0x891   :  { %1967 = vadd.xlane.f32.xlu2 %v1966_v19 }
 0x892   :  { %v2001_v50 = vsel %vm231_vm4, %v1982_v49, 0.0 }
 0x893   :  { %2002 = vadd.xlane.f32.xlu0 %v2001_v50 }
 0x897   :  { %v1946_v31 = vpop.f32.mrf.mxu2 }
 0x8d4   :  { %v1950_v24 = vpop.xlane.xlu2 %1949 }
 0x8d5   :  { %v1969_v10 = vmul.f32 %v1950_v24, %v2676_v18 }
 0x8d6   :  { %v1985_v6 = vpop.xlane.xlu1 %1984 }
 0x8d7   :  { %v2011_v37 = vmul.f32 %v1969_v10, %v1969_v10  ;;  %v2004_v42 = vmul.f32 %v1985_v6, %v2676_v18  ;;  %v2032_v31 = vsub.f32 %v4208_v45, %v1969_v10 }
 0x8d9   :  { %v2018_v17 = vsub.f32 %v2004_v42, %v2011_v37 }
 0x8db   :  { %v2025_v14 = vmax.f32 %v2018_v17, 0.0 }
 0x8dc   :  { %v1953_v33 = vpop.xlane.xlu0 %1952 }
 0x8dd   :  { %v2039_v41 = vadd.f32 1e-05, %v2025_v14  ;;  %v1970_v36 = vmul.f32 %v1953_v33, %v2676_v18 }
 0x8de   :  { %v1988_v44 = vpop.xlane.xlu2 %1987 }
 0x8df   :  { %2442 = vrsqrt.f32 %v2039_v41  ;;  %v2012_v11 = vmul.f32 %v1970_v36, %v1970_v36  ;;  %v2005_v16 = vmul.f32 %v1988_v44, %v2676_v18  ;;  %vm2052_vm4 = vweird.f32 %v2039_v41 }
 0x8e1   :  { %v2019_v29 = vsub.f32 %v2005_v16, %v2012_v11 }
 0x8e3   :  { %v2026_v62 = vmax.f32 %v2019_v29, 0.0 }
 0x8e4   :  { %v1956_v8 = vpop.xlane.xlu0 %1955 }
 0x8e5   :  { %v2443_v60 = vpop.eup %2442  ;;  %v4262_v56 = vmul.f32 %v1956_v8, %v2676_v18  ;;  %v2040_v46 = vadd.f32 1e-05, %v2026_v62 }
 0x8e6   :  { %v2047_v13 = vmul.f32 %v2443_v60, %v2039_v41  ;;  %v1991_v55 = vpop.xlane.xlu2 %1990  ;;  %vm2053_vm3 = vweird.f32 %v2443_v60  ;;  %v2033_v41 = vsub.f32 %v4215_v9, %v1970_v36 }
 0x8e7   :  { %v2013_v21 = vmul.f32 %v4262_v56, %v4262_v56  ;;  %v2006_v61 = vmul.f32 %v1991_v55, %v2676_v18  ;;  %2444 = vrsqrt.f32 %v2040_v46  ;;  %vm4273_vm14 = vmor %vm2052_vm4, %vm2053_vm3  ;;  %vm2062_vm5 = vweird.f32 %v2040_v46 }
 0x8e8   :  { %v2048_v43 = vmul.f32 %v2443_v60, %v2047_v13 }
 0x8e9   :  { %v2020_v2 = vsub.f32 %v2006_v61, %v2013_v21 }
 0x8ea   :  { %v2049_v38 = vmul.f32 0.5, %v2048_v43 }
 0x8eb   :  { %v2027_v48 = vmax.f32 %v2020_v2, 0.0 }
 0x8ec   :  { %v1959_v0 = vpop.xlane.xlu1 %1958  ;;  %v2050_v32 = vsub.f32 1.5, %v2049_v38 }
 0x8ed   :  { %v2041_v63 = vadd.f32 1e-05, %v2027_v48  ;;  %v4268_v15 = vmul.f32 %v1959_v0, %v2676_v18  ;;  %v2445_v52 = vpop.eup %2444 }
 0x8ee   :  { %v1994_v7 = vpop.xlane.xlu0 %1993  ;;  %v2057_v12 = vmul.f32 %v2445_v52, %v2040_v46  ;;  %v2051_v40 = vmul.f32 %v2443_v60, %v2050_v32  ;;  %vm2063_vm15 = vweird.f32 %v2445_v52 }
 0x8ef   :  { %2446 = vrsqrt.f32 %v2041_v63  ;;  %v2014_v28 = vmul.f32 %v4268_v15, %v4268_v15  ;;  %v2007_v54 = vmul.f32 %v1994_v7, %v2676_v18  ;;  %vm2064_vm6 = vmor %vm2062_vm5, %vm2063_vm15  ;;  %vm2072_vm8 = vweird.f32 %v2041_v63 }
 0x8f0   :  { %v2058_v4 = vmul.f32 %v2445_v52, %v2057_v12  ;;  %v2055_v19 = vsel %vm4273_vm14, %v2443_v60, %v2051_v40  ;;  %v2034_v40 = vsub.f32 %v4222_v59, %v4262_v56 }
 0x8f1   :  { %v2021_v23 = vsub.f32 %v2007_v54, %v2014_v28  ;;  %v2116_v33 = vmul.f32 %v2055_v19, %v2032_v31 }
 0x8f2   :  { %v2059_v34 = vmul.f32 0.5, %v2058_v4 }
 0x8f3   :  { %v2028_v20 = vmax.f32 %v2021_v23, 0.0  ;;  %v2123_v8 = vadd.f32 %v2116_v33, %v4187_v47 }
 0x8f4   :  { %v1962_v22 = vpop.xlane.xlu1 %1961  ;;  %v2060_v49 = vsub.f32 1.5, %v2059_v34 }
 0x8f5   :  { %v4277_v51 = vpop.eup %2446  ;;  %v4282_v50 = vmul.f32 %v1962_v22, %v2676_v18  ;;  %v2042_v6 = vadd.f32 1e-05, %v2028_v20  ;;  %v2035_v22 = vsub.f32 %v4229_v58, %v4268_v15 }
 0x8f6   :  { %v2067_v24 = vmul.f32 %v4277_v51, %v2041_v63  ;;  %v1997_v37 = vpop.xlane.xlu0 %1996  ;;  %v2061_v42 = vmul.f32 %v2445_v52, %v2060_v49  ;;  %vm2073_vm7 = vweird.f32 %v4277_v51 }
 0x8f7   :  { %v2015_v17 = vmul.f32 %v4282_v50, %v4282_v50  ;;  %v2008_v14 = vmul.f32 %v1997_v37, %v2676_v18  ;;  %2448 = vrsqrt.f32 %v2042_v6  ;;  %vm4302_vm9 = vmor %vm2072_vm8, %vm2073_vm7  ;;  %vm2082_vm2 = vweird.f32 %v2042_v6 }
 0x8f8   :  { %v2068_v44 = vmul.f32 %v4277_v51, %v2067_v24  ;;  %v2065_v11 = vsel %vm2064_vm6, %v2445_v52, %v2061_v42 }
 0x8f9   :  { %v2022_v45 = vsub.f32 %v2008_v14, %v2015_v17  ;;  %v2117_v10 = vmul.f32 %v2065_v11, %v2033_v41 }
 0x8fa   :  { %v2069_v16 = vmul.f32 0.5, %v2068_v44 }
 0x8fb   :  { %v2029_v29 = vmax.f32 %v2022_v45, 0.0  ;;  %v2124_v60 = vadd.f32 %v2117_v10, %v4190_v30 }
 0x8fc   :  { %v1965_v62 = vpop.xlane.xlu2 %1964  ;;  %v2070_v13 = vsub.f32 1.5, %v2069_v16 }
 0x8fd   :  { %v2043_v46 = vadd.f32 1e-05, %v2029_v29  ;;  %v4294_v55 = vmul.f32 %v1965_v62, %v2676_v18  ;;  %v2449_v9 = vpop.eup %2448  ;;  %v2130_v21 = vpack.c.bf16 %v2124_v60, %v2123_v8 }
 0x8fe   :  { %v2000_v36 = vpop.xlane.xlu1 %1999  ;;  %v2077_v61 = vmul.f32 %v2449_v9, %v2042_v6  ;;  %v2071_v47 = vmul.f32 %v4277_v51, %v2070_v13  ;;  %vm2083_vm10 = vweird.f32 %v2449_v9 }
 0x8ff   :  { %2450 = vrsqrt.f32 %v2043_v46  ;;  %v2016_v43 = vmul.f32 %v4294_v55, %v4294_v55  ;;  %v2009_v2 = vmul.f32 %v2000_v36, %v2676_v18  ;;  %2314 = vmatmul.msk.bf16.vlgmr.msra.gmra.mxu3 %vm101_vm1, %v2130_v21  ;;  %vm2084_vm11 = vmor %vm2082_vm2, %vm2083_vm10  ;;  %vm2092_vm0 = vweird.f32 %v2043_v46 }
 0x900   :  { %v2078_v30 = vmul.f32 %v2449_v9, %v2077_v61  ;;  %v2075_v54 = vsel %vm4302_vm9, %v4277_v51, %v2071_v47  ;;  %v2037_v16 = vsub.f32 %v4243_v57, %v4294_v55 }
 0x901   :  { %v2023_v38 = vsub.f32 %v2009_v2, %v2016_v43  ;;  %v2118_v49 = vmul.f32 %v2075_v54, %v2034_v40 }
 0x902   :  { %v2079_v48 = vmul.f32 0.5, %v2078_v30 }
 0x903   :  { %v2030_v32 = vmax.f32 %v2023_v38, 0.0  ;;  %v2125_v56 = vadd.f32 %v2118_v49, %v4178_v39 }
 0x904   :  { %v1968_v52 = vpop.xlane.xlu2 %1967  ;;  %v2080_v12 = vsub.f32 1.5, %v2079_v48 }
 0x905   :  { %v2451_v7 = vpop.eup %2450  ;;  %v1975_v28 = vmul.f32 %v1968_v52, %v2676_v18  ;;  %v2044_v4 = vadd.f32 1e-05, %v2030_v32 }
 0x906   :  { %v2087_v63 = vmul.f32 %v2451_v7, %v2043_v46  ;;  %v2003_v23 = vpop.xlane.xlu0 %2002  ;;  %v2081_v34 = vmul.f32 %v2449_v9, %v2080_v12  ;;  %vm2093_vm12 = vweird.f32 %v2451_v7 }
 0x907   :  { %v2017_v25 = vmul.f32 %v1975_v28, %v1975_v28  ;;  %v2010_v20 = vmul.f32 %v2003_v23, %v2676_v18  ;;  %2452 = vrsqrt.f32 %v2044_v4  ;;  %vm2094_vm13 = vmor %vm2092_vm0, %vm2093_vm12  ;;  %vm2102_vm4 = vweird.f32 %v2044_v4 }
 0x908   :  { %v2088_v19 = vmul.f32 %v2451_v7, %v2087_v63  ;;  %v2085_v51 = vsel %vm2084_vm11, %v2449_v9, %v2081_v34  ;;  %v2038_v57 = vsub.f32 %v4250_v27, %v1975_v28 }
 0x909   :  { %v2024_v31 = vsub.f32 %v2010_v20, %v2017_v25  ;;  %v2119_v37 = vmul.f32 %v2085_v51, %v2035_v22 }
 0x90a   :  { %v2089_v24 = vmul.f32 0.5, %v2088_v19 }
 0x90b   :  { %v2031_v59 = vmax.f32 %v2024_v31, 0.0  ;;  %v2126_v42 = vadd.f32 %v2119_v37, %v4174_v35  ;;  %v2036_v35 = vsub.f32 %v4236_v5, %v4282_v50 }
 0x90c   :  { %v2090_v6 = vsub.f32 1.5, %v2089_v24 }
 0x90d   :  { %v2045_v17 = vadd.f32 1e-05, %v2031_v59  ;;  %v2453_v14 = vpop.eup %2452  ;;  %v2131_v18 = vpack.c.bf16 %v2126_v42, %v2125_v56 }
 0x90e   :  { %v2097_v33 = vmul.f32 %v2453_v14, %v2044_v4  ;;  %v2091_v58 = vmul.f32 %v2451_v7, %v2090_v6  ;;  %vm2103_vm3 = vweird.f32 %v2453_v14 }
 0x90f   :  { %2454 = vrsqrt.f32 %v2045_v17  ;;  %2315 = vmatmul.msk.bf16.gmra.mxu3 %vm101_vm1, %v2131_v18  ;;  %vm2104_vm14 = vmor %vm2102_vm4, %vm2103_vm3  ;;  %vm2112_vm15 = vweird.f32 %v2045_v17 }
 0x910   :  { %v2098_v15 = vmul.f32 %v2453_v14, %v2097_v33  ;;  %v2095_v39 = vsel %vm2094_vm13, %v2451_v7, %v2091_v58 }
 0x911   :  { %v2120_v62 = vmul.f32 %v2095_v39, %v2036_v35 }
 0x912   :  { %v2099_v41 = vmul.f32 0.5, %v2098_v15 }
 0x913   :  { %v2127_v9 = vadd.f32 %v2120_v62, %v4169_v1 }
 0x914   :  { %v2100_v11 = vsub.f32 1.5, %v2099_v41 }
 0x915   :  { %v2455_v44 = vpop.eup %2454 }
 0x916   :  { %v2107_v45 = vmul.f32 %v2455_v44, %v2045_v17  ;;  %v2101_v10 = vmul.f32 %v2453_v14, %v2100_v11  ;;  %vm2113_vm5 = vweird.f32 %v2455_v44 }
 0x917   :  { %vm2114_vm6 = vmor %vm2112_vm15, %vm2113_vm5 }
 0x918   :  { %v2108_v29 = vmul.f32 %v2455_v44, %v2107_v45  ;;  %v2105_v8 = vsel %vm2104_vm14, %v2453_v14, %v2101_v10 }
 0x919   :  { %v2121_v13 = vmul.f32 %v2105_v8, %v2037_v16 }
 0x91a   :  { %v2109_v60 = vmul.f32 0.5, %v2108_v29 }
 0x91b   :  { %v2128_v36 = vadd.f32 %v2121_v13, %v4165_v3 }
 0x91c   :  { %v2110_v46 = vsub.f32 1.5, %v2109_v60 }
 0x91d   :  { %v2132_v21 = vpack.c.bf16 %v2128_v36, %v2127_v9 }
 0x91e   :  { %v2111_v5 = vmul.f32 %v2455_v44, %v2110_v46 }
 0x91f   :  { %2316 = vmatmul.msk.bf16.gmra.mxu3 %vm101_vm1, %v2132_v21 }
 0x920   :  { %v2115_v50 = vsel %vm2114_vm6, %v2455_v44, %v2111_v5 }
 0x921   :  { %v2122_v55 = vmul.f32 %v2115_v50, %v2038_v57 }
 0x923   :  { %v2129_v61 = vadd.f32 %v2122_v55, %v4145_v26 }
 0x925   :  { %v2133_v43 = vpack.c.bf16 %v2129_v61, %v2129_v61 }
 0x92f   :  { %2317 = vmatmul.msk.bf16.gmra.mxu3 %vm101_vm1, %v2133_v43 }
 0x982   :  { %v2155_v2 = vpop.f32.mrf.mxu3 }
 0x983   :  { %v2156_v1 = vadd.f32 %v3952_v53, %v2155_v2 }
 0x985   :  { %2318 = vst [vmem:[%s4367_s11 + $0x38] sm:$0xff] %v2156_v1 }
 0x98a   :  { %v2157_v3 = vpop.f32.mrf.mxu3 }
 0x98b   :  { %v2158_v47 = vadd.f32 %v3952_v53, %v2157_v3 }
 0x98d   :  { %2319 = vst [vmem:[%s4367_s11 + $0x40] sm:$0xff] %v2158_v47 }
 0x992   :  { %v2160_v27 = vpop.f32.mrf.mxu3 }
 0x993   :  { %v2161_v26 = vadd.f32 %v3952_v53, %v2160_v27 }
 0x995   :  { %2320 = vst [vmem:[%s4367_s11 + $0x48] sm:$0xff] %v2161_v26 }
 0x99a   :  { %v2162_v30 = vpop.f32.mrf.mxu3 }
 0x99b   :  { %v2163_v38 = vadd.f32 %v3952_v53, %v2162_v30 }
 0x99d   :  { %2321 = vst [vmem:[%s4367_s11 + $0x50] sm:$0xff] %v2163_v38 }
 0x9a2   :  { %v2165_v48 = vpop.f32.mrf.mxu3 }
 0x9a3   :  { %v2166_v0 = vadd.f32 %v3952_v53, %v2165_v48 }
 0x9a5   :  { %2322 = vst [vmem:[%s4367_s11 + $0x58] sm:$0xff] %v2166_v0 }
 0x9aa   :  { %v2167_v32 = vpop.f32.mrf.mxu3 }
 0x9ab   :  { %v2168_v52 = vadd.f32 %v3952_v53, %v2167_v32 }
 0x9ad   :  { %2323 = vst [vmem:[%s4367_s11 + $0x60] sm:$0xff] %v2168_v52 }
 0x9b2   :  { %v2170_v7 = vpop.f32.mrf.mxu3 }
 0x9b3   :  { %v2171_v12 = vadd.f32 %v3952_v53, %v2170_v7 }
 0x9b5   :  { %2324 = vst [vmem:[%s4367_s11 + $0x68] sm:$0x3] %v2171_v12 }
 0x9ba   :  { %v2172_v28 = vpop.f32.mrf.mxu3 }

</bundles_post_ra>
